<compile_context>
chip_gen: v5e
topology: v5e:2x2
jax: 0.10.0
libtpu: 0.0.40
codegen_flags: <defaults>
</compile_context>

<pallas_src>
import functools

import numpy as np
import jax
import jax.numpy as jnp
from jax.experimental import pallas as pl
from jax.experimental.pallas import tpu as pltpu

INPUT_SIZE = 28
HIDDEN = 64
OUT_DIM = 10


def _reorder_gates(a):
    """PyTorch LSTM gate order (i, f, g, o) -> (i, f, o, g) along axis 0."""
    i, f, g, o = jnp.split(a, 4, axis=0)
    return jnp.concatenate([i, f, o, g], axis=0)


def _pick_t_tile(T, B, max_tile=32):
    """Largest divisor of T (<= max_tile) whose row block (tile*B) is 8-aligned."""
    for cand in range(min(T, max_tile), 0, -1):
        if T % cand == 0 and (cand * B) % 8 == 0:
            return cand
    return T  # fallback: one tile == full sequence (block == full array, always legal)


def rnn_lstm_kernel(x_ref, w_ih_ref, w_hh_ref, b_ref, w_out_ref, b_out_ref,
                    out_ref, h_ref, c_ref, *, t_tile, batch):
    """One grid step = t_tile LSTM time steps over the whole (small) batch.

    x_ref     : (t_tile*batch, INPUT_SIZE)  time-major rows of this tile
    w_ih_ref  : (INPUT_SIZE, 4H)            gate order (i, f, o, g)
    w_hh_ref  : (HIDDEN, 4H)
    b_ref     : (1, 4H)                     (= b_ih + b_hh, reordered)
    w_out_ref : (HIDDEN, OUT_DIM)
    b_out_ref : (1, OUT_DIM)
    out_ref   : (batch, OUT_DIM)            written on the last grid step only
    h_ref/c_ref: (batch, HIDDEN)            VMEM scratch, persists across grid steps
    """
    H = HIDDEN
    t_idx = pl.program_id(0)

    @pl.when(t_idx == 0)
    def _():
        h_ref[...] = jnp.zeros_like(h_ref)
        c_ref[...] = jnp.zeros_like(c_ref)

    # ---- hoisted input projection: one MXU pass for the whole tile ----------
    pre = jnp.dot(x_ref[...], w_ih_ref[...],
                  preferred_element_type=jnp.float32) + b_ref[...]   # (t_tile*B, 4H)

    w_hh = w_hh_ref[...]
    h = h_ref[...]
    c = c_ref[...]

    # ---- serial recurrence: only h @ W_hh on the critical path; fully unrolled
    for s in range(t_tile):
        gates = pre[s * batch:(s + 1) * batch, :] + jnp.dot(
            h, w_hh, preferred_element_type=jnp.float32)             # (B, 4H)
        sig = jax.nn.sigmoid(gates[:, :3 * H])    # i, f, o in one contiguous slab
        i_g = sig[:, 0:H]
        f_g = sig[:, H:2 * H]
        o_g = sig[:, 2 * H:3 * H]
        g_g = jnp.tanh(gates[:, 3 * H:])
        c = f_g * c + i_g * g_g
        h = o_g * jnp.tanh(c)

    h_ref[...] = h
    c_ref[...] = c

    # ---- final Linear on the last hidden state (last grid step only) --------
    @pl.when(t_idx == pl.num_programs(0) - 1)
    def _():
        out = jnp.dot(h, w_out_ref[...],
                      preferred_element_type=jnp.float32) + b_out_ref[...]
        out_ref[...] = out.astype(out_ref.dtype)


def rnn_forward(x, params, *, max_t_tile=32):
    """x: (B, T, INPUT_SIZE) batch-first, like the PyTorch module."""
    w_ih, w_hh, b_ih, b_hh, w_out, b_out = params
    B, T, _ = x.shape
    H = HIDDEN

    t_tile = _pick_t_tile(T, B, max_t_tile)
    n_tiles = T // t_tile

    # Time-major rows (row index = t*B + b) so the per-tile input projection is
    # one plain 2-D matmul inside the kernel (no in-kernel reshapes).
    x_rows = jnp.transpose(x, (1, 0, 2)).reshape(T * B, INPUT_SIZE)

    # Gate reorder (i,f,g,o)->(i,f,o,g), pre-transpose weights, fuse the biases.
    w_ih_t = _reorder_gates(w_ih).T                        # (INPUT_SIZE, 4H)
    w_hh_t = _reorder_gates(w_hh).T                        # (HIDDEN, 4H)
    b = _reorder_gates(b_ih + b_hh).reshape(1, 4 * H)      # (1, 4H)
    w_out_t = w_out.T                                      # (HIDDEN, OUT_DIM)
    b_out_r = b_out.reshape(1, OUT_DIM)                    # (1, OUT_DIM)

    kernel = functools.partial(rnn_lstm_kernel, t_tile=t_tile, batch=B)

    # TODO(synk): for large B add a leading "parallel" batch grid axis so v7x's
    # second TensorCore runs an independent LSTM chain on half the batch.
    return pl.pallas_call(
        kernel,
        out_shape=jax.ShapeDtypeStruct((B, OUT_DIM), jnp.float32),
        grid=(n_tiles,),
        in_specs=[
            pl.BlockSpec((t_tile * B, INPUT_SIZE), lambda t: (t, 0)),
            pl.BlockSpec((INPUT_SIZE, 4 * H), lambda t: (0, 0)),
            pl.BlockSpec((H, 4 * H), lambda t: (0, 0)),
            pl.BlockSpec((1, 4 * H), lambda t: (0, 0)),
            pl.BlockSpec((H, OUT_DIM), lambda t: (0, 0)),
            pl.BlockSpec((1, OUT_DIM), lambda t: (0, 0)),
        ],
        out_specs=pl.BlockSpec((B, OUT_DIM), lambda t: (0, 0)),
        scratch_shapes=[
            pltpu.VMEM((B, H), jnp.float32),   # h carry across grid steps
            pltpu.VMEM((B, H), jnp.float32),   # c carry across grid steps
        ],
        compiler_params=pltpu.CompilerParams(
            dimension_semantics=("arbitrary",)),
    )(x_rows, w_ih_t, w_hh_t, b, w_out_t, b_out_r)


def rnn_forward_ref(x, params):
    """Pure-JAX reference implementation of the PyTorch forward."""
    w_ih, w_hh, b_ih, b_hh, w_out, b_out = params
    B, T, _ = x.shape
    H = HIDDEN
    h = jnp.zeros((B, H), jnp.float32)
    c = jnp.zeros((B, H), jnp.float32)
    for t in range(T):
        gates = x[:, t, :] @ w_ih.T + h @ w_hh.T + b_ih + b_hh
        i_g = jax.nn.sigmoid(gates[:, 0:H])
        f_g = jax.nn.sigmoid(gates[:, H:2 * H])
        g_g = jnp.tanh(gates[:, 2 * H:3 * H])
        o_g = jax.nn.sigmoid(gates[:, 3 * H:4 * H])
        c = f_g * c + i_g * g_g
        h = o_g * jnp.tanh(c)
    return h @ w_out.T + b_out


def init_params(key):
    """Deterministic init mimicking PyTorch's U(-1/sqrt(H), 1/sqrt(H))."""
    ks = jax.random.split(key, 6)
    bound = 1.0 / np.sqrt(HIDDEN)
    w_ih = jax.random.uniform(ks[0], (4 * HIDDEN, INPUT_SIZE), jnp.float32, -bound, bound)
    w_hh = jax.random.uniform(ks[1], (4 * HIDDEN, HIDDEN), jnp.float32, -bound, bound)
    b_ih = jax.random.uniform(ks[2], (4 * HIDDEN,), jnp.float32, -bound, bound)
    b_hh = jax.random.uniform(ks[3], (4 * HIDDEN,), jnp.float32, -bound, bound)
    w_out = jax.random.uniform(ks[4], (OUT_DIM, HIDDEN), jnp.float32, -bound, bound)
    b_out = jax.random.uniform(ks[5], (OUT_DIM,), jnp.float32, -bound, bound)
    return (w_ih, w_hh, b_ih, b_hh, w_out, b_out)


if __name__ == "__main__":
    key = jax.random.PRNGKey(0)
    k_param, k_x1, k_x2 = jax.random.split(key, 3)
    params = init_params(k_param)

    # Case 1: MNIST-row-like shape (batch=2, seq=28, features=28); single T tile.
    x1 = jax.random.normal(k_x1, (2, 28, INPUT_SIZE), jnp.float32)
    out1 = jax.block_until_ready(rnn_forward(x1, params))
    assert out1.shape == (2, OUT_DIM)
    np.testing.assert_allclose(np.asarray(out1),
                               np.asarray(rnn_forward_ref(x1, params)),
                               rtol=1e-5, atol=1e-5)

    # Case 2: longer sequence exercising multi-tile streaming + h/c scratch carry.
    x2 = jax.random.normal(k_x2, (4, 64, INPUT_SIZE), jnp.float32)
    out2 = jax.block_until_ready(rnn_forward(x2, params))
    assert out2.shape == (4, OUT_DIM)
    np.testing.assert_allclose(np.asarray(out2),
                               np.asarray(rnn_forward_ref(x2, params)),
                               rtol=2e-5, atol=2e-5)

    print("KERNEL_OK")
</pallas_src>

<mosaic_0001>
module attributes {stable_mosaic.version = 11 : i64} {
  func.func @rnn_lstm_kernel(%arg0: i32, %arg1: memref<56x28xf32, #tpu.memory_space<vmem>>, %arg2: memref<28x256xf32, #tpu.memory_space<vmem>>, %arg3: memref<64x256xf32, #tpu.memory_space<vmem>>, %arg4: memref<1x256xf32, #tpu.memory_space<vmem>>, %arg5: memref<64x10xf32, #tpu.memory_space<vmem>>, %arg6: memref<1x10xf32, #tpu.memory_space<vmem>>, %arg7: memref<2x10xf32, #tpu.memory_space<vmem>>, %arg8: memref<2x64xf32, #tpu.memory_space<vmem>>, %arg9: memref<2x64xf32, #tpu.memory_space<vmem>>) attributes {dimension_semantics = [#tpu.dimension_semantics<arbitrary>], iteration_bounds = array<i64: 1>, scalar_prefetch = 0 : i64, scratch_operands = 2 : i64, tpu.core_type = #tpu.core_type<tc>, window_params = [{transform_indices = @transform_0, window_bounds = array<i64: 56, 28>}, {pipeline_mode = #tpu.pipeline_mode<synchronous>, transform_indices = @transform_1, window_bounds = array<i64: 28, 256>}, {pipeline_mode = #tpu.pipeline_mode<synchronous>, transform_indices = @transform_2, window_bounds = array<i64: 64, 256>}, {pipeline_mode = #tpu.pipeline_mode<synchronous>, transform_indices = @transform_3, window_bounds = array<i64: 1, 256>}, {pipeline_mode = #tpu.pipeline_mode<synchronous>, transform_indices = @transform_4, window_bounds = array<i64: 64, 10>}, {pipeline_mode = #tpu.pipeline_mode<synchronous>, transform_indices = @transform_5, window_bounds = array<i64: 1, 10>}, {pipeline_mode = #tpu.pipeline_mode<synchronous>, transform_indices = @transform_6, window_bounds = array<i64: 2, 10>}]} {
    %c0_i32 = arith.constant 0 : i32
    %0 = arith.cmpi eq, %arg0, %c0_i32 : i32
    %1 = arith.extui %0 : i1 to i32
    %c0_i32_0 = arith.constant 0 : i32
    %2 = arith.cmpi ne, %1, %c0_i32_0 : i32
    scf.if %2 {
      %cst_74 = arith.constant 0.000000e+00 : f32
      %549 = vector.broadcast %cst_74 : f32 to vector<2x64xf32>
      %c0_75 = arith.constant 0 : index
      %c0_76 = arith.constant 0 : index
      %550 = vector.load %arg8[%c0_75, %c0_76] : memref<2x64xf32, #tpu.memory_space<vmem>>, vector<2x64xf32>
      tpu.vector_store %arg8[%c0_75, %c0_76], %549 {strides = array<i32>} : memref<2x64xf32, #tpu.memory_space<vmem>>, vector<2x64xf32>,
      %cst_77 = arith.constant 0.000000e+00 : f32
      %551 = vector.broadcast %cst_77 : f32 to vector<2x64xf32>
      %c0_78 = arith.constant 0 : index
      %c0_79 = arith.constant 0 : index
      %552 = vector.load %arg9[%c0_78, %c0_79] : memref<2x64xf32, #tpu.memory_space<vmem>>, vector<2x64xf32>
      tpu.vector_store %arg9[%c0_78, %c0_79], %551 {strides = array<i32>} : memref<2x64xf32, #tpu.memory_space<vmem>>, vector<2x64xf32>,
    } else {
    }
    %c0 = arith.constant 0 : index
    %c0_1 = arith.constant 0 : index
    %3 = vector.load %arg1[%c0, %c0_1] : memref<56x28xf32, #tpu.memory_space<vmem>>, vector<56x28xf32>
    %c0_2 = arith.constant 0 : index
    %c0_3 = arith.constant 0 : index
    %4 = vector.load %arg2[%c0_2, %c0_3] : memref<28x256xf32, #tpu.memory_space<vmem>>, vector<28x256xf32>
    %cst = arith.constant dense<0.000000e+00> : vector<56x256xf32>
    %5 = tpu.matmul %3, %4, %cst {dimension_numbers = #tpu.dot_dimension_numbers<[1], [0], [0], [1], [0, 0, 1, 1], [], []>} : vector<56x28xf32>, vector<28x256xf32>, vector<56x256xf32> -> vector<56x256xf32>
    %c0_4 = arith.constant 0 : index
    %c0_5 = arith.constant 0 : index
    %6 = vector.load %arg4[%c0_4, %c0_5] : memref<1x256xf32, #tpu.memory_space<vmem>>, vector<1x256xf32>
    %7 = vector.broadcast %6 : vector<1x256xf32> to vector<56x256xf32>
    %8 = arith.addf %5, %7 : vector<56x256xf32>
    %c0_6 = arith.constant 0 : index
    %c0_7 = arith.constant 0 : index
    %9 = vector.load %arg3[%c0_6, %c0_7] : memref<64x256xf32, #tpu.memory_space<vmem>>, vector<64x256xf32>
    %c0_8 = arith.constant 0 : index
    %c0_9 = arith.constant 0 : index
    %10 = vector.load %arg8[%c0_8, %c0_9] : memref<2x64xf32, #tpu.memory_space<vmem>>, vector<2x64xf32>
    %c0_10 = arith.constant 0 : index
    %c0_11 = arith.constant 0 : index
    %11 = vector.load %arg9[%c0_10, %c0_11] : memref<2x64xf32, #tpu.memory_space<vmem>>, vector<2x64xf32>
    %12 = vector.extract_strided_slice %8 {offsets = [0, 0], sizes = [2, 256], strides = [1, 1]} : vector<56x256xf32> to vector<2x256xf32>
    %cst_12 = arith.constant dense<0.000000e+00> : vector<2x256xf32>
    %13 = tpu.matmul %10, %9, %cst_12 {dimension_numbers = #tpu.dot_dimension_numbers<[1], [0], [0], [1], [0, 0, 1, 1], [], []>} : vector<2x64xf32>, vector<64x256xf32>, vector<2x256xf32> -> vector<2x256xf32>
    %14 = arith.addf %12, %13 : vector<2x256xf32>
    %15 = vector.extract_strided_slice %14 {offsets = [0, 0], sizes = [2, 192], strides = [1, 1]} : vector<2x256xf32> to vector<2x192xf32>
    %16 = arith.negf %15 : vector<2x192xf32>
    %17 = math.exp %16 : vector<2x192xf32>
    %cst_13 = arith.constant 1.000000e+00 : f32
    %18 = vector.broadcast %cst_13 : f32 to vector<2x192xf32>
    %19 = arith.addf %18, %17 : vector<2x192xf32>
    %20 = arith.divf %18, %19 : vector<2x192xf32>
    %21 = vector.extract_strided_slice %20 {offsets = [0, 0], sizes = [2, 64], strides = [1, 1]} : vector<2x192xf32> to vector<2x64xf32>
    %22 = vector.extract_strided_slice %20 {offsets = [0, 64], sizes = [2, 64], strides = [1, 1]} : vector<2x192xf32> to vector<2x64xf32>
    %23 = vector.extract_strided_slice %20 {offsets = [0, 128], sizes = [2, 64], strides = [1, 1]} : vector<2x192xf32> to vector<2x64xf32>
    %24 = vector.extract_strided_slice %14 {offsets = [0, 192], sizes = [2, 64], strides = [1, 1]} : vector<2x256xf32> to vector<2x64xf32>
    %25 = math.tanh %24 : vector<2x64xf32>
    %26 = arith.mulf %22, %11 : vector<2x64xf32>
    %27 = arith.mulf %21, %25 : vector<2x64xf32>
    %28 = arith.addf %26, %27 : vector<2x64xf32>
    %29 = math.tanh %28 : vector<2x64xf32>
    %30 = arith.mulf %23, %29 : vector<2x64xf32>
    %31 = vector.extract_strided_slice %8 {offsets = [2, 0], sizes = [2, 256], strides = [1, 1]} : vector<56x256xf32> to vector<2x256xf32>
    %cst_14 = arith.constant dense<0.000000e+00> : vector<2x256xf32>
    %32 = tpu.matmul %30, %9, %cst_14 {dimension_numbers = #tpu.dot_dimension_numbers<[1], [0], [0], [1], [0, 0, 1, 1], [], []>} : vector<2x64xf32>, vector<64x256xf32>, vector<2x256xf32> -> vector<2x256xf32>
    %33 = arith.addf %31, %32 : vector<2x256xf32>
    %34 = vector.extract_strided_slice %33 {offsets = [0, 0], sizes = [2, 192], strides = [1, 1]} : vector<2x256xf32> to vector<2x192xf32>
    %35 = arith.negf %34 : vector<2x192xf32>
    %36 = math.exp %35 : vector<2x192xf32>
    %cst_15 = arith.constant 1.000000e+00 : f32
    %37 = vector.broadcast %cst_15 : f32 to vector<2x192xf32>
    %38 = arith.addf %37, %36 : vector<2x192xf32>
    %39 = arith.divf %37, %38 : vector<2x192xf32>
    %40 = vector.extract_strided_slice %39 {offsets = [0, 0], sizes = [2, 64], strides = [1, 1]} : vector<2x192xf32> to vector<2x64xf32>
    %41 = vector.extract_strided_slice %39 {offsets = [0, 64], sizes = [2, 64], strides = [1, 1]} : vector<2x192xf32> to vector<2x64xf32>
    %42 = vector.extract_strided_slice %39 {offsets = [0, 128], sizes = [2, 64], strides = [1, 1]} : vector<2x192xf32> to vector<2x64xf32>
    %43 = vector.extract_strided_slice %33 {offsets = [0, 192], sizes = [2, 64], strides = [1, 1]} : vector<2x256xf32> to vector<2x64xf32>
    %44 = math.tanh %43 : vector<2x64xf32>
    %45 = arith.mulf %41, %28 : vector<2x64xf32>
    %46 = arith.mulf %40, %44 : vector<2x64xf32>
    %47 = arith.addf %45, %46 : vector<2x64xf32>
    %48 = math.tanh %47 : vector<2x64xf32>
    %49 = arith.mulf %42, %48 : vector<2x64xf32>
    %50 = vector.extract_strided_slice %8 {offsets = [4, 0], sizes = [2, 256], strides = [1, 1]} : vector<56x256xf32> to vector<2x256xf32>
    %cst_16 = arith.constant dense<0.000000e+00> : vector<2x256xf32>
    %51 = tpu.matmul %49, %9, %cst_16 {dimension_numbers = #tpu.dot_dimension_numbers<[1], [0], [0], [1], [0, 0, 1, 1], [], []>} : vector<2x64xf32>, vector<64x256xf32>, vector<2x256xf32> -> vector<2x256xf32>
    %52 = arith.addf %50, %51 : vector<2x256xf32>
    %53 = vector.extract_strided_slice %52 {offsets = [0, 0], sizes = [2, 192], strides = [1, 1]} : vector<2x256xf32> to vector<2x192xf32>
    %54 = arith.negf %53 : vector<2x192xf32>
    %55 = math.exp %54 : vector<2x192xf32>
    %cst_17 = arith.constant 1.000000e+00 : f32
    %56 = vector.broadcast %cst_17 : f32 to vector<2x192xf32>
    %57 = arith.addf %56, %55 : vector<2x192xf32>
    %58 = arith.divf %56, %57 : vector<2x192xf32>
    %59 = vector.extract_strided_slice %58 {offsets = [0, 0], sizes = [2, 64], strides = [1, 1]} : vector<2x192xf32> to vector<2x64xf32>
    %60 = vector.extract_strided_slice %58 {offsets = [0, 64], sizes = [2, 64], strides = [1, 1]} : vector<2x192xf32> to vector<2x64xf32>
    %61 = vector.extract_strided_slice %58 {offsets = [0, 128], sizes = [2, 64], strides = [1, 1]} : vector<2x192xf32> to vector<2x64xf32>
    %62 = vector.extract_strided_slice %52 {offsets = [0, 192], sizes = [2, 64], strides = [1, 1]} : vector<2x256xf32> to vector<2x64xf32>
    %63 = math.tanh %62 : vector<2x64xf32>
    %64 = arith.mulf %60, %47 : vector<2x64xf32>
    %65 = arith.mulf %59, %63 : vector<2x64xf32>
    %66 = arith.addf %64, %65 : vector<2x64xf32>
    %67 = math.tanh %66 : vector<2x64xf32>
    %68 = arith.mulf %61, %67 : vector<2x64xf32>
    %69 = vector.extract_strided_slice %8 {offsets = [6, 0], sizes = [2, 256], strides = [1, 1]} : vector<56x256xf32> to vector<2x256xf32>
    %cst_18 = arith.constant dense<0.000000e+00> : vector<2x256xf32>
    %70 = tpu.matmul %68, %9, %cst_18 {dimension_numbers = #tpu.dot_dimension_numbers<[1], [0], [0], [1], [0, 0, 1, 1], [], []>} : vector<2x64xf32>, vector<64x256xf32>, vector<2x256xf32> -> vector<2x256xf32>
    %71 = arith.addf %69, %70 : vector<2x256xf32>
    %72 = vector.extract_strided_slice %71 {offsets = [0, 0], sizes = [2, 192], strides = [1, 1]} : vector<2x256xf32> to vector<2x192xf32>
    %73 = arith.negf %72 : vector<2x192xf32>
    %74 = math.exp %73 : vector<2x192xf32>
    %cst_19 = arith.constant 1.000000e+00 : f32
    %75 = vector.broadcast %cst_19 : f32 to vector<2x192xf32>
    %76 = arith.addf %75, %74 : vector<2x192xf32>
    %77 = arith.divf %75, %76 : vector<2x192xf32>
    %78 = vector.extract_strided_slice %77 {offsets = [0, 0], sizes = [2, 64], strides = [1, 1]} : vector<2x192xf32> to vector<2x64xf32>
    %79 = vector.extract_strided_slice %77 {offsets = [0, 64], sizes = [2, 64], strides = [1, 1]} : vector<2x192xf32> to vector<2x64xf32>
    %80 = vector.extract_strided_slice %77 {offsets = [0, 128], sizes = [2, 64], strides = [1, 1]} : vector<2x192xf32> to vector<2x64xf32>
    %81 = vector.extract_strided_slice %71 {offsets = [0, 192], sizes = [2, 64], strides = [1, 1]} : vector<2x256xf32> to vector<2x64xf32>
    %82 = math.tanh %81 : vector<2x64xf32>
    %83 = arith.mulf %79, %66 : vector<2x64xf32>
    %84 = arith.mulf %78, %82 : vector<2x64xf32>
    %85 = arith.addf %83, %84 : vector<2x64xf32>
    %86 = math.tanh %85 : vector<2x64xf32>
    %87 = arith.mulf %80, %86 : vector<2x64xf32>
    %88 = vector.extract_strided_slice %8 {offsets = [8, 0], sizes = [2, 256], strides = [1, 1]} : vector<56x256xf32> to vector<2x256xf32>
    %cst_20 = arith.constant dense<0.000000e+00> : vector<2x256xf32>
    %89 = tpu.matmul %87, %9, %cst_20 {dimension_numbers = #tpu.dot_dimension_numbers<[1], [0], [0], [1], [0, 0, 1, 1], [], []>} : vector<2x64xf32>, vector<64x256xf32>, vector<2x256xf32> -> vector<2x256xf32>
    %90 = arith.addf %88, %89 : vector<2x256xf32>
    %91 = vector.extract_strided_slice %90 {offsets = [0, 0], sizes = [2, 192], strides = [1, 1]} : vector<2x256xf32> to vector<2x192xf32>
    %92 = arith.negf %91 : vector<2x192xf32>
    %93 = math.exp %92 : vector<2x192xf32>
    %cst_21 = arith.constant 1.000000e+00 : f32
    %94 = vector.broadcast %cst_21 : f32 to vector<2x192xf32>
    %95 = arith.addf %94, %93 : vector<2x192xf32>
    %96 = arith.divf %94, %95 : vector<2x192xf32>
    %97 = vector.extract_strided_slice %96 {offsets = [0, 0], sizes = [2, 64], strides = [1, 1]} : vector<2x192xf32> to vector<2x64xf32>
    %98 = vector.extract_strided_slice %96 {offsets = [0, 64], sizes = [2, 64], strides = [1, 1]} : vector<2x192xf32> to vector<2x64xf32>
    %99 = vector.extract_strided_slice %96 {offsets = [0, 128], sizes = [2, 64], strides = [1, 1]} : vector<2x192xf32> to vector<2x64xf32>
    %100 = vector.extract_strided_slice %90 {offsets = [0, 192], sizes = [2, 64], strides = [1, 1]} : vector<2x256xf32> to vector<2x64xf32>
    %101 = math.tanh %100 : vector<2x64xf32>
    %102 = arith.mulf %98, %85 : vector<2x64xf32>
    %103 = arith.mulf %97, %101 : vector<2x64xf32>
    %104 = arith.addf %102, %103 : vector<2x64xf32>
    %105 = math.tanh %104 : vector<2x64xf32>
    %106 = arith.mulf %99, %105 : vector<2x64xf32>
    %107 = vector.extract_strided_slice %8 {offsets = [10, 0], sizes = [2, 256], strides = [1, 1]} : vector<56x256xf32> to vector<2x256xf32>
    %cst_22 = arith.constant dense<0.000000e+00> : vector<2x256xf32>
    %108 = tpu.matmul %106, %9, %cst_22 {dimension_numbers = #tpu.dot_dimension_numbers<[1], [0], [0], [1], [0, 0, 1, 1], [], []>} : vector<2x64xf32>, vector<64x256xf32>, vector<2x256xf32> -> vector<2x256xf32>
    %109 = arith.addf %107, %108 : vector<2x256xf32>
    %110 = vector.extract_strided_slice %109 {offsets = [0, 0], sizes = [2, 192], strides = [1, 1]} : vector<2x256xf32> to vector<2x192xf32>
    %111 = arith.negf %110 : vector<2x192xf32>
    %112 = math.exp %111 : vector<2x192xf32>
    %cst_23 = arith.constant 1.000000e+00 : f32
    %113 = vector.broadcast %cst_23 : f32 to vector<2x192xf32>
    %114 = arith.addf %113, %112 : vector<2x192xf32>
    %115 = arith.divf %113, %114 : vector<2x192xf32>
    %116 = vector.extract_strided_slice %115 {offsets = [0, 0], sizes = [2, 64], strides = [1, 1]} : vector<2x192xf32> to vector<2x64xf32>
    %117 = vector.extract_strided_slice %115 {offsets = [0, 64], sizes = [2, 64], strides = [1, 1]} : vector<2x192xf32> to vector<2x64xf32>
    %118 = vector.extract_strided_slice %115 {offsets = [0, 128], sizes = [2, 64], strides = [1, 1]} : vector<2x192xf32> to vector<2x64xf32>
    %119 = vector.extract_strided_slice %109 {offsets = [0, 192], sizes = [2, 64], strides = [1, 1]} : vector<2x256xf32> to vector<2x64xf32>
    %120 = math.tanh %119 : vector<2x64xf32>
    %121 = arith.mulf %117, %104 : vector<2x64xf32>
    %122 = arith.mulf %116, %120 : vector<2x64xf32>
    %123 = arith.addf %121, %122 : vector<2x64xf32>
    %124 = math.tanh %123 : vector<2x64xf32>
    %125 = arith.mulf %118, %124 : vector<2x64xf32>
    %126 = vector.extract_strided_slice %8 {offsets = [12, 0], sizes = [2, 256], strides = [1, 1]} : vector<56x256xf32> to vector<2x256xf32>
    %cst_24 = arith.constant dense<0.000000e+00> : vector<2x256xf32>
    %127 = tpu.matmul %125, %9, %cst_24 {dimension_numbers = #tpu.dot_dimension_numbers<[1], [0], [0], [1], [0, 0, 1, 1], [], []>} : vector<2x64xf32>, vector<64x256xf32>, vector<2x256xf32> -> vector<2x256xf32>
    %128 = arith.addf %126, %127 : vector<2x256xf32>
    %129 = vector.extract_strided_slice %128 {offsets = [0, 0], sizes = [2, 192], strides = [1, 1]} : vector<2x256xf32> to vector<2x192xf32>
    %130 = arith.negf %129 : vector<2x192xf32>
    %131 = math.exp %130 : vector<2x192xf32>
    %cst_25 = arith.constant 1.000000e+00 : f32
    %132 = vector.broadcast %cst_25 : f32 to vector<2x192xf32>
    %133 = arith.addf %132, %131 : vector<2x192xf32>
    %134 = arith.divf %132, %133 : vector<2x192xf32>
    %135 = vector.extract_strided_slice %134 {offsets = [0, 0], sizes = [2, 64], strides = [1, 1]} : vector<2x192xf32> to vector<2x64xf32>
    %136 = vector.extract_strided_slice %134 {offsets = [0, 64], sizes = [2, 64], strides = [1, 1]} : vector<2x192xf32> to vector<2x64xf32>
    %137 = vector.extract_strided_slice %134 {offsets = [0, 128], sizes = [2, 64], strides = [1, 1]} : vector<2x192xf32> to vector<2x64xf32>
    %138 = vector.extract_strided_slice %128 {offsets = [0, 192], sizes = [2, 64], strides = [1, 1]} : vector<2x256xf32> to vector<2x64xf32>
    %139 = math.tanh %138 : vector<2x64xf32>
    %140 = arith.mulf %136, %123 : vector<2x64xf32>
    %141 = arith.mulf %135, %139 : vector<2x64xf32>
    %142 = arith.addf %140, %141 : vector<2x64xf32>
    %143 = math.tanh %142 : vector<2x64xf32>
    %144 = arith.mulf %137, %143 : vector<2x64xf32>
    %145 = vector.extract_strided_slice %8 {offsets = [14, 0], sizes = [2, 256], strides = [1, 1]} : vector<56x256xf32> to vector<2x256xf32>
    %cst_26 = arith.constant dense<0.000000e+00> : vector<2x256xf32>
    %146 = tpu.matmul %144, %9, %cst_26 {dimension_numbers = #tpu.dot_dimension_numbers<[1], [0], [0], [1], [0, 0, 1, 1], [], []>} : vector<2x64xf32>, vector<64x256xf32>, vector<2x256xf32> -> vector<2x256xf32>
    %147 = arith.addf %145, %146 : vector<2x256xf32>
    %148 = vector.extract_strided_slice %147 {offsets = [0, 0], sizes = [2, 192], strides = [1, 1]} : vector<2x256xf32> to vector<2x192xf32>
    %149 = arith.negf %148 : vector<2x192xf32>
    %150 = math.exp %149 : vector<2x192xf32>
    %cst_27 = arith.constant 1.000000e+00 : f32
    %151 = vector.broadcast %cst_27 : f32 to vector<2x192xf32>
    %152 = arith.addf %151, %150 : vector<2x192xf32>
    %153 = arith.divf %151, %152 : vector<2x192xf32>
    %154 = vector.extract_strided_slice %153 {offsets = [0, 0], sizes = [2, 64], strides = [1, 1]} : vector<2x192xf32> to vector<2x64xf32>
    %155 = vector.extract_strided_slice %153 {offsets = [0, 64], sizes = [2, 64], strides = [1, 1]} : vector<2x192xf32> to vector<2x64xf32>
    %156 = vector.extract_strided_slice %153 {offsets = [0, 128], sizes = [2, 64], strides = [1, 1]} : vector<2x192xf32> to vector<2x64xf32>
    %157 = vector.extract_strided_slice %147 {offsets = [0, 192], sizes = [2, 64], strides = [1, 1]} : vector<2x256xf32> to vector<2x64xf32>
    %158 = math.tanh %157 : vector<2x64xf32>
    %159 = arith.mulf %155, %142 : vector<2x64xf32>
    %160 = arith.mulf %154, %158 : vector<2x64xf32>
    %161 = arith.addf %159, %160 : vector<2x64xf32>
    %162 = math.tanh %161 : vector<2x64xf32>
    %163 = arith.mulf %156, %162 : vector<2x64xf32>
    %164 = vector.extract_strided_slice %8 {offsets = [16, 0], sizes = [2, 256], strides = [1, 1]} : vector<56x256xf32> to vector<2x256xf32>
    %cst_28 = arith.constant dense<0.000000e+00> : vector<2x256xf32>
    %165 = tpu.matmul %163, %9, %cst_28 {dimension_numbers = #tpu.dot_dimension_numbers<[1], [0], [0], [1], [0, 0, 1, 1], [], []>} : vector<2x64xf32>, vector<64x256xf32>, vector<2x256xf32> -> vector<2x256xf32>
    %166 = arith.addf %164, %165 : vector<2x256xf32>
    %167 = vector.extract_strided_slice %166 {offsets = [0, 0], sizes = [2, 192], strides = [1, 1]} : vector<2x256xf32> to vector<2x192xf32>
    %168 = arith.negf %167 : vector<2x192xf32>
    %169 = math.exp %168 : vector<2x192xf32>
    %cst_29 = arith.constant 1.000000e+00 : f32
    %170 = vector.broadcast %cst_29 : f32 to vector<2x192xf32>
    %171 = arith.addf %170, %169 : vector<2x192xf32>
    %172 = arith.divf %170, %171 : vector<2x192xf32>
    %173 = vector.extract_strided_slice %172 {offsets = [0, 0], sizes = [2, 64], strides = [1, 1]} : vector<2x192xf32> to vector<2x64xf32>
    %174 = vector.extract_strided_slice %172 {offsets = [0, 64], sizes = [2, 64], strides = [1, 1]} : vector<2x192xf32> to vector<2x64xf32>
    %175 = vector.extract_strided_slice %172 {offsets = [0, 128], sizes = [2, 64], strides = [1, 1]} : vector<2x192xf32> to vector<2x64xf32>
    %176 = vector.extract_strided_slice %166 {offsets = [0, 192], sizes = [2, 64], strides = [1, 1]} : vector<2x256xf32> to vector<2x64xf32>
    %177 = math.tanh %176 : vector<2x64xf32>
    %178 = arith.mulf %174, %161 : vector<2x64xf32>
    %179 = arith.mulf %173, %177 : vector<2x64xf32>
    %180 = arith.addf %178, %179 : vector<2x64xf32>
    %181 = math.tanh %180 : vector<2x64xf32>
    %182 = arith.mulf %175, %181 : vector<2x64xf32>
    %183 = vector.extract_strided_slice %8 {offsets = [18, 0], sizes = [2, 256], strides = [1, 1]} : vector<56x256xf32> to vector<2x256xf32>
    %cst_30 = arith.constant dense<0.000000e+00> : vector<2x256xf32>
    %184 = tpu.matmul %182, %9, %cst_30 {dimension_numbers = #tpu.dot_dimension_numbers<[1], [0], [0], [1], [0, 0, 1, 1], [], []>} : vector<2x64xf32>, vector<64x256xf32>, vector<2x256xf32> -> vector<2x256xf32>
    %185 = arith.addf %183, %184 : vector<2x256xf32>
    %186 = vector.extract_strided_slice %185 {offsets = [0, 0], sizes = [2, 192], strides = [1, 1]} : vector<2x256xf32> to vector<2x192xf32>
    %187 = arith.negf %186 : vector<2x192xf32>
    %188 = math.exp %187 : vector<2x192xf32>
    %cst_31 = arith.constant 1.000000e+00 : f32
    %189 = vector.broadcast %cst_31 : f32 to vector<2x192xf32>
    %190 = arith.addf %189, %188 : vector<2x192xf32>
    %191 = arith.divf %189, %190 : vector<2x192xf32>
    %192 = vector.extract_strided_slice %191 {offsets = [0, 0], sizes = [2, 64], strides = [1, 1]} : vector<2x192xf32> to vector<2x64xf32>
    %193 = vector.extract_strided_slice %191 {offsets = [0, 64], sizes = [2, 64], strides = [1, 1]} : vector<2x192xf32> to vector<2x64xf32>
    %194 = vector.extract_strided_slice %191 {offsets = [0, 128], sizes = [2, 64], strides = [1, 1]} : vector<2x192xf32> to vector<2x64xf32>
    %195 = vector.extract_strided_slice %185 {offsets = [0, 192], sizes = [2, 64], strides = [1, 1]} : vector<2x256xf32> to vector<2x64xf32>
    %196 = math.tanh %195 : vector<2x64xf32>
    %197 = arith.mulf %193, %180 : vector<2x64xf32>
    %198 = arith.mulf %192, %196 : vector<2x64xf32>
    %199 = arith.addf %197, %198 : vector<2x64xf32>
    %200 = math.tanh %199 : vector<2x64xf32>
    %201 = arith.mulf %194, %200 : vector<2x64xf32>
    %202 = vector.extract_strided_slice %8 {offsets = [20, 0], sizes = [2, 256], strides = [1, 1]} : vector<56x256xf32> to vector<2x256xf32>
    %cst_32 = arith.constant dense<0.000000e+00> : vector<2x256xf32>
    %203 = tpu.matmul %201, %9, %cst_32 {dimension_numbers = #tpu.dot_dimension_numbers<[1], [0], [0], [1], [0, 0, 1, 1], [], []>} : vector<2x64xf32>, vector<64x256xf32>, vector<2x256xf32> -> vector<2x256xf32>
    %204 = arith.addf %202, %203 : vector<2x256xf32>
    %205 = vector.extract_strided_slice %204 {offsets = [0, 0], sizes = [2, 192], strides = [1, 1]} : vector<2x256xf32> to vector<2x192xf32>
    %206 = arith.negf %205 : vector<2x192xf32>
    %207 = math.exp %206 : vector<2x192xf32>
    %cst_33 = arith.constant 1.000000e+00 : f32
    %208 = vector.broadcast %cst_33 : f32 to vector<2x192xf32>
    %209 = arith.addf %208, %207 : vector<2x192xf32>
    %210 = arith.divf %208, %209 : vector<2x192xf32>
    %211 = vector.extract_strided_slice %210 {offsets = [0, 0], sizes = [2, 64], strides = [1, 1]} : vector<2x192xf32> to vector<2x64xf32>
    %212 = vector.extract_strided_slice %210 {offsets = [0, 64], sizes = [2, 64], strides = [1, 1]} : vector<2x192xf32> to vector<2x64xf32>
    %213 = vector.extract_strided_slice %210 {offsets = [0, 128], sizes = [2, 64], strides = [1, 1]} : vector<2x192xf32> to vector<2x64xf32>
    %214 = vector.extract_strided_slice %204 {offsets = [0, 192], sizes = [2, 64], strides = [1, 1]} : vector<2x256xf32> to vector<2x64xf32>
    %215 = math.tanh %214 : vector<2x64xf32>
    %216 = arith.mulf %212, %199 : vector<2x64xf32>
    %217 = arith.mulf %211, %215 : vector<2x64xf32>
    %218 = arith.addf %216, %217 : vector<2x64xf32>
    %219 = math.tanh %218 : vector<2x64xf32>
    %220 = arith.mulf %213, %219 : vector<2x64xf32>
    %221 = vector.extract_strided_slice %8 {offsets = [22, 0], sizes = [2, 256], strides = [1, 1]} : vector<56x256xf32> to vector<2x256xf32>
    %cst_34 = arith.constant dense<0.000000e+00> : vector<2x256xf32>
    %222 = tpu.matmul %220, %9, %cst_34 {dimension_numbers = #tpu.dot_dimension_numbers<[1], [0], [0], [1], [0, 0, 1, 1], [], []>} : vector<2x64xf32>, vector<64x256xf32>, vector<2x256xf32> -> vector<2x256xf32>
    %223 = arith.addf %221, %222 : vector<2x256xf32>
    %224 = vector.extract_strided_slice %223 {offsets = [0, 0], sizes = [2, 192], strides = [1, 1]} : vector<2x256xf32> to vector<2x192xf32>
    %225 = arith.negf %224 : vector<2x192xf32>
    %226 = math.exp %225 : vector<2x192xf32>
    %cst_35 = arith.constant 1.000000e+00 : f32
    %227 = vector.broadcast %cst_35 : f32 to vector<2x192xf32>
    %228 = arith.addf %227, %226 : vector<2x192xf32>
    %229 = arith.divf %227, %228 : vector<2x192xf32>
    %230 = vector.extract_strided_slice %229 {offsets = [0, 0], sizes = [2, 64], strides = [1, 1]} : vector<2x192xf32> to vector<2x64xf32>
    %231 = vector.extract_strided_slice %229 {offsets = [0, 64], sizes = [2, 64], strides = [1, 1]} : vector<2x192xf32> to vector<2x64xf32>
    %232 = vector.extract_strided_slice %229 {offsets = [0, 128], sizes = [2, 64], strides = [1, 1]} : vector<2x192xf32> to vector<2x64xf32>
    %233 = vector.extract_strided_slice %223 {offsets = [0, 192], sizes = [2, 64], strides = [1, 1]} : vector<2x256xf32> to vector<2x64xf32>
    %234 = math.tanh %233 : vector<2x64xf32>
    %235 = arith.mulf %231, %218 : vector<2x64xf32>
    %236 = arith.mulf %230, %234 : vector<2x64xf32>
    %237 = arith.addf %235, %236 : vector<2x64xf32>
    %238 = math.tanh %237 : vector<2x64xf32>
    %239 = arith.mulf %232, %238 : vector<2x64xf32>
    %240 = vector.extract_strided_slice %8 {offsets = [24, 0], sizes = [2, 256], strides = [1, 1]} : vector<56x256xf32> to vector<2x256xf32>
    %cst_36 = arith.constant dense<0.000000e+00> : vector<2x256xf32>
    %241 = tpu.matmul %239, %9, %cst_36 {dimension_numbers = #tpu.dot_dimension_numbers<[1], [0], [0], [1], [0, 0, 1, 1], [], []>} : vector<2x64xf32>, vector<64x256xf32>, vector<2x256xf32> -> vector<2x256xf32>
    %242 = arith.addf %240, %241 : vector<2x256xf32>
    %243 = vector.extract_strided_slice %242 {offsets = [0, 0], sizes = [2, 192], strides = [1, 1]} : vector<2x256xf32> to vector<2x192xf32>
    %244 = arith.negf %243 : vector<2x192xf32>
    %245 = math.exp %244 : vector<2x192xf32>
    %cst_37 = arith.constant 1.000000e+00 : f32
    %246 = vector.broadcast %cst_37 : f32 to vector<2x192xf32>
    %247 = arith.addf %246, %245 : vector<2x192xf32>
    %248 = arith.divf %246, %247 : vector<2x192xf32>
    %249 = vector.extract_strided_slice %248 {offsets = [0, 0], sizes = [2, 64], strides = [1, 1]} : vector<2x192xf32> to vector<2x64xf32>
    %250 = vector.extract_strided_slice %248 {offsets = [0, 64], sizes = [2, 64], strides = [1, 1]} : vector<2x192xf32> to vector<2x64xf32>
    %251 = vector.extract_strided_slice %248 {offsets = [0, 128], sizes = [2, 64], strides = [1, 1]} : vector<2x192xf32> to vector<2x64xf32>
    %252 = vector.extract_strided_slice %242 {offsets = [0, 192], sizes = [2, 64], strides = [1, 1]} : vector<2x256xf32> to vector<2x64xf32>
    %253 = math.tanh %252 : vector<2x64xf32>
    %254 = arith.mulf %250, %237 : vector<2x64xf32>
    %255 = arith.mulf %249, %253 : vector<2x64xf32>
    %256 = arith.addf %254, %255 : vector<2x64xf32>
    %257 = math.tanh %256 : vector<2x64xf32>
    %258 = arith.mulf %251, %257 : vector<2x64xf32>
    %259 = vector.extract_strided_slice %8 {offsets = [26, 0], sizes = [2, 256], strides = [1, 1]} : vector<56x256xf32> to vector<2x256xf32>
    %cst_38 = arith.constant dense<0.000000e+00> : vector<2x256xf32>
    %260 = tpu.matmul %258, %9, %cst_38 {dimension_numbers = #tpu.dot_dimension_numbers<[1], [0], [0], [1], [0, 0, 1, 1], [], []>} : vector<2x64xf32>, vector<64x256xf32>, vector<2x256xf32> -> vector<2x256xf32>
    %261 = arith.addf %259, %260 : vector<2x256xf32>
    %262 = vector.extract_strided_slice %261 {offsets = [0, 0], sizes = [2, 192], strides = [1, 1]} : vector<2x256xf32> to vector<2x192xf32>
    %263 = arith.negf %262 : vector<2x192xf32>
    %264 = math.exp %263 : vector<2x192xf32>
    %cst_39 = arith.constant 1.000000e+00 : f32
    %265 = vector.broadcast %cst_39 : f32 to vector<2x192xf32>
    %266 = arith.addf %265, %264 : vector<2x192xf32>
    %267 = arith.divf %265, %266 : vector<2x192xf32>
    %268 = vector.extract_strided_slice %267 {offsets = [0, 0], sizes = [2, 64], strides = [1, 1]} : vector<2x192xf32> to vector<2x64xf32>
    %269 = vector.extract_strided_slice %267 {offsets = [0, 64], sizes = [2, 64], strides = [1, 1]} : vector<2x192xf32> to vector<2x64xf32>
    %270 = vector.extract_strided_slice %267 {offsets = [0, 128], sizes = [2, 64], strides = [1, 1]} : vector<2x192xf32> to vector<2x64xf32>
    %271 = vector.extract_strided_slice %261 {offsets = [0, 192], sizes = [2, 64], strides = [1, 1]} : vector<2x256xf32> to vector<2x64xf32>
    %272 = math.tanh %271 : vector<2x64xf32>
    %273 = arith.mulf %269, %256 : vector<2x64xf32>
    %274 = arith.mulf %268, %272 : vector<2x64xf32>
    %275 = arith.addf %273, %274 : vector<2x64xf32>
    %276 = math.tanh %275 : vector<2x64xf32>
    %277 = arith.mulf %270, %276 : vector<2x64xf32>
    %278 = vector.extract_strided_slice %8 {offsets = [28, 0], sizes = [2, 256], strides = [1, 1]} : vector<56x256xf32> to vector<2x256xf32>
    %cst_40 = arith.constant dense<0.000000e+00> : vector<2x256xf32>
    %279 = tpu.matmul %277, %9, %cst_40 {dimension_numbers = #tpu.dot_dimension_numbers<[1], [0], [0], [1], [0, 0, 1, 1], [], []>} : vector<2x64xf32>, vector<64x256xf32>, vector<2x256xf32> -> vector<2x256xf32>
    %280 = arith.addf %278, %279 : vector<2x256xf32>
    %281 = vector.extract_strided_slice %280 {offsets = [0, 0], sizes = [2, 192], strides = [1, 1]} : vector<2x256xf32> to vector<2x192xf32>
    %282 = arith.negf %281 : vector<2x192xf32>
    %283 = math.exp %282 : vector<2x192xf32>
    %cst_41 = arith.constant 1.000000e+00 : f32
    %284 = vector.broadcast %cst_41 : f32 to vector<2x192xf32>
    %285 = arith.addf %284, %283 : vector<2x192xf32>
    %286 = arith.divf %284, %285 : vector<2x192xf32>
    %287 = vector.extract_strided_slice %286 {offsets = [0, 0], sizes = [2, 64], strides = [1, 1]} : vector<2x192xf32> to vector<2x64xf32>
    %288 = vector.extract_strided_slice %286 {offsets = [0, 64], sizes = [2, 64], strides = [1, 1]} : vector<2x192xf32> to vector<2x64xf32>
    %289 = vector.extract_strided_slice %286 {offsets = [0, 128], sizes = [2, 64], strides = [1, 1]} : vector<2x192xf32> to vector<2x64xf32>
    %290 = vector.extract_strided_slice %280 {offsets = [0, 192], sizes = [2, 64], strides = [1, 1]} : vector<2x256xf32> to vector<2x64xf32>
    %291 = math.tanh %290 : vector<2x64xf32>
    %292 = arith.mulf %288, %275 : vector<2x64xf32>
    %293 = arith.mulf %287, %291 : vector<2x64xf32>
    %294 = arith.addf %292, %293 : vector<2x64xf32>
    %295 = math.tanh %294 : vector<2x64xf32>
    %296 = arith.mulf %289, %295 : vector<2x64xf32>
    %297 = vector.extract_strided_slice %8 {offsets = [30, 0], sizes = [2, 256], strides = [1, 1]} : vector<56x256xf32> to vector<2x256xf32>
    %cst_42 = arith.constant dense<0.000000e+00> : vector<2x256xf32>
    %298 = tpu.matmul %296, %9, %cst_42 {dimension_numbers = #tpu.dot_dimension_numbers<[1], [0], [0], [1], [0, 0, 1, 1], [], []>} : vector<2x64xf32>, vector<64x256xf32>, vector<2x256xf32> -> vector<2x256xf32>
    %299 = arith.addf %297, %298 : vector<2x256xf32>
    %300 = vector.extract_strided_slice %299 {offsets = [0, 0], sizes = [2, 192], strides = [1, 1]} : vector<2x256xf32> to vector<2x192xf32>
    %301 = arith.negf %300 : vector<2x192xf32>
    %302 = math.exp %301 : vector<2x192xf32>
    %cst_43 = arith.constant 1.000000e+00 : f32
    %303 = vector.broadcast %cst_43 : f32 to vector<2x192xf32>
    %304 = arith.addf %303, %302 : vector<2x192xf32>
    %305 = arith.divf %303, %304 : vector<2x192xf32>
    %306 = vector.extract_strided_slice %305 {offsets = [0, 0], sizes = [2, 64], strides = [1, 1]} : vector<2x192xf32> to vector<2x64xf32>
    %307 = vector.extract_strided_slice %305 {offsets = [0, 64], sizes = [2, 64], strides = [1, 1]} : vector<2x192xf32> to vector<2x64xf32>
    %308 = vector.extract_strided_slice %305 {offsets = [0, 128], sizes = [2, 64], strides = [1, 1]} : vector<2x192xf32> to vector<2x64xf32>
    %309 = vector.extract_strided_slice %299 {offsets = [0, 192], sizes = [2, 64], strides = [1, 1]} : vector<2x256xf32> to vector<2x64xf32>
    %310 = math.tanh %309 : vector<2x64xf32>
    %311 = arith.mulf %307, %294 : vector<2x64xf32>
    %312 = arith.mulf %306, %310 : vector<2x64xf32>
    %313 = arith.addf %311, %312 : vector<2x64xf32>
    %314 = math.tanh %313 : vector<2x64xf32>
    %315 = arith.mulf %308, %314 : vector<2x64xf32>
    %316 = vector.extract_strided_slice %8 {offsets = [32, 0], sizes = [2, 256], strides = [1, 1]} : vector<56x256xf32> to vector<2x256xf32>
    %cst_44 = arith.constant dense<0.000000e+00> : vector<2x256xf32>
    %317 = tpu.matmul %315, %9, %cst_44 {dimension_numbers = #tpu.dot_dimension_numbers<[1], [0], [0], [1], [0, 0, 1, 1], [], []>} : vector<2x64xf32>, vector<64x256xf32>, vector<2x256xf32> -> vector<2x256xf32>
    %318 = arith.addf %316, %317 : vector<2x256xf32>
    %319 = vector.extract_strided_slice %318 {offsets = [0, 0], sizes = [2, 192], strides = [1, 1]} : vector<2x256xf32> to vector<2x192xf32>
    %320 = arith.negf %319 : vector<2x192xf32>
    %321 = math.exp %320 : vector<2x192xf32>
    %cst_45 = arith.constant 1.000000e+00 : f32
    %322 = vector.broadcast %cst_45 : f32 to vector<2x192xf32>
    %323 = arith.addf %322, %321 : vector<2x192xf32>
    %324 = arith.divf %322, %323 : vector<2x192xf32>
    %325 = vector.extract_strided_slice %324 {offsets = [0, 0], sizes = [2, 64], strides = [1, 1]} : vector<2x192xf32> to vector<2x64xf32>
    %326 = vector.extract_strided_slice %324 {offsets = [0, 64], sizes = [2, 64], strides = [1, 1]} : vector<2x192xf32> to vector<2x64xf32>
    %327 = vector.extract_strided_slice %324 {offsets = [0, 128], sizes = [2, 64], strides = [1, 1]} : vector<2x192xf32> to vector<2x64xf32>
    %328 = vector.extract_strided_slice %318 {offsets = [0, 192], sizes = [2, 64], strides = [1, 1]} : vector<2x256xf32> to vector<2x64xf32>
    %329 = math.tanh %328 : vector<2x64xf32>
    %330 = arith.mulf %326, %313 : vector<2x64xf32>
    %331 = arith.mulf %325, %329 : vector<2x64xf32>
    %332 = arith.addf %330, %331 : vector<2x64xf32>
    %333 = math.tanh %332 : vector<2x64xf32>
    %334 = arith.mulf %327, %333 : vector<2x64xf32>
    %335 = vector.extract_strided_slice %8 {offsets = [34, 0], sizes = [2, 256], strides = [1, 1]} : vector<56x256xf32> to vector<2x256xf32>
    %cst_46 = arith.constant dense<0.000000e+00> : vector<2x256xf32>
    %336 = tpu.matmul %334, %9, %cst_46 {dimension_numbers = #tpu.dot_dimension_numbers<[1], [0], [0], [1], [0, 0, 1, 1], [], []>} : vector<2x64xf32>, vector<64x256xf32>, vector<2x256xf32> -> vector<2x256xf32>
    %337 = arith.addf %335, %336 : vector<2x256xf32>
    %338 = vector.extract_strided_slice %337 {offsets = [0, 0], sizes = [2, 192], strides = [1, 1]} : vector<2x256xf32> to vector<2x192xf32>
    %339 = arith.negf %338 : vector<2x192xf32>
    %340 = math.exp %339 : vector<2x192xf32>
    %cst_47 = arith.constant 1.000000e+00 : f32
    %341 = vector.broadcast %cst_47 : f32 to vector<2x192xf32>
    %342 = arith.addf %341, %340 : vector<2x192xf32>
    %343 = arith.divf %341, %342 : vector<2x192xf32>
    %344 = vector.extract_strided_slice %343 {offsets = [0, 0], sizes = [2, 64], strides = [1, 1]} : vector<2x192xf32> to vector<2x64xf32>
    %345 = vector.extract_strided_slice %343 {offsets = [0, 64], sizes = [2, 64], strides = [1, 1]} : vector<2x192xf32> to vector<2x64xf32>
    %346 = vector.extract_strided_slice %343 {offsets = [0, 128], sizes = [2, 64], strides = [1, 1]} : vector<2x192xf32> to vector<2x64xf32>
    %347 = vector.extract_strided_slice %337 {offsets = [0, 192], sizes = [2, 64], strides = [1, 1]} : vector<2x256xf32> to vector<2x64xf32>
    %348 = math.tanh %347 : vector<2x64xf32>
    %349 = arith.mulf %345, %332 : vector<2x64xf32>
    %350 = arith.mulf %344, %348 : vector<2x64xf32>
    %351 = arith.addf %349, %350 : vector<2x64xf32>
    %352 = math.tanh %351 : vector<2x64xf32>
    %353 = arith.mulf %346, %352 : vector<2x64xf32>
    %354 = vector.extract_strided_slice %8 {offsets = [36, 0], sizes = [2, 256], strides = [1, 1]} : vector<56x256xf32> to vector<2x256xf32>
    %cst_48 = arith.constant dense<0.000000e+00> : vector<2x256xf32>
    %355 = tpu.matmul %353, %9, %cst_48 {dimension_numbers = #tpu.dot_dimension_numbers<[1], [0], [0], [1], [0, 0, 1, 1], [], []>} : vector<2x64xf32>, vector<64x256xf32>, vector<2x256xf32> -> vector<2x256xf32>
    %356 = arith.addf %354, %355 : vector<2x256xf32>
    %357 = vector.extract_strided_slice %356 {offsets = [0, 0], sizes = [2, 192], strides = [1, 1]} : vector<2x256xf32> to vector<2x192xf32>
    %358 = arith.negf %357 : vector<2x192xf32>
    %359 = math.exp %358 : vector<2x192xf32>
    %cst_49 = arith.constant 1.000000e+00 : f32
    %360 = vector.broadcast %cst_49 : f32 to vector<2x192xf32>
    %361 = arith.addf %360, %359 : vector<2x192xf32>
    %362 = arith.divf %360, %361 : vector<2x192xf32>
    %363 = vector.extract_strided_slice %362 {offsets = [0, 0], sizes = [2, 64], strides = [1, 1]} : vector<2x192xf32> to vector<2x64xf32>
    %364 = vector.extract_strided_slice %362 {offsets = [0, 64], sizes = [2, 64], strides = [1, 1]} : vector<2x192xf32> to vector<2x64xf32>
    %365 = vector.extract_strided_slice %362 {offsets = [0, 128], sizes = [2, 64], strides = [1, 1]} : vector<2x192xf32> to vector<2x64xf32>
    %366 = vector.extract_strided_slice %356 {offsets = [0, 192], sizes = [2, 64], strides = [1, 1]} : vector<2x256xf32> to vector<2x64xf32>
    %367 = math.tanh %366 : vector<2x64xf32>
    %368 = arith.mulf %364, %351 : vector<2x64xf32>
    %369 = arith.mulf %363, %367 : vector<2x64xf32>
    %370 = arith.addf %368, %369 : vector<2x64xf32>
    %371 = math.tanh %370 : vector<2x64xf32>
    %372 = arith.mulf %365, %371 : vector<2x64xf32>
    %373 = vector.extract_strided_slice %8 {offsets = [38, 0], sizes = [2, 256], strides = [1, 1]} : vector<56x256xf32> to vector<2x256xf32>
    %cst_50 = arith.constant dense<0.000000e+00> : vector<2x256xf32>
    %374 = tpu.matmul %372, %9, %cst_50 {dimension_numbers = #tpu.dot_dimension_numbers<[1], [0], [0], [1], [0, 0, 1, 1], [], []>} : vector<2x64xf32>, vector<64x256xf32>, vector<2x256xf32> -> vector<2x256xf32>
    %375 = arith.addf %373, %374 : vector<2x256xf32>
    %376 = vector.extract_strided_slice %375 {offsets = [0, 0], sizes = [2, 192], strides = [1, 1]} : vector<2x256xf32> to vector<2x192xf32>
    %377 = arith.negf %376 : vector<2x192xf32>
    %378 = math.exp %377 : vector<2x192xf32>
    %cst_51 = arith.constant 1.000000e+00 : f32
    %379 = vector.broadcast %cst_51 : f32 to vector<2x192xf32>
    %380 = arith.addf %379, %378 : vector<2x192xf32>
    %381 = arith.divf %379, %380 : vector<2x192xf32>
    %382 = vector.extract_strided_slice %381 {offsets = [0, 0], sizes = [2, 64], strides = [1, 1]} : vector<2x192xf32> to vector<2x64xf32>
    %383 = vector.extract_strided_slice %381 {offsets = [0, 64], sizes = [2, 64], strides = [1, 1]} : vector<2x192xf32> to vector<2x64xf32>
    %384 = vector.extract_strided_slice %381 {offsets = [0, 128], sizes = [2, 64], strides = [1, 1]} : vector<2x192xf32> to vector<2x64xf32>
    %385 = vector.extract_strided_slice %375 {offsets = [0, 192], sizes = [2, 64], strides = [1, 1]} : vector<2x256xf32> to vector<2x64xf32>
    %386 = math.tanh %385 : vector<2x64xf32>
    %387 = arith.mulf %383, %370 : vector<2x64xf32>
    %388 = arith.mulf %382, %386 : vector<2x64xf32>
    %389 = arith.addf %387, %388 : vector<2x64xf32>
    %390 = math.tanh %389 : vector<2x64xf32>
    %391 = arith.mulf %384, %390 : vector<2x64xf32>
    %392 = vector.extract_strided_slice %8 {offsets = [40, 0], sizes = [2, 256], strides = [1, 1]} : vector<56x256xf32> to vector<2x256xf32>
    %cst_52 = arith.constant dense<0.000000e+00> : vector<2x256xf32>
    %393 = tpu.matmul %391, %9, %cst_52 {dimension_numbers = #tpu.dot_dimension_numbers<[1], [0], [0], [1], [0, 0, 1, 1], [], []>} : vector<2x64xf32>, vector<64x256xf32>, vector<2x256xf32> -> vector<2x256xf32>
    %394 = arith.addf %392, %393 : vector<2x256xf32>
    %395 = vector.extract_strided_slice %394 {offsets = [0, 0], sizes = [2, 192], strides = [1, 1]} : vector<2x256xf32> to vector<2x192xf32>
    %396 = arith.negf %395 : vector<2x192xf32>
    %397 = math.exp %396 : vector<2x192xf32>
    %cst_53 = arith.constant 1.000000e+00 : f32
    %398 = vector.broadcast %cst_53 : f32 to vector<2x192xf32>
    %399 = arith.addf %398, %397 : vector<2x192xf32>
    %400 = arith.divf %398, %399 : vector<2x192xf32>
    %401 = vector.extract_strided_slice %400 {offsets = [0, 0], sizes = [2, 64], strides = [1, 1]} : vector<2x192xf32> to vector<2x64xf32>
    %402 = vector.extract_strided_slice %400 {offsets = [0, 64], sizes = [2, 64], strides = [1, 1]} : vector<2x192xf32> to vector<2x64xf32>
    %403 = vector.extract_strided_slice %400 {offsets = [0, 128], sizes = [2, 64], strides = [1, 1]} : vector<2x192xf32> to vector<2x64xf32>
    %404 = vector.extract_strided_slice %394 {offsets = [0, 192], sizes = [2, 64], strides = [1, 1]} : vector<2x256xf32> to vector<2x64xf32>
    %405 = math.tanh %404 : vector<2x64xf32>
    %406 = arith.mulf %402, %389 : vector<2x64xf32>
    %407 = arith.mulf %401, %405 : vector<2x64xf32>
    %408 = arith.addf %406, %407 : vector<2x64xf32>
    %409 = math.tanh %408 : vector<2x64xf32>
    %410 = arith.mulf %403, %409 : vector<2x64xf32>
    %411 = vector.extract_strided_slice %8 {offsets = [42, 0], sizes = [2, 256], strides = [1, 1]} : vector<56x256xf32> to vector<2x256xf32>
    %cst_54 = arith.constant dense<0.000000e+00> : vector<2x256xf32>
    %412 = tpu.matmul %410, %9, %cst_54 {dimension_numbers = #tpu.dot_dimension_numbers<[1], [0], [0], [1], [0, 0, 1, 1], [], []>} : vector<2x64xf32>, vector<64x256xf32>, vector<2x256xf32> -> vector<2x256xf32>
    %413 = arith.addf %411, %412 : vector<2x256xf32>
    %414 = vector.extract_strided_slice %413 {offsets = [0, 0], sizes = [2, 192], strides = [1, 1]} : vector<2x256xf32> to vector<2x192xf32>
    %415 = arith.negf %414 : vector<2x192xf32>
    %416 = math.exp %415 : vector<2x192xf32>
    %cst_55 = arith.constant 1.000000e+00 : f32
    %417 = vector.broadcast %cst_55 : f32 to vector<2x192xf32>
    %418 = arith.addf %417, %416 : vector<2x192xf32>
    %419 = arith.divf %417, %418 : vector<2x192xf32>
    %420 = vector.extract_strided_slice %419 {offsets = [0, 0], sizes = [2, 64], strides = [1, 1]} : vector<2x192xf32> to vector<2x64xf32>
    %421 = vector.extract_strided_slice %419 {offsets = [0, 64], sizes = [2, 64], strides = [1, 1]} : vector<2x192xf32> to vector<2x64xf32>
    %422 = vector.extract_strided_slice %419 {offsets = [0, 128], sizes = [2, 64], strides = [1, 1]} : vector<2x192xf32> to vector<2x64xf32>
    %423 = vector.extract_strided_slice %413 {offsets = [0, 192], sizes = [2, 64], strides = [1, 1]} : vector<2x256xf32> to vector<2x64xf32>
    %424 = math.tanh %423 : vector<2x64xf32>
    %425 = arith.mulf %421, %408 : vector<2x64xf32>
    %426 = arith.mulf %420, %424 : vector<2x64xf32>
    %427 = arith.addf %425, %426 : vector<2x64xf32>
    %428 = math.tanh %427 : vector<2x64xf32>
    %429 = arith.mulf %422, %428 : vector<2x64xf32>
    %430 = vector.extract_strided_slice %8 {offsets = [44, 0], sizes = [2, 256], strides = [1, 1]} : vector<56x256xf32> to vector<2x256xf32>
    %cst_56 = arith.constant dense<0.000000e+00> : vector<2x256xf32>
    %431 = tpu.matmul %429, %9, %cst_56 {dimension_numbers = #tpu.dot_dimension_numbers<[1], [0], [0], [1], [0, 0, 1, 1], [], []>} : vector<2x64xf32>, vector<64x256xf32>, vector<2x256xf32> -> vector<2x256xf32>
    %432 = arith.addf %430, %431 : vector<2x256xf32>
    %433 = vector.extract_strided_slice %432 {offsets = [0, 0], sizes = [2, 192], strides = [1, 1]} : vector<2x256xf32> to vector<2x192xf32>
    %434 = arith.negf %433 : vector<2x192xf32>
    %435 = math.exp %434 : vector<2x192xf32>
    %cst_57 = arith.constant 1.000000e+00 : f32
    %436 = vector.broadcast %cst_57 : f32 to vector<2x192xf32>
    %437 = arith.addf %436, %435 : vector<2x192xf32>
    %438 = arith.divf %436, %437 : vector<2x192xf32>
    %439 = vector.extract_strided_slice %438 {offsets = [0, 0], sizes = [2, 64], strides = [1, 1]} : vector<2x192xf32> to vector<2x64xf32>
    %440 = vector.extract_strided_slice %438 {offsets = [0, 64], sizes = [2, 64], strides = [1, 1]} : vector<2x192xf32> to vector<2x64xf32>
    %441 = vector.extract_strided_slice %438 {offsets = [0, 128], sizes = [2, 64], strides = [1, 1]} : vector<2x192xf32> to vector<2x64xf32>
    %442 = vector.extract_strided_slice %432 {offsets = [0, 192], sizes = [2, 64], strides = [1, 1]} : vector<2x256xf32> to vector<2x64xf32>
    %443 = math.tanh %442 : vector<2x64xf32>
    %444 = arith.mulf %440, %427 : vector<2x64xf32>
    %445 = arith.mulf %439, %443 : vector<2x64xf32>
    %446 = arith.addf %444, %445 : vector<2x64xf32>
    %447 = math.tanh %446 : vector<2x64xf32>
    %448 = arith.mulf %441, %447 : vector<2x64xf32>
    %449 = vector.extract_strided_slice %8 {offsets = [46, 0], sizes = [2, 256], strides = [1, 1]} : vector<56x256xf32> to vector<2x256xf32>
    %cst_58 = arith.constant dense<0.000000e+00> : vector<2x256xf32>
    %450 = tpu.matmul %448, %9, %cst_58 {dimension_numbers = #tpu.dot_dimension_numbers<[1], [0], [0], [1], [0, 0, 1, 1], [], []>} : vector<2x64xf32>, vector<64x256xf32>, vector<2x256xf32> -> vector<2x256xf32>
    %451 = arith.addf %449, %450 : vector<2x256xf32>
    %452 = vector.extract_strided_slice %451 {offsets = [0, 0], sizes = [2, 192], strides = [1, 1]} : vector<2x256xf32> to vector<2x192xf32>
    %453 = arith.negf %452 : vector<2x192xf32>
    %454 = math.exp %453 : vector<2x192xf32>
    %cst_59 = arith.constant 1.000000e+00 : f32
    %455 = vector.broadcast %cst_59 : f32 to vector<2x192xf32>
    %456 = arith.addf %455, %454 : vector<2x192xf32>
    %457 = arith.divf %455, %456 : vector<2x192xf32>
    %458 = vector.extract_strided_slice %457 {offsets = [0, 0], sizes = [2, 64], strides = [1, 1]} : vector<2x192xf32> to vector<2x64xf32>
    %459 = vector.extract_strided_slice %457 {offsets = [0, 64], sizes = [2, 64], strides = [1, 1]} : vector<2x192xf32> to vector<2x64xf32>
    %460 = vector.extract_strided_slice %457 {offsets = [0, 128], sizes = [2, 64], strides = [1, 1]} : vector<2x192xf32> to vector<2x64xf32>
    %461 = vector.extract_strided_slice %451 {offsets = [0, 192], sizes = [2, 64], strides = [1, 1]} : vector<2x256xf32> to vector<2x64xf32>
    %462 = math.tanh %461 : vector<2x64xf32>
    %463 = arith.mulf %459, %446 : vector<2x64xf32>
    %464 = arith.mulf %458, %462 : vector<2x64xf32>
    %465 = arith.addf %463, %464 : vector<2x64xf32>
    %466 = math.tanh %465 : vector<2x64xf32>
    %467 = arith.mulf %460, %466 : vector<2x64xf32>
    %468 = vector.extract_strided_slice %8 {offsets = [48, 0], sizes = [2, 256], strides = [1, 1]} : vector<56x256xf32> to vector<2x256xf32>
    %cst_60 = arith.constant dense<0.000000e+00> : vector<2x256xf32>
    %469 = tpu.matmul %467, %9, %cst_60 {dimension_numbers = #tpu.dot_dimension_numbers<[1], [0], [0], [1], [0, 0, 1, 1], [], []>} : vector<2x64xf32>, vector<64x256xf32>, vector<2x256xf32> -> vector<2x256xf32>
    %470 = arith.addf %468, %469 : vector<2x256xf32>
    %471 = vector.extract_strided_slice %470 {offsets = [0, 0], sizes = [2, 192], strides = [1, 1]} : vector<2x256xf32> to vector<2x192xf32>
    %472 = arith.negf %471 : vector<2x192xf32>
    %473 = math.exp %472 : vector<2x192xf32>
    %cst_61 = arith.constant 1.000000e+00 : f32
    %474 = vector.broadcast %cst_61 : f32 to vector<2x192xf32>
    %475 = arith.addf %474, %473 : vector<2x192xf32>
    %476 = arith.divf %474, %475 : vector<2x192xf32>
    %477 = vector.extract_strided_slice %476 {offsets = [0, 0], sizes = [2, 64], strides = [1, 1]} : vector<2x192xf32> to vector<2x64xf32>
    %478 = vector.extract_strided_slice %476 {offsets = [0, 64], sizes = [2, 64], strides = [1, 1]} : vector<2x192xf32> to vector<2x64xf32>
    %479 = vector.extract_strided_slice %476 {offsets = [0, 128], sizes = [2, 64], strides = [1, 1]} : vector<2x192xf32> to vector<2x64xf32>
    %480 = vector.extract_strided_slice %470 {offsets = [0, 192], sizes = [2, 64], strides = [1, 1]} : vector<2x256xf32> to vector<2x64xf32>
    %481 = math.tanh %480 : vector<2x64xf32>
    %482 = arith.mulf %478, %465 : vector<2x64xf32>
    %483 = arith.mulf %477, %481 : vector<2x64xf32>
    %484 = arith.addf %482, %483 : vector<2x64xf32>
    %485 = math.tanh %484 : vector<2x64xf32>
    %486 = arith.mulf %479, %485 : vector<2x64xf32>
    %487 = vector.extract_strided_slice %8 {offsets = [50, 0], sizes = [2, 256], strides = [1, 1]} : vector<56x256xf32> to vector<2x256xf32>
    %cst_62 = arith.constant dense<0.000000e+00> : vector<2x256xf32>
    %488 = tpu.matmul %486, %9, %cst_62 {dimension_numbers = #tpu.dot_dimension_numbers<[1], [0], [0], [1], [0, 0, 1, 1], [], []>} : vector<2x64xf32>, vector<64x256xf32>, vector<2x256xf32> -> vector<2x256xf32>
    %489 = arith.addf %487, %488 : vector<2x256xf32>
    %490 = vector.extract_strided_slice %489 {offsets = [0, 0], sizes = [2, 192], strides = [1, 1]} : vector<2x256xf32> to vector<2x192xf32>
    %491 = arith.negf %490 : vector<2x192xf32>
    %492 = math.exp %491 : vector<2x192xf32>
    %cst_63 = arith.constant 1.000000e+00 : f32
    %493 = vector.broadcast %cst_63 : f32 to vector<2x192xf32>
    %494 = arith.addf %493, %492 : vector<2x192xf32>
    %495 = arith.divf %493, %494 : vector<2x192xf32>
    %496 = vector.extract_strided_slice %495 {offsets = [0, 0], sizes = [2, 64], strides = [1, 1]} : vector<2x192xf32> to vector<2x64xf32>
    %497 = vector.extract_strided_slice %495 {offsets = [0, 64], sizes = [2, 64], strides = [1, 1]} : vector<2x192xf32> to vector<2x64xf32>
    %498 = vector.extract_strided_slice %495 {offsets = [0, 128], sizes = [2, 64], strides = [1, 1]} : vector<2x192xf32> to vector<2x64xf32>
    %499 = vector.extract_strided_slice %489 {offsets = [0, 192], sizes = [2, 64], strides = [1, 1]} : vector<2x256xf32> to vector<2x64xf32>
    %500 = math.tanh %499 : vector<2x64xf32>
    %501 = arith.mulf %497, %484 : vector<2x64xf32>
    %502 = arith.mulf %496, %500 : vector<2x64xf32>
    %503 = arith.addf %501, %502 : vector<2x64xf32>
    %504 = math.tanh %503 : vector<2x64xf32>
    %505 = arith.mulf %498, %504 : vector<2x64xf32>
    %506 = vector.extract_strided_slice %8 {offsets = [52, 0], sizes = [2, 256], strides = [1, 1]} : vector<56x256xf32> to vector<2x256xf32>
    %cst_64 = arith.constant dense<0.000000e+00> : vector<2x256xf32>
    %507 = tpu.matmul %505, %9, %cst_64 {dimension_numbers = #tpu.dot_dimension_numbers<[1], [0], [0], [1], [0, 0, 1, 1], [], []>} : vector<2x64xf32>, vector<64x256xf32>, vector<2x256xf32> -> vector<2x256xf32>
    %508 = arith.addf %506, %507 : vector<2x256xf32>
    %509 = vector.extract_strided_slice %508 {offsets = [0, 0], sizes = [2, 192], strides = [1, 1]} : vector<2x256xf32> to vector<2x192xf32>
    %510 = arith.negf %509 : vector<2x192xf32>
    %511 = math.exp %510 : vector<2x192xf32>
    %cst_65 = arith.constant 1.000000e+00 : f32
    %512 = vector.broadcast %cst_65 : f32 to vector<2x192xf32>
    %513 = arith.addf %512, %511 : vector<2x192xf32>
    %514 = arith.divf %512, %513 : vector<2x192xf32>
    %515 = vector.extract_strided_slice %514 {offsets = [0, 0], sizes = [2, 64], strides = [1, 1]} : vector<2x192xf32> to vector<2x64xf32>
    %516 = vector.extract_strided_slice %514 {offsets = [0, 64], sizes = [2, 64], strides = [1, 1]} : vector<2x192xf32> to vector<2x64xf32>
    %517 = vector.extract_strided_slice %514 {offsets = [0, 128], sizes = [2, 64], strides = [1, 1]} : vector<2x192xf32> to vector<2x64xf32>
    %518 = vector.extract_strided_slice %508 {offsets = [0, 192], sizes = [2, 64], strides = [1, 1]} : vector<2x256xf32> to vector<2x64xf32>
    %519 = math.tanh %518 : vector<2x64xf32>
    %520 = arith.mulf %516, %503 : vector<2x64xf32>
    %521 = arith.mulf %515, %519 : vector<2x64xf32>
    %522 = arith.addf %520, %521 : vector<2x64xf32>
    %523 = math.tanh %522 : vector<2x64xf32>
    %524 = arith.mulf %517, %523 : vector<2x64xf32>
    %525 = vector.extract_strided_slice %8 {offsets = [54, 0], sizes = [2, 256], strides = [1, 1]} : vector<56x256xf32> to vector<2x256xf32>
    %cst_66 = arith.constant dense<0.000000e+00> : vector<2x256xf32>
    %526 = tpu.matmul %524, %9, %cst_66 {dimension_numbers = #tpu.dot_dimension_numbers<[1], [0], [0], [1], [0, 0, 1, 1], [], []>} : vector<2x64xf32>, vector<64x256xf32>, vector<2x256xf32> -> vector<2x256xf32>
    %527 = arith.addf %525, %526 : vector<2x256xf32>
    %528 = vector.extract_strided_slice %527 {offsets = [0, 0], sizes = [2, 192], strides = [1, 1]} : vector<2x256xf32> to vector<2x192xf32>
    %529 = arith.negf %528 : vector<2x192xf32>
    %530 = math.exp %529 : vector<2x192xf32>
    %cst_67 = arith.constant 1.000000e+00 : f32
    %531 = vector.broadcast %cst_67 : f32 to vector<2x192xf32>
    %532 = arith.addf %531, %530 : vector<2x192xf32>
    %533 = arith.divf %531, %532 : vector<2x192xf32>
    %534 = vector.extract_strided_slice %533 {offsets = [0, 0], sizes = [2, 64], strides = [1, 1]} : vector<2x192xf32> to vector<2x64xf32>
    %535 = vector.extract_strided_slice %533 {offsets = [0, 64], sizes = [2, 64], strides = [1, 1]} : vector<2x192xf32> to vector<2x64xf32>
    %536 = vector.extract_strided_slice %533 {offsets = [0, 128], sizes = [2, 64], strides = [1, 1]} : vector<2x192xf32> to vector<2x64xf32>
    %537 = vector.extract_strided_slice %527 {offsets = [0, 192], sizes = [2, 64], strides = [1, 1]} : vector<2x256xf32> to vector<2x64xf32>
    %538 = math.tanh %537 : vector<2x64xf32>
    %539 = arith.mulf %535, %522 : vector<2x64xf32>
    %540 = arith.mulf %534, %538 : vector<2x64xf32>
    %541 = arith.addf %539, %540 : vector<2x64xf32>
    %542 = math.tanh %541 : vector<2x64xf32>
    %543 = arith.mulf %536, %542 : vector<2x64xf32>
    %c0_68 = arith.constant 0 : index
    %c0_69 = arith.constant 0 : index
    %544 = vector.load %arg8[%c0_68, %c0_69] : memref<2x64xf32, #tpu.memory_space<vmem>>, vector<2x64xf32>
    tpu.vector_store %arg8[%c0_68, %c0_69], %543 {strides = array<i32>} : memref<2x64xf32, #tpu.memory_space<vmem>>, vector<2x64xf32>,
    %c0_70 = arith.constant 0 : index
    %c0_71 = arith.constant 0 : index
    %545 = vector.load %arg9[%c0_70, %c0_71] : memref<2x64xf32, #tpu.memory_space<vmem>>, vector<2x64xf32>
    tpu.vector_store %arg9[%c0_70, %c0_71], %541 {strides = array<i32>} : memref<2x64xf32, #tpu.memory_space<vmem>>, vector<2x64xf32>,
    %c0_i32_72 = arith.constant 0 : i32
    %546 = arith.cmpi eq, %arg0, %c0_i32_72 : i32
    %547 = arith.extui %546 : i1 to i32
    %c0_i32_73 = arith.constant 0 : i32
    %548 = arith.cmpi ne, %547, %c0_i32_73 : i32
    scf.if %548 {
      %c0_74 = arith.constant 0 : index
      %c0_75 = arith.constant 0 : index
      %549 = vector.load %arg5[%c0_74, %c0_75] : memref<64x10xf32, #tpu.memory_space<vmem>>, vector<64x10xf32>
      %cst_76 = arith.constant dense<0.000000e+00> : vector<2x10xf32>
      %550 = tpu.matmul %543, %549, %cst_76 {dimension_numbers = #tpu.dot_dimension_numbers<[1], [0], [0], [1], [0, 0, 1, 1], [], []>} : vector<2x64xf32>, vector<64x10xf32>, vector<2x10xf32> -> vector<2x10xf32>
      %c0_77 = arith.constant 0 : index
      %c0_78 = arith.constant 0 : index
      %551 = vector.load %arg6[%c0_77, %c0_78] : memref<1x10xf32, #tpu.memory_space<vmem>>, vector<1x10xf32>
      %552 = vector.broadcast %551 : vector<1x10xf32> to vector<2x10xf32>
      %553 = arith.addf %550, %552 : vector<2x10xf32>
      %c0_79 = arith.constant 0 : index
      %c0_80 = arith.constant 0 : index
      %554 = vector.load %arg7[%c0_79, %c0_80] : memref<2x10xf32, #tpu.memory_space<vmem>>, vector<2x10xf32>
      tpu.vector_store %arg7[%c0_79, %c0_80], %553 {strides = array<i32>} : memref<2x10xf32, #tpu.memory_space<vmem>>, vector<2x10xf32>,
    } else {
    }
    return
  }
  func.func @transform_0(%arg0: i32) -> (i32, i32) {
    %c0_i32 = arith.constant 0 : i32
    %c0_i32_0 = arith.constant 0 : i32
    return %arg0, %c0_i32 : i32, i32
  }
  func.func @transform_1(%arg0: i32) -> (i32, i32) {
    %c0_i32 = arith.constant 0 : i32
    %c0_i32_0 = arith.constant 0 : i32
    %c0_i32_1 = arith.constant 0 : i32
    return %c0_i32, %c0_i32_0 : i32, i32
  }
  func.func @transform_2(%arg0: i32) -> (i32, i32) {
    %c0_i32 = arith.constant 0 : i32
    %c0_i32_0 = arith.constant 0 : i32
    %c0_i32_1 = arith.constant 0 : i32
    return %c0_i32, %c0_i32_0 : i32, i32
  }
  func.func @transform_3(%arg0: i32) -> (i32, i32) {
    %c0_i32 = arith.constant 0 : i32
    %c0_i32_0 = arith.constant 0 : i32
    %c0_i32_1 = arith.constant 0 : i32
    return %c0_i32, %c0_i32_0 : i32, i32
  }
  func.func @transform_4(%arg0: i32) -> (i32, i32) {
    %c0_i32 = arith.constant 0 : i32
    %c0_i32_0 = arith.constant 0 : i32
    %c0_i32_1 = arith.constant 0 : i32
    return %c0_i32, %c0_i32_0 : i32, i32
  }
  func.func @transform_5(%arg0: i32) -> (i32, i32) {
    %c0_i32 = arith.constant 0 : i32
    %c0_i32_0 = arith.constant 0 : i32
    %c0_i32_1 = arith.constant 0 : i32
    return %c0_i32, %c0_i32_0 : i32, i32
  }
  func.func @transform_6(%arg0: i32) -> (i32, i32) {
    %c0_i32 = arith.constant 0 : i32
    %c0_i32_0 = arith.constant 0 : i32
    %c0_i32_1 = arith.constant 0 : i32
    return %c0_i32, %c0_i32_0 : i32, i32
  }
}

</mosaic_0001>

<bundles_post_ra>
// kernel: tpu_custom_call.1
= control target key start
LH: loop header
LB: loop body
LE: loop exit
PB: predicated region body
PF: predicated region fallthrough
CT: control target
= control target key end

     0   :  { %11 = vsyncpa [#allocation5], 0  ;;  %s5147_s0 = inlined_call_operand.vmem [shape: f32[56,28], index: 0, kind: input, shape index: {}]   ;;  %s5148_s1 = inlined_call_operand.hbm [shape: f32[28,256], index: 1, kind: input, shape index: {}]   ;;  %s5149_s2 = inlined_call_operand.vmem [shape: f32[64,256], index: 2, kind: input, shape index: {}]   ;;  %s5150_s3 = inlined_call_operand.vmem [shape: f32[1,256], index: 3, kind: input, shape index: {}]   ;;  %s5151_s4 = inlined_call_operand.vmem [shape: f32[64,10], index: 4, kind: input, shape index: {}]   ;;  %s5152_s5 = inlined_call_operand.vmem [shape: f32[1,10], index: 5, kind: input, shape index: {}]   ;;  %s5153_s6 = inlined_call_operand.hbm [shape: f32[2,10], index: 6, kind: output, shape index: {}]  }
   0x1   :  { %12 = vsyncpa [#allocation6], 0  ;;  %s19_s23 = sshll.u32 %s5148_s1, 4  ;;  %s3888_s24 = smov [#allocation4]   ;;  %s20_s23 = int_to_ptr.hbm [resolvable:$true] %s19_s23 }
   0x2   :  { %s21_s25 = sshll.u32 %s3888_s24, 4  ;;  %s3889_s26 = smov 256   ;;  %s22_s25 = int_to_ptr.vmem [resolvable:$true] %s21_s25 }
   0x3   :  { %s3890_s27 = smov 16  }
   0x4   :  { %27 = dma.hbm_to_vmem [thread:$0]  %s20_s23, 1024, %s22_s25, [#allocation5], %s3889_s26, %s3889_s26, %s3890_s27  }
   0x5   :  { %3884 = dma.done.wait [#allocation5], 1024  }
   0x6   :  { %3885 = vsyncadd [#allocation5], 4294966272  ;;  %vm44_vm0 = vcmask 517120   ;;  %v3891_v0 = vmov 0.0   ;;  %v3935_v1 = vld [vmem:[%s5149_s2 + $0x78] sm:$0xff]  ;;  %v3940_v2 = vld [vmem:[%s5149_s2 + $0x68] sm:$0xff] }
   0x7   :  { %45 = vst.msk [vmem:[#allocation2] sm:$0x3] %vm44_vm0, %v3891_v0  ;;  %vm90_vm1 = vcmask 1043456   ;;  %223 = vmatpush.msra.mxu3 %v3935_v1  ;;  %v3946_v3 = vld [vmem:[%s5149_s2 + $0x58] sm:$0xff]  ;;  %v59_v5 = vld [vmem:[#allocation4 + $0x28] sm:$0xff]  ;;  %v3964_v9 = vld [vmem:[%s5149_s2 + $0x60] sm:$0xff] }
   0x8   :  { %46 = vst.msk [vmem:[#allocation3] sm:$0x3] %vm44_vm0, %v3891_v0  ;;  %v61_v4 = vld [vmem:[#allocation4 + $0x38] sm:$0xf]  ;;  %v3953_v6 = vld [vmem:[%s5149_s2 + $0x48] sm:$0xff]  ;;  %v3958_v8 = vld [vmem:[%s5149_s2 + $0x70] sm:$0xff] }
   0x9   :  { %224 = vmatpush.msra.mxu3 %v3940_v2  ;;  %3324 = vmatpush.msk.msra.mxu1 %vm90_vm1, %v61_v4  ;;  %v57_v7 = vld [vmem:[#allocation4 + $0x18] sm:$0xff]  ;;  %v55_v11 = vld [vmem:[#allocation4 + $0x8] sm:$0xff]  ;;  %v60_v12 = vld [vmem:[#allocation4 + $0x30] sm:$0xf]  ;;  %vm68_vm2 = vcmask 228352   ;;  %vm191_vm3 = vcmask 523264  }
   0xa   :  { %v3969_v10 = vld [vmem:[%s5149_s2 + $0x38] sm:$0xff]  ;;  %203 = vmatpush.msra.mxu2 %v3958_v8  ;;  %v47_v13 = vld [vmem:[%s5147_s0] sm:$0xff]  ;;  %v3979_v14 = vld [vmem:[%s5149_s2 + $0x50] sm:$0xff]  ;;  %3316 = vmatpush.msk.msra.mxu0 %vm90_vm1, %v60_v12  ;;  %s3892_s14 = smov 64   ;;  %s3893_s7 = smov [#allocation7]  }
   0xb   :  { %225 = vmatpush.msra.mxu3 %v3946_v3  ;;  %148 = vmatpush.msra.mxu1 %v59_v5  ;;  %v3984_v15 = vld [vmem:[%s5149_s2 + $0x28] sm:$0xff]  ;;  %v3992_v17 = vld [vmem:[%s5149_s2 + $0x40] sm:$0xff]  ;;  %v3997_v18 = vld [vmem:[%s5149_s2 + $0x18] sm:$0xff]  ;;  %s3304_s8 = sshll.u32 %s3893_s7, 4  ;;  %s3306_s11 = sshll.u32 %s5153_s6, 4  ;;  %s3305_s8 = int_to_ptr.vmem [resolvable:$true] %s3304_s8  ;;  %s3307_s11 = int_to_ptr.hbm [resolvable:$true] %s3306_s11 }
   0xc   :  { %204 = vmatpush.msra.mxu2 %v3964_v9  ;;  %v58_v16 = vld [vmem:[#allocation4 + $0x20] sm:$0xff]  ;;  %v56_v19 = vld [vmem:[#allocation4 + $0x10] sm:$0xff]  ;;  %v62_v27 = vld [vmem:[%s5150_s3] sm:$0x3] }
   0xd   :  { %226 = vmatpush.msra.mxu3 %v3953_v6  ;;  %149 = vmatpush.msra.mxu1 %v57_v7  ;;  %v4005_v20 = vld [vmem:[%s5149_s2 + $0x30] sm:$0xff]  ;;  %v4010_v21 = vld [vmem:[%s5149_s2 + $0x8] sm:$0xff]  ;;  %v4018_v24 = vld [vmem:[%s5149_s2 + $0x20] sm:$0xff]  ;;  %v4104_v28 = vperm.slane %v62_v27, 1  ;;  %v4112_v35 = vperm.slane %v62_v27, 0 }
   0xe   :  { %205 = vmatpush.msra.mxu2 %v3979_v14  ;;  %110 = vmatpush.msra.mxu0 %v58_v16  ;;  %v54_v22 = vld [vmem:[#allocation4] sm:$0xff]  ;;  %v189_v23 = vld [vmem:[#allocation2] sm:$0x3]  ;;  %v4026_v25 = vld [vmem:[%s5149_s2 + $0x10] sm:$0xff] }
   0xf   :  { %227 = vmatpush.msra.mxu3 %v3969_v10  ;;  %150 = vmatpush.msra.mxu1 %v55_v11  ;;  %v4033_v26 = vld [vmem:[%s5149_s2] sm:$0xff] }
  0x10   :  { %3325 = vmatmul.msk.f32.vlgmr.msra.gmra.mxu1 %vm68_vm2, %v47_v13  ;;  %206 = vmatpush.msra.mxu2 %v3992_v17  ;;  %v190_v34 = vld [vmem:[#allocation3] sm:$0x3] }
  0x11   :  { %228 = vmatpush.msra.mxu3 %v3984_v15  ;;  %550 = vmatpush.msrb.mxu1 %v3935_v1 }
  0x12   :  { %111 = vmatpush.msra.mxu0 %v56_v19  ;;  %207 = vmatpush.msra.mxu2 %v4005_v20 }
  0x13   :  { %229 = vmatpush.msra.mxu3 %v3997_v18  ;;  %551 = vmatpush.msrb.mxu1 %v3940_v2 }
  0x14   :  { %112 = vmatpush.msra.mxu0 %v54_v22  ;;  %208 = vmatpush.msra.mxu2 %v4018_v24 }
  0x15   :  { %230 = vmatpush.msra.mxu3 %v4010_v21  ;;  %3317 = vmatmul.msk.f32.vlgmr.msra.gmra.mxu0 %vm68_vm2, %v47_v13 }
  0x16   :  { %3333 = vmatmul.msk.f32.vlgmr.msra.gmra.mxu3 %vm191_vm3, %v189_v23  ;;  %209 = vmatpush.msra.mxu2 %v4026_v25 }
  0x17   :  { %328 = vmatpush.msrb.mxu3 %v3935_v1  ;;  %552 = vmatpush.msrb.mxu1 %v3946_v3 }
  0x18   :  { %530 = vmatpush.msrb.mxu0 %v3958_v8  ;;  %210 = vmatpush.msra.mxu2 %v4033_v26 }
  0x19   :  { %329 = vmatpush.msrb.mxu3 %v3940_v2  ;;  %553 = vmatpush.msrb.mxu1 %v3953_v6 }
  0x1a   :  { %3332 = vmatmul.msk.f32.vlgmr.msra.gmra.mxu2 %vm191_vm3, %v189_v23  ;;  %531 = vmatpush.msrb.mxu0 %v3964_v9 }
  0x1b   :  { %330 = vmatpush.msrb.mxu3 %v3946_v3  ;;  %308 = vmatpush.msrb.mxu2 %v3958_v8 }
  0x1c   :  { %554 = vmatpush.msrb.mxu1 %v3969_v10  ;;  %532 = vmatpush.msrb.mxu0 %v3979_v14 }
  0x1d   :  { %331 = vmatpush.msrb.mxu3 %v3953_v6  ;;  %309 = vmatpush.msrb.mxu2 %v3964_v9 }
  0x1e   :  { %555 = vmatpush.msrb.mxu1 %v3984_v15  ;;  %533 = vmatpush.msrb.mxu0 %v3992_v17 }
  0x1f   :  { %332 = vmatpush.msrb.mxu3 %v3969_v10  ;;  %310 = vmatpush.msrb.mxu2 %v3979_v14 }
  0x20   :  { %556 = vmatpush.msrb.mxu1 %v3997_v18  ;;  %534 = vmatpush.msrb.mxu0 %v4005_v20 }
  0x21   :  { %333 = vmatpush.msrb.mxu3 %v3984_v15  ;;  %311 = vmatpush.msrb.mxu2 %v3992_v17 }
  0x22   :  { %557 = vmatpush.msrb.mxu1 %v4010_v21  ;;  %535 = vmatpush.msrb.mxu0 %v4018_v24 }
  0x23   :  { %334 = vmatpush.msrb.mxu3 %v3997_v18  ;;  %312 = vmatpush.msrb.mxu2 %v4005_v20 }
  0x24   :  { %765 = vmatpush.msra.mxu1 %v3935_v1  ;;  %536 = vmatpush.msrb.mxu0 %v4026_v25 }
  0x25   :  { %335 = vmatpush.msrb.mxu3 %v4010_v21  ;;  %313 = vmatpush.msrb.mxu2 %v4018_v24 }
  0x26   :  { %766 = vmatpush.msra.mxu1 %v3940_v2  ;;  %537 = vmatpush.msrb.mxu0 %v4033_v26 }
  0x27   :  { %439 = vmatpush.msra.mxu3 %v3935_v1  ;;  %314 = vmatpush.msrb.mxu2 %v4026_v25 }
  0x28   :  { %767 = vmatpush.msra.mxu1 %v3946_v3  ;;  %745 = vmatpush.msra.mxu0 %v3958_v8 }
  0x29   :  { %440 = vmatpush.msra.mxu3 %v3940_v2  ;;  %315 = vmatpush.msrb.mxu2 %v4033_v26 }
  0x2a   :  { %768 = vmatpush.msra.mxu1 %v3953_v6  ;;  %746 = vmatpush.msra.mxu0 %v3964_v9 }
  0x2b   :  { %441 = vmatpush.msra.mxu3 %v3946_v3  ;;  %419 = vmatpush.msra.mxu2 %v3958_v8 }
  0x2c   :  { %769 = vmatpush.msra.mxu1 %v3969_v10  ;;  %747 = vmatpush.msra.mxu0 %v3979_v14 }
  0x2d   :  { %442 = vmatpush.msra.mxu3 %v3953_v6  ;;  %420 = vmatpush.msra.mxu2 %v3964_v9 }
  0x2e   :  { %770 = vmatpush.msra.mxu1 %v3984_v15  ;;  %748 = vmatpush.msra.mxu0 %v3992_v17 }
  0x2f   :  { %443 = vmatpush.msra.mxu3 %v3969_v10  ;;  %421 = vmatpush.msra.mxu2 %v3979_v14 }
  0x30   :  { %771 = vmatpush.msra.mxu1 %v3997_v18  ;;  %749 = vmatpush.msra.mxu0 %v4005_v20 }
  0x31   :  { %444 = vmatpush.msra.mxu3 %v3984_v15  ;;  %422 = vmatpush.msra.mxu2 %v3992_v17 }
  0x32   :  { %772 = vmatpush.msra.mxu1 %v4010_v21  ;;  %750 = vmatpush.msra.mxu0 %v4018_v24 }
  0x33   :  { %445 = vmatpush.msra.mxu3 %v3997_v18  ;;  %423 = vmatpush.msra.mxu2 %v4005_v20 }
  0x34   :  { %751 = vmatpush.msra.mxu0 %v4026_v25 }
  0x35   :  { %446 = vmatpush.msra.mxu3 %v4010_v21  ;;  %424 = vmatpush.msra.mxu2 %v4018_v24 }
  0x36   :  { %752 = vmatpush.msra.mxu0 %v4033_v26 }
  0x37   :  { %425 = vmatpush.msra.mxu2 %v4026_v25 }
  0x39   :  { %426 = vmatpush.msra.mxu2 %v4033_v26 }
  0x8d   :  { %v152_v29 = vpop.f32.mrf.mxu1 }
  0x8e   :  { %v4107_v30 = vadd.f32 %v152_v29, %v4104_v28 }
  0x92   :  { %v114_v36 = vpop.f32.mrf.mxu0 }
  0x93   :  { %v4115_v37 = vadd.f32 %v114_v36, %v4112_v35 }
  0x99   :  { %v232_v31 = vpop.f32.mrf.mxu3 }
  0x9a   :  { %v236_v32 = vadd.f32 %v232_v31, %v4107_v30 }
  0x9c   :  { %3452 = vtanh.f32 %v236_v32  ;;  %v3335_v60 = vmul.f32 -1.442695, %v236_v32 }
  0x9d   :  { %v212_v38 = vpop.f32.mrf.mxu2 }
  0x9e   :  { %v235_v39 = vadd.f32 %v212_v38, %v4115_v37 }
  0xa0   :  { %v3334_v40 = vmul.f32 -1.442695, %v235_v39 }
  0xa2   :  { %v3453_v33 = vpop.eup %3452  ;;  %3454 = vpow2.f32 %v3334_v40 }
  0xa3   :  { %282 = vrot.lane.b32.xlu0 %v3453_v33, %s3892_s14 }
  0xa8   :  { %v3455_v41 = vpop.eup %3454 }
  0xa9   :  { %v243_v42 = vadd.f32 1.0, %v3455_v41 }
  0xab   :  { %277 = vrot.lane.b32.xlu0 %v190_v34, %s3892_s14  ;;  %3456 = vrcp.f32 %v243_v42  ;;  %vm250_vm4 = vweird.f32 %v243_v42  ;;  %v256_v47 = vand.u32 2147483648, %v243_v42  ;;  %v254_v49 = vand.u32 2147483647, %v243_v42 }
  0xad   :  { %v257_v50 = vor.u32 1.1754944e-38, %v256_v47  ;;  %vm255_vm7 = vcmp.eq.f32.partialorder %v254_v49, 8.507059e+37 }
  0xb1   :  { %v3457_v43 = vpop.eup %3456 }
  0xb2   :  { %v246_v44 = vmul.f32 %v3457_v43, %v243_v42  ;;  %vm251_vm5 = vweird.f32 %v3457_v43 }
  0xb3   :  { %vm252_vm6 = vmor %vm250_vm4, %vm251_vm5 }
  0xb4   :  { %v247_v45 = vsub.f32 1.0, %v246_v44 }
  0xb6   :  { %v248_v46 = vmul.f32 %v3457_v43, %v247_v45 }
  0xb8   :  { %v249_v48 = vadd.f32 %v3457_v43, %v248_v46 }
  0xba   :  { %v253_v51 = vsel %vm252_vm6, %v3457_v43, %v249_v48 }
  0xbb   :  { %v258_v53 = vsel %vm255_vm7, %v257_v50, %v253_v51 }
 0x115   :  { %v283_v52 = vpop.permute.xlu0 %282 }
 0x116   :  { %v285_v54 = vmul.f32 %v283_v52, %v258_v53 }
 0x118   :  { %287 = vrot.lane.b32.xlu1 %v285_v54, %s3892_s14 }
 0x11d   :  { %v278_v55 = vpop.permute.xlu0 %277 }
 0x11e   :  { %v280_v56 = vmul.f32 %v278_v55, %v258_v53 }
 0x18a   :  { %v288_v57 = vpop.permute.xlu1 %287 }
 0x18b   :  { %v4119_v58 = vadd.f32 %v288_v57, %v280_v56 }
 0x18d   :  { %3458 = vtanh.f32 %v4119_v58  ;;  %v388_v53 = vrot.slane %v4119_v58, 6 }
 0x18e   :  { %3460 = vpow2.f32 %v3335_v60 }
 0x193   :  { %v3459_v59 = vpop.eup %3458 }
 0x194   :  { %293 = vrot.lane.b32.xlu1 %v3459_v59, %s3892_s14  ;;  %v3461_v61 = vpop.eup %3460 }
 0x195   :  { %v244_v62 = vadd.f32 1.0, %v3461_v61 }
 0x197   :  { %3462 = vrcp.f32 %v244_v62  ;;  %v271_v11 = vand.u32 2147483648, %v244_v62  ;;  %vm265_vm9 = vweird.f32 %v244_v62  ;;  %v269_v12 = vand.u32 2147483647, %v244_v62 }
 0x199   :  { %v272_v16 = vor.u32 1.1754944e-38, %v271_v11  ;;  %vm270_vm11 = vcmp.eq.f32.partialorder %v269_v12, 8.507059e+37 }
 0x19d   :  { %v3463_v63 = vpop.eup %3462 }
 0x19e   :  { %v261_v0 = vmul.f32 %v3463_v63, %v244_v62  ;;  %vm266_vm8 = vweird.f32 %v3463_v63 }
 0x19f   :  { %vm267_vm10 = vmor %vm265_vm9, %vm266_vm8 }
 0x1a0   :  { %v262_v4 = vsub.f32 1.0, %v261_v0 }
 0x1a2   :  { %v263_v5 = vmul.f32 %v3463_v63, %v262_v4 }
 0x1a4   :  { %v264_v7 = vadd.f32 %v3463_v63, %v263_v5 }
 0x1a6   :  { %v268_v13 = vsel %vm267_vm10, %v3463_v63, %v264_v7 }
 0x1a7   :  { %v273_v19 = vsel %vm270_vm11, %v272_v16, %v268_v13 }
 0x206   :  { %v294_v22 = vpop.permute.xlu1 %293 }
 0x207   :  { %v296_v23 = vmul.f32 %v294_v22, %v273_v19 }
 0x209   :  { %3336 = vmatmul.msk.f32.vlgmr.msrb.gmra.mxu2 %vm191_vm3, %v296_v23  ;;  %3337 = vmatmul.msk.f32.vlgmr.msrb.gmra.mxu3 %vm191_vm3, %v296_v23 }
 0x20a   :  { %641 = vmatpush.msrb.mxu2 %v3958_v8  ;;  %661 = vmatpush.msrb.mxu3 %v3935_v1 }
 0x20c   :  { %642 = vmatpush.msrb.mxu2 %v3964_v9  ;;  %662 = vmatpush.msrb.mxu3 %v3940_v2 }
 0x20e   :  { %643 = vmatpush.msrb.mxu2 %v3979_v14  ;;  %663 = vmatpush.msrb.mxu3 %v3946_v3 }
 0x210   :  { %644 = vmatpush.msrb.mxu2 %v3992_v17  ;;  %664 = vmatpush.msrb.mxu3 %v3953_v6 }
 0x212   :  { %645 = vmatpush.msrb.mxu2 %v4005_v20  ;;  %665 = vmatpush.msrb.mxu3 %v3969_v10 }
 0x214   :  { %646 = vmatpush.msrb.mxu2 %v4018_v24  ;;  %666 = vmatpush.msrb.mxu3 %v3984_v15 }
 0x216   :  { %647 = vmatpush.msrb.mxu2 %v4026_v25  ;;  %667 = vmatpush.msrb.mxu3 %v3997_v18 }
 0x218   :  { %648 = vmatpush.msrb.mxu2 %v4033_v26  ;;  %668 = vmatpush.msrb.mxu3 %v4010_v21 }
 0x28c   :  { %v337_v27 = vpop.f32.mrf.mxu3  ;;  %v317_v33 = vpop.f32.mrf.mxu2 }
 0x28d   :  { %v343_v29 = vrot.slane %v337_v27, 6  ;;  %v342_v34 = vrot.slane %v317_v33, 6 }
 0x28f   :  { %v347_v31 = vadd.f32 %v343_v29, %v4107_v30  ;;  %v346_v36 = vadd.f32 %v342_v34, %v4115_v37 }
 0x291   :  { %3464 = vtanh.f32 %v347_v31  ;;  %v3338_v38 = vmul.f32 -1.442695, %v346_v36  ;;  %v3339_v59 = vmul.f32 -1.442695, %v347_v31 }
 0x293   :  { %3466 = vpow2.f32 %v3338_v38 }
 0x297   :  { %v3465_v32 = vpop.eup %3464 }
 0x298   :  { %392 = vrot.lane.b32.xlu2 %v3465_v32, %s3892_s14 }
 0x299   :  { %v3467_v39 = vpop.eup %3466 }
 0x29a   :  { %v354_v40 = vadd.f32 1.0, %v3467_v39 }
 0x29c   :  { %3468 = vrcp.f32 %v354_v40  ;;  %v367_v46 = vand.u32 2147483648, %v354_v40  ;;  %vm361_vm13 = vweird.f32 %v354_v40  ;;  %v365_v47 = vand.u32 2147483647, %v354_v40 }
 0x29e   :  { %v368_v49 = vor.u32 1.1754944e-38, %v367_v46  ;;  %vm366_vm15 = vcmp.eq.f32.partialorder %v365_v47, 8.507059e+37 }
 0x2a2   :  { %v3469_v41 = vpop.eup %3468 }
 0x2a3   :  { %v357_v42 = vmul.f32 %v3469_v41, %v354_v40  ;;  %vm362_vm12 = vweird.f32 %v3469_v41 }
 0x2a4   :  { %vm363_vm14 = vmor %vm361_vm13, %vm362_vm12 }
 0x2a5   :  { %v358_v43 = vsub.f32 1.0, %v357_v42 }
 0x2a7   :  { %v359_v44 = vmul.f32 %v3469_v41, %v358_v43 }
 0x2a9   :  { %v360_v45 = vadd.f32 %v3469_v41, %v359_v44 }
 0x2ab   :  { %v364_v48 = vsel %vm363_vm14, %v3469_v41, %v360_v45 }
 0x2ac   :  { %v369_v51 = vsel %vm366_vm15, %v368_v49, %v364_v48 }
 0x2ad   :  { %v390_v54 = vmul.f32 %v388_v53, %v369_v51  ;;  %v49_v53 = vld [vmem:[%s5147_s0 + $0x10] sm:$0xff] }
 0x2f2   :  { %v393_v50 = vpop.permute.xlu2 %392 }
 0x2f3   :  { %v395_v52 = vmul.f32 %v393_v50, %v369_v51 }
 0x2f5   :  { %397 = vrot.lane.b32.xlu2 %v395_v52, %s3892_s14  ;;  %v48_v52 = vld [vmem:[%s5147_s0 + $0x8] sm:$0xff] }
 0x2f6   :  { %3318 = vmatmul.msk.f32.gmra.mxu0 %vm68_vm2, %v48_v52  ;;  %3326 = vmatmul.msk.f32.gmra.mxu1 %vm68_vm2, %v48_v52 }
 0x2fe   :  { %3319 = vmatmul.msk.f32.gmra.mxu0 %vm68_vm2, %v49_v53  ;;  %3327 = vmatmul.msk.f32.gmra.mxu1 %vm68_vm2, %v49_v53 }
 0x34f   :  { %v398_v55 = vpop.permute.xlu2 %397 }
 0x350   :  { %v4146_v56 = vadd.f32 %v398_v55, %v390_v54  ;;  %v50_v54 = vld [vmem:[%s5147_s0 + $0x18] sm:$0xff] }
 0x351   :  { %3320 = vmatmul.msk.f32.gmra.mxu0 %vm68_vm2, %v50_v54  ;;  %3328 = vmatmul.msk.f32.gmra.mxu1 %vm68_vm2, %v50_v54 }
 0x352   :  { %3470 = vtanh.f32 %v4146_v56  ;;  %v499_v55 = vrot.slane %v4146_v56, 6  ;;  %v53_v56 = vld [vmem:[%s5147_s0 + $0x30] sm:$0xff] }
 0x353   :  { %3472 = vpow2.f32 %v3339_v59 }
 0x358   :  { %v3471_v57 = vpop.eup %3470 }
 0x359   :  { %403 = vrot.lane.b32.xlu0 %v3471_v57, %s3892_s14  ;;  %v3473_v60 = vpop.eup %3472 }
 0x35a   :  { %v355_v61 = vadd.f32 1.0, %v3473_v60  ;;  %v51_v60 = vld [vmem:[%s5147_s0 + $0x20] sm:$0xff] }
 0x35b   :  { %3321 = vmatmul.msk.f32.gmra.mxu0 %vm68_vm2, %v51_v60  ;;  %3329 = vmatmul.msk.f32.gmra.mxu1 %vm68_vm2, %v51_v60 }
 0x35c   :  { %3474 = vrcp.f32 %v355_v61  ;;  %v382_v58 = vand.u32 2147483648, %v355_v61  ;;  %vm376_vm1 = vweird.f32 %v355_v61  ;;  %v380_v7 = vand.u32 2147483647, %v355_v61 }
 0x35e   :  { %v383_v12 = vor.u32 1.1754944e-38, %v382_v58  ;;  %vm381_vm5 = vcmp.eq.f32.partialorder %v380_v7, 8.507059e+37 }
 0x362   :  { %v3475_v62 = vpop.eup %3474 }
 0x363   :  { %v372_v63 = vmul.f32 %v3475_v62, %v355_v61  ;;  %vm377_vm0 = vweird.f32 %v3475_v62 }
 0x364   :  { %vm378_vm4 = vmor %vm376_vm1, %vm377_vm0 }
 0x365   :  { %v373_v0 = vsub.f32 1.0, %v372_v63 }
 0x367   :  { %v374_v4 = vmul.f32 %v3475_v62, %v373_v0 }
 0x369   :  { %v375_v5 = vadd.f32 %v3475_v62, %v374_v4 }
 0x36b   :  { %v379_v11 = vsel %vm378_vm4, %v3475_v62, %v375_v5  ;;  %v52_v62 = vld [vmem:[%s5147_s0 + $0x28] sm:$0xff] }
 0x36c   :  { %v384_v13 = vsel %vm381_vm5, %v383_v12, %v379_v11  ;;  %3322 = vmatmul.msk.f32.gmra.mxu0 %vm68_vm2, %v52_v62  ;;  %3330 = vmatmul.msk.f32.gmra.mxu1 %vm68_vm2, %v52_v62 }
 0x374   :  { %3323 = vmatmul.msk.f32.gmra.mxu0 %vm68_vm2, %v53_v56  ;;  %3331 = vmatmul.msk.f32.gmra.mxu1 %vm68_vm2, %v53_v56 }
 0x3cb   :  { %v404_v16 = vpop.permute.xlu0 %403 }
 0x3cc   :  { %v406_v19 = vmul.f32 %v404_v16, %v384_v13 }
 0x3ce   :  { %v408_v22 = vrot.slane %v406_v19, 2 }
 0x3d0   :  { %3340 = vmatmul.msk.f32.vlgmr.msra.gmra.mxu2 %vm191_vm3, %v408_v22  ;;  %3341 = vmatmul.msk.f32.vlgmr.msra.gmra.mxu3 %vm191_vm3, %v408_v22 }
 0x3d1   :  { %856 = vmatpush.msra.mxu2 %v3958_v8  ;;  %876 = vmatpush.msra.mxu3 %v3935_v1 }
 0x3d3   :  { %857 = vmatpush.msra.mxu2 %v3964_v9  ;;  %877 = vmatpush.msra.mxu3 %v3940_v2 }
 0x3d5   :  { %858 = vmatpush.msra.mxu2 %v3979_v14  ;;  %878 = vmatpush.msra.mxu3 %v3946_v3 }
 0x3d7   :  { %859 = vmatpush.msra.mxu2 %v3992_v17  ;;  %879 = vmatpush.msra.mxu3 %v3953_v6 }
 0x3d9   :  { %860 = vmatpush.msra.mxu2 %v4005_v20  ;;  %880 = vmatpush.msra.mxu3 %v3969_v10 }
 0x3db   :  { %861 = vmatpush.msra.mxu2 %v4018_v24  ;;  %881 = vmatpush.msra.mxu3 %v3984_v15 }
 0x3dd   :  { %862 = vmatpush.msra.mxu2 %v4026_v25  ;;  %882 = vmatpush.msra.mxu3 %v3997_v18 }
 0x3df   :  { %863 = vmatpush.msra.mxu2 %v4033_v26  ;;  %883 = vmatpush.msra.mxu3 %v4010_v21 }
 0x453   :  { %v448_v23 = vpop.f32.mrf.mxu3  ;;  %v428_v32 = vpop.f32.mrf.mxu2 }
 0x454   :  { %v454_v27 = vrot.slane %v448_v23, 4  ;;  %v453_v33 = vrot.slane %v428_v32, 4 }
 0x456   :  { %v458_v29 = vadd.f32 %v454_v27, %v4107_v30  ;;  %v457_v34 = vadd.f32 %v453_v33, %v4115_v37  ;;  %v4225_v33 = vpop.f32.mrf.mxu1 }
 0x458   :  { %3476 = vtanh.f32 %v458_v29  ;;  %v3342_v36 = vmul.f32 -1.442695, %v457_v34  ;;  %v3343_v0 = vmul.f32 -1.442695, %v458_v29 }
 0x45a   :  { %3478 = vpow2.f32 %v3342_v36 }
 0x45e   :  { %v3477_v31 = vpop.eup %3476  ;;  %v4227_v34 = vpop.f32.mrf.mxu1 }
 0x45f   :  { %503 = vrot.lane.b32.xlu1 %v3477_v31, %s3892_s14 }
 0x460   :  { %v3479_v38 = vpop.eup %3478 }
 0x461   :  { %v465_v39 = vadd.f32 1.0, %v3479_v38 }
 0x463   :  { %3480 = vrcp.f32 %v465_v39  ;;  %v478_v45 = vand.u32 2147483648, %v465_v39  ;;  %vm472_vm7 = vweird.f32 %v465_v39  ;;  %v476_v46 = vand.u32 2147483647, %v465_v39 }
 0x465   :  { %v479_v48 = vor.u32 1.1754944e-38, %v478_v45  ;;  %vm477_vm9 = vcmp.eq.f32.partialorder %v476_v46, 8.507059e+37 }
 0x466   :  { %v4229_v36 = vpop.f32.mrf.mxu1 }
 0x469   :  { %v3481_v40 = vpop.eup %3480 }
 0x46a   :  { %v468_v41 = vmul.f32 %v3481_v40, %v465_v39  ;;  %vm473_vm6 = vweird.f32 %v3481_v40 }
 0x46b   :  { %vm474_vm8 = vmor %vm472_vm7, %vm473_vm6 }
 0x46c   :  { %v469_v42 = vsub.f32 1.0, %v468_v41 }
 0x46e   :  { %v470_v43 = vmul.f32 %v3481_v40, %v469_v42  ;;  %v4231_v38 = vpop.f32.mrf.mxu1 }
 0x470   :  { %v471_v44 = vadd.f32 %v3481_v40, %v470_v43 }
 0x472   :  { %v475_v47 = vsel %vm474_vm8, %v3481_v40, %v471_v44  ;;  %v4238_v44 = vpop.f32.mrf.mxu0 }
 0x473   :  { %v480_v50 = vsel %vm477_vm9, %v479_v48, %v475_v47 }
 0x474   :  { %v501_v57 = vmul.f32 %v499_v55, %v480_v50 }
 0x476   :  { %v4233_v39 = vpop.f32.mrf.mxu1 }
 0x47a   :  { %v4241_v46 = vpop.f32.mrf.mxu0 }
 0x47e   :  { %v4235_v40 = vpop.f32.mrf.mxu1 }
 0x482   :  { %v4243_v47 = vpop.f32.mrf.mxu0 }
 0x48a   :  { %v4245_v48 = vpop.f32.mrf.mxu0 }
 0x4d1   :  { %v504_v49 = vpop.permute.xlu1 %503 }
 0x4d2   :  { %v506_v51 = vmul.f32 %v504_v49, %v480_v50  ;;  %v4247_v49 = vpop.f32.mrf.mxu0 }
 0x4d4   :  { %508 = vrot.lane.b32.xlu2 %v506_v51, %s3892_s14 }
 0x4da   :  { %v4249_v50 = vpop.f32.mrf.mxu0 }
 0x52e   :  { %v509_v59 = vpop.permute.xlu2 %508 }
 0x52f   :  { %v4191_v61 = vadd.f32 %v509_v59, %v501_v57 }
 0x531   :  { %3482 = vtanh.f32 %v4191_v61 }
 0x532   :  { %3484 = vpow2.f32 %v3343_v0 }
 0x537   :  { %v3483_v63 = vpop.eup %3482 }
 0x538   :  { %514 = vrot.lane.b32.xlu0 %v3483_v63, %s3892_s14  ;;  %v3485_v4 = vpop.eup %3484 }
 0x539   :  { %v466_v5 = vadd.f32 1.0, %v3485_v4 }
 0x53b   :  { %3486 = vrcp.f32 %v466_v5  ;;  %v493_v16 = vand.u32 2147483648, %v466_v5  ;;  %vm487_vm11 = vweird.f32 %v466_v5  ;;  %v491_v19 = vand.u32 2147483647, %v466_v5 }
 0x53d   :  { %v494_v23 = vor.u32 1.1754944e-38, %v493_v16  ;;  %vm492_vm13 = vcmp.eq.f32.partialorder %v491_v19, 8.507059e+37 }
 0x541   :  { %v3487_v58 = vpop.eup %3486 }
 0x542   :  { %v483_v7 = vmul.f32 %v3487_v58, %v466_v5  ;;  %vm488_vm10 = vweird.f32 %v3487_v58 }
 0x543   :  { %vm489_vm12 = vmor %vm487_vm11, %vm488_vm10 }
 0x544   :  { %v484_v11 = vsub.f32 1.0, %v483_v7 }
 0x546   :  { %v485_v12 = vmul.f32 %v3487_v58, %v484_v11  ;;  %v610_v11 = vrot.slane %v4191_v61, 6 }
 0x548   :  { %v486_v13 = vadd.f32 %v3487_v58, %v485_v12 }
 0x54a   :  { %v490_v22 = vsel %vm489_vm12, %v3487_v58, %v486_v13 }
 0x54b   :  { %v495_v27 = vsel %vm492_vm13, %v494_v23, %v490_v22 }
 0x5aa   :  { %v515_v31 = vpop.permute.xlu0 %514 }
 0x5ab   :  { %v517_v29 = vmul.f32 %v515_v31, %v495_v27 }
 0x5ad   :  { %v519_v32 = vrot.slane %v517_v29, 4 }
 0x5af   :  { %3344 = vmatmul.msk.f32.vlgmr.msrb.gmra.mxu0 %vm191_vm3, %v519_v32  ;;  %3345 = vmatmul.msk.f32.vlgmr.msrb.gmra.mxu1 %vm191_vm3, %v519_v32 }
 0x5b0   :  { %967 = vmatpush.msrb.mxu0 %v3958_v8  ;;  %987 = vmatpush.msrb.mxu1 %v3935_v1 }
 0x5b2   :  { %968 = vmatpush.msrb.mxu0 %v3964_v9  ;;  %988 = vmatpush.msrb.mxu1 %v3940_v2 }
 0x5b4   :  { %969 = vmatpush.msrb.mxu0 %v3979_v14  ;;  %989 = vmatpush.msrb.mxu1 %v3946_v3 }
 0x5b6   :  { %970 = vmatpush.msrb.mxu0 %v3992_v17  ;;  %990 = vmatpush.msrb.mxu1 %v3953_v6 }
 0x5b8   :  { %971 = vmatpush.msrb.mxu0 %v4005_v20  ;;  %991 = vmatpush.msrb.mxu1 %v3969_v10 }
 0x5ba   :  { %972 = vmatpush.msrb.mxu0 %v4018_v24  ;;  %992 = vmatpush.msrb.mxu1 %v3984_v15 }
 0x5bc   :  { %973 = vmatpush.msrb.mxu0 %v4026_v25  ;;  %993 = vmatpush.msrb.mxu1 %v3997_v18 }
 0x5be   :  { %974 = vmatpush.msrb.mxu0 %v4033_v26  ;;  %994 = vmatpush.msrb.mxu1 %v4010_v21 }
 0x62c   :  { %v559_v41 = vpop.f32.mrf.mxu1  ;;  %v539_v51 = vpop.f32.mrf.mxu0 }
 0x62d   :  { %v565_v42 = vrot.slane %v559_v41, 2  ;;  %v564_v52 = vrot.slane %v539_v51, 2 }
 0x62f   :  { %v569_v43 = vadd.f32 %v565_v42, %v4107_v30  ;;  %v568_v30 = vadd.f32 %v564_v52, %v4115_v37 }
 0x631   :  { %3488 = vtanh.f32 %v569_v43  ;;  %v3346_v53 = vmul.f32 -1.442695, %v568_v30  ;;  %v3347_v22 = vmul.f32 -1.442695, %v569_v43 }
 0x633   :  { %3490 = vpow2.f32 %v3346_v53 }
 0x637   :  { %v3489_v45 = vpop.eup %3488 }
 0x638   :  { %614 = vrot.lane.b32.xlu1 %v3489_v45, %s3892_s14 }
 0x639   :  { %v3491_v54 = vpop.eup %3490 }
 0x63a   :  { %v576_v55 = vadd.f32 1.0, %v3491_v54 }
 0x63c   :  { %3492 = vrcp.f32 %v576_v55  ;;  %v589_v56 = vand.u32 2147483648, %v576_v55  ;;  %vm583_vm14 = vweird.f32 %v576_v55  ;;  %v587_v0 = vand.u32 2147483647, %v576_v55 }
 0x63e   :  { %v590_v5 = vor.u32 1.1754944e-38, %v589_v56  ;;  %vm588_vm0 = vcmp.eq.f32.partialorder %v587_v0, 8.507059e+37 }
 0x642   :  { %v3493_v57 = vpop.eup %3492 }
 0x643   :  { %v579_v59 = vmul.f32 %v3493_v57, %v576_v55  ;;  %vm584_vm2 = vweird.f32 %v3493_v57 }
 0x644   :  { %vm585_vm15 = vmor %vm583_vm14, %vm584_vm2 }
 0x645   :  { %v580_v60 = vsub.f32 1.0, %v579_v59 }
 0x647   :  { %v581_v62 = vmul.f32 %v3493_v57, %v580_v60 }
 0x649   :  { %v582_v63 = vadd.f32 %v3493_v57, %v581_v62 }
 0x64b   :  { %v586_v4 = vsel %vm585_vm15, %v3493_v57, %v582_v63 }
 0x64c   :  { %v591_v37 = vsel %vm588_vm0, %v590_v5, %v586_v4 }
 0x64d   :  { %v612_v12 = vmul.f32 %v610_v11, %v591_v37 }
 0x6aa   :  { %v615_v58 = vpop.permute.xlu1 %614 }
 0x6ab   :  { %v617_v7 = vmul.f32 %v615_v58, %v591_v37 }
 0x6ad   :  { %619 = vrot.lane.b32.xlu2 %v617_v7, %s3892_s14 }
 0x707   :  { %v620_v13 = vpop.permute.xlu2 %619 }
 0x708   :  { %v4254_v16 = vadd.f32 %v620_v13, %v612_v12 }
 0x70a   :  { %3494 = vtanh.f32 %v4254_v16  ;;  %v715_v58 = vrot.slane %v4254_v16, 6 }
 0x70b   :  { %3496 = vpow2.f32 %v3347_v22 }
 0x710   :  { %v3495_v19 = vpop.eup %3494 }
 0x711   :  { %625 = vrot.lane.b32.xlu0 %v3495_v19, %s3892_s14  ;;  %v3497_v23 = vpop.eup %3496 }
 0x712   :  { %v577_v27 = vadd.f32 1.0, %v3497_v23 }
 0x714   :  { %3498 = vrcp.f32 %v577_v27  ;;  %v604_v61 = vand.u32 2147483648, %v577_v27  ;;  %vm598_vm4 = vweird.f32 %v577_v27  ;;  %v602_v45 = vand.u32 2147483647, %v577_v27 }
 0x716   :  { %v605_v52 = vor.u32 1.1754944e-38, %v604_v61  ;;  %vm603_vm6 = vcmp.eq.f32.partialorder %v602_v45, 8.507059e+37 }
 0x71a   :  { %v3499_v31 = vpop.eup %3498 }
 0x71b   :  { %v594_v29 = vmul.f32 %v3499_v31, %v577_v27  ;;  %vm599_vm1 = vweird.f32 %v3499_v31 }
 0x71c   :  { %vm600_vm5 = vmor %vm598_vm4, %vm599_vm1 }
 0x71d   :  { %v595_v32 = vsub.f32 1.0, %v594_v29 }
 0x71f   :  { %v596_v41 = vmul.f32 %v3499_v31, %v595_v32 }
 0x721   :  { %v597_v42 = vadd.f32 %v3499_v31, %v596_v41 }
 0x723   :  { %v601_v51 = vsel %vm600_vm5, %v3499_v31, %v597_v42 }
 0x724   :  { %v606_v30 = vsel %vm603_vm6, %v605_v52, %v601_v51 }
 0x783   :  { %v626_v53 = vpop.permute.xlu0 %625 }
 0x784   :  { %v628_v43 = vmul.f32 %v626_v53, %v606_v30  ;;  %v4298_v30 = vld [vmem:[%s5149_s2 + $0x70] sm:$0xff]  ;;  %v4304_v53 = vld [vmem:[%s5149_s2 + $0x78] sm:$0xff] }
 0x786   :  { %v630_v54 = vrot.slane %v628_v43, 6  ;;  %v4310_v43 = vld [vmem:[%s5149_s2 + $0x60] sm:$0xff] }
 0x788   :  { %3348 = vmatmul.msk.f32.vlgmr.msrb.gmra.mxu2 %vm191_vm3, %v630_v54  ;;  %3349 = vmatmul.msk.f32.vlgmr.msrb.gmra.mxu3 %vm191_vm3, %v630_v54  ;;  %v4316_v54 = vld [vmem:[%s5149_s2 + $0x68] sm:$0xff] }
 0x789   :  { %1078 = vmatpush.msrb.mxu2 %v3958_v8  ;;  %1098 = vmatpush.msrb.mxu3 %v3935_v1  ;;  %v4278_v1 = vadd.f32 %v4225_v33, %v4104_v28 }
 0x78b   :  { %1079 = vmatpush.msrb.mxu2 %v3964_v9  ;;  %1099 = vmatpush.msrb.mxu3 %v3940_v2  ;;  %v4284_v9 = vadd.f32 %v4238_v44, %v4112_v35 }
 0x78d   :  { %1080 = vmatpush.msrb.mxu2 %v3979_v14  ;;  %1100 = vmatpush.msrb.mxu3 %v3946_v3 }
 0x78f   :  { %1081 = vmatpush.msrb.mxu2 %v3992_v17  ;;  %1101 = vmatpush.msrb.mxu3 %v3953_v6 }
 0x791   :  { %1082 = vmatpush.msrb.mxu2 %v4005_v20  ;;  %1102 = vmatpush.msrb.mxu3 %v3969_v10 }
 0x793   :  { %1083 = vmatpush.msrb.mxu2 %v4018_v24  ;;  %1103 = vmatpush.msrb.mxu3 %v3984_v15 }
 0x795   :  { %1084 = vmatpush.msrb.mxu2 %v4026_v25  ;;  %1104 = vmatpush.msrb.mxu3 %v3997_v18 }
 0x797   :  { %1085 = vmatpush.msrb.mxu2 %v4033_v26  ;;  %1105 = vmatpush.msrb.mxu3 %v4010_v21 }
 0x80b   :  { %v670_v2 = vpop.f32.mrf.mxu3  ;;  %v650_v8 = vpop.f32.mrf.mxu2 }
 0x80c   :  { %v674_v3 = vadd.f32 %v670_v2, %v4278_v1  ;;  %v673_v10 = vadd.f32 %v650_v8, %v4284_v9  ;;  %v4322_v2 = vld [vmem:[%s5149_s2 + $0x50] sm:$0xff]  ;;  %v4342_v8 = vld [vmem:[%s5149_s2 + $0x38] sm:$0xff] }
 0x80e   :  { %3500 = vtanh.f32 %v674_v3  ;;  %v3350_v14 = vmul.f32 -1.442695, %v673_v10  ;;  %v3351_v13 = vmul.f32 -1.442695, %v674_v3  ;;  %v4328_v3 = vld [vmem:[%s5149_s2 + $0x58] sm:$0xff] }
 0x810   :  { %3502 = vpow2.f32 %v3350_v14 }
 0x814   :  { %v3501_v6 = vpop.eup %3500 }
 0x815   :  { %719 = vrot.lane.b32.xlu1 %v3501_v6, %s3892_s14  ;;  %v4335_v6 = vld [vmem:[%s5149_s2 + $0x48] sm:$0xff] }
 0x816   :  { %v3503_v15 = vpop.eup %3502 }
 0x817   :  { %v681_v18 = vadd.f32 1.0, %v3503_v15 }
 0x819   :  { %3504 = vrcp.f32 %v681_v18  ;;  %v694_v62 = vand.u32 2147483648, %v681_v18  ;;  %vm688_vm8 = vweird.f32 %v681_v18  ;;  %v692_v63 = vand.u32 2147483647, %v681_v18 }
 0x81b   :  { %v695_v44 = vor.u32 1.1754944e-38, %v694_v62  ;;  %vm693_vm10 = vcmp.eq.f32.partialorder %v692_v63, 8.507059e+37 }
 0x81f   :  { %v3505_v33 = vpop.eup %3504 }
 0x820   :  { %v684_v55 = vmul.f32 %v3505_v33, %v681_v18  ;;  %vm689_vm7 = vweird.f32 %v3505_v33 }
 0x821   :  { %vm690_vm9 = vmor %vm688_vm8, %vm689_vm7 }
 0x822   :  { %v685_v57 = vsub.f32 1.0, %v684_v55 }
 0x824   :  { %v686_v59 = vmul.f32 %v3505_v33, %v685_v57 }
 0x826   :  { %v687_v60 = vadd.f32 %v3505_v33, %v686_v59 }
 0x828   :  { %v691_v56 = vsel %vm690_vm9, %v3505_v33, %v687_v60 }
 0x829   :  { %v696_v4 = vsel %vm693_vm10, %v695_v44, %v691_v56 }
 0x82a   :  { %v717_v37 = vmul.f32 %v715_v58, %v696_v4 }
 0x887   :  { %v720_v0 = vpop.permute.xlu1 %719 }
 0x888   :  { %v722_v5 = vmul.f32 %v720_v0, %v696_v4 }
 0x88a   :  { %724 = vrot.lane.b32.xlu2 %v722_v5, %s3892_s14 }
 0x8e4   :  { %v725_v7 = vpop.permute.xlu2 %724 }
 0x8e5   :  { %v4289_v11 = vadd.f32 %v725_v7, %v717_v37 }
 0x8e7   :  { %3506 = vtanh.f32 %v4289_v11  ;;  %v825_v7 = vrot.slane %v4289_v11, 6 }
 0x8e8   :  { %3508 = vpow2.f32 %v3351_v13 }
 0x8ed   :  { %v3507_v12 = vpop.eup %3506 }
 0x8ee   :  { %730 = vrot.lane.b32.xlu0 %v3507_v12, %s3892_s14  ;;  %v3509_v19 = vpop.eup %3508 }
 0x8ef   :  { %v682_v22 = vadd.f32 1.0, %v3509_v19 }
 0x8f1   :  { %3510 = vrcp.f32 %v682_v22  ;;  %v709_v16 = vand.u32 2147483648, %v682_v22  ;;  %vm703_vm12 = vweird.f32 %v682_v22  ;;  %v707_v41 = vand.u32 2147483647, %v682_v22 }
 0x8f3   :  { %v710_v61 = vor.u32 1.1754944e-38, %v709_v16  ;;  %vm708_vm2 = vcmp.eq.f32.partialorder %v707_v41, 8.507059e+37 }
 0x8f7   :  { %v3511_v23 = vpop.eup %3510 }
 0x8f8   :  { %v699_v27 = vmul.f32 %v3511_v23, %v682_v22  ;;  %vm704_vm11 = vweird.f32 %v3511_v23 }
 0x8f9   :  { %vm705_vm13 = vmor %vm703_vm12, %vm704_vm11 }
 0x8fa   :  { %v700_v31 = vsub.f32 1.0, %v699_v27 }
 0x8fc   :  { %v701_v29 = vmul.f32 %v3511_v23, %v700_v31 }
 0x8fe   :  { %v702_v32 = vadd.f32 %v3511_v23, %v701_v29 }
 0x900   :  { %v706_v42 = vsel %vm705_vm13, %v3511_v23, %v702_v32 }
 0x901   :  { %v711_v45 = vsel %vm708_vm2, %v710_v61, %v706_v42 }
 0x960   :  { %v731_v51 = vpop.permute.xlu0 %730 }
 0x961   :  { %v733_v52 = vmul.f32 %v731_v51, %v711_v45 }
 0x963   :  { %3352 = vmatmul.msk.f32.vlgmr.msra.gmra.mxu0 %vm191_vm3, %v733_v52  ;;  %3353 = vmatmul.msk.f32.vlgmr.msra.gmra.mxu1 %vm191_vm3, %v733_v52 }
 0x964   :  { %1182 = vmatpush.msra.mxu0 %v4298_v30  ;;  %1202 = vmatpush.msra.mxu1 %v4304_v53 }
 0x966   :  { %1183 = vmatpush.msra.mxu0 %v4310_v43  ;;  %1203 = vmatpush.msra.mxu1 %v4316_v54 }
 0x968   :  { %1184 = vmatpush.msra.mxu0 %v4322_v2  ;;  %1204 = vmatpush.msra.mxu1 %v4328_v3 }
 0x96a   :  { %1185 = vmatpush.msra.mxu0 %v3992_v17  ;;  %1205 = vmatpush.msra.mxu1 %v4335_v6  ;;  %v4349_v17 = vld [vmem:[%s5149_s2 + $0x28] sm:$0xff] }
 0x96c   :  { %1186 = vmatpush.msra.mxu0 %v4005_v20  ;;  %1206 = vmatpush.msra.mxu1 %v4342_v8  ;;  %v4356_v20 = vld [vmem:[%s5149_s2 + $0x18] sm:$0xff] }
 0x96e   :  { %1187 = vmatpush.msra.mxu0 %v4018_v24  ;;  %1207 = vmatpush.msra.mxu1 %v4349_v17 }
 0x970   :  { %1188 = vmatpush.msra.mxu0 %v4026_v25  ;;  %1208 = vmatpush.msra.mxu1 %v4356_v20 }
 0x972   :  { %1189 = vmatpush.msra.mxu0 %v4033_v26  ;;  %1209 = vmatpush.msra.mxu1 %v4010_v21 }
 0x9e0   :  { %v774_v24 = vpop.f32.mrf.mxu1  ;;  %v754_v25 = vpop.f32.mrf.mxu0 }
 0x9e1   :  { %v780_v10 = vrot.slane %v774_v24, 6  ;;  %v779_v18 = vrot.slane %v754_v25, 6  ;;  %v4388_v25 = vld [vmem:[%s5149_s2 + $0x30] sm:$0xff] }
 0x9e3   :  { %v784_v14 = vadd.f32 %v780_v10, %v4278_v1  ;;  %v783_v33 = vadd.f32 %v779_v18, %v4284_v9  ;;  %v4395_v18 = vld [vmem:[%s5149_s2 + $0x20] sm:$0xff] }
 0x9e5   :  { %3512 = vtanh.f32 %v784_v14  ;;  %v3354_v55 = vmul.f32 -1.442695, %v783_v33  ;;  %v3355_v23 = vmul.f32 -1.442695, %v784_v14  ;;  %v4402_v33 = vld [vmem:[%s5149_s2 + $0x10] sm:$0xff] }
 0x9e7   :  { %3514 = vpow2.f32 %v3354_v55  ;;  %v4409_v55 = vld [vmem:[%s5149_s2] sm:$0xff] }
 0x9eb   :  { %v3513_v15 = vpop.eup %3512 }
 0x9ec   :  { %829 = vrot.lane.b32.xlu1 %v3513_v15, %s3892_s14  ;;  %v4381_v15 = vld [vmem:[%s5149_s2 + $0x40] sm:$0xff] }
 0x9ed   :  { %v3515_v57 = vpop.eup %3514 }
 0x9ee   :  { %v791_v59 = vadd.f32 1.0, %v3515_v57  ;;  %v4415_v57 = vld [vmem:[%s5149_s2 + $0x8] sm:$0xff] }
 0x9f0   :  { %3516 = vrcp.f32 %v791_v59  ;;  %v804_v56 = vand.u32 2147483648, %v791_v59  ;;  %vm798_vm15 = vweird.f32 %v791_v59  ;;  %v802_v44 = vand.u32 2147483647, %v791_v59 }
 0x9f2   :  { %v805_v4 = vor.u32 1.1754944e-38, %v804_v56  ;;  %vm803_vm1 = vcmp.eq.f32.partialorder %v802_v44, 8.507059e+37 }
 0x9f6   :  { %v3517_v26 = vpop.eup %3516 }
 0x9f7   :  { %v794_v60 = vmul.f32 %v3517_v26, %v791_v59  ;;  %vm799_vm14 = vweird.f32 %v3517_v26 }
 0x9f8   :  { %vm800_vm0 = vmor %vm798_vm15, %vm799_vm14 }
 0x9f9   :  { %v795_v21 = vsub.f32 1.0, %v794_v60 }
 0x9fb   :  { %v796_v62 = vmul.f32 %v3517_v26, %v795_v21 }
 0x9fd   :  { %v797_v63 = vadd.f32 %v3517_v26, %v796_v62 }
 0x9ff   :  { %v801_v0 = vsel %vm800_vm0, %v3517_v26, %v797_v63 }
 0xa00   :  { %v806_v58 = vsel %vm803_vm1, %v805_v4, %v801_v0 }
 0xa01   :  { %v827_v12 = vmul.f32 %v825_v7, %v806_v58 }
 0xa5e   :  { %v830_v5 = vpop.permute.xlu1 %829 }
 0xa5f   :  { %v832_v37 = vmul.f32 %v830_v5, %v806_v58 }
 0xa61   :  { %834 = vrot.lane.b32.xlu2 %v832_v37, %s3892_s14 }
 0xabb   :  { %v835_v13 = vpop.permute.xlu2 %834 }
 0xabc   :  { %v4366_v19 = vadd.f32 %v835_v13, %v827_v12 }
 0xabe   :  { %3518 = vtanh.f32 %v4366_v19 }
 0xabf   :  { %3520 = vpow2.f32 %v3355_v23 }
 0xac4   :  { %v3519_v22 = vpop.eup %3518 }
 0xac5   :  { %840 = vrot.lane.b32.xlu0 %v3519_v22, %s3892_s14  ;;  %v3521_v27 = vpop.eup %3520 }
 0xac6   :  { %v792_v31 = vadd.f32 1.0, %v3521_v27 }
 0xac8   :  { %3522 = vrcp.f32 %v792_v31  ;;  %v819_v11 = vand.u32 2147483648, %v792_v31  ;;  %vm813_vm5 = vweird.f32 %v792_v31  ;;  %v817_v61 = vand.u32 2147483647, %v792_v31 }
 0xaca   :  { %v820_v51 = vor.u32 1.1754944e-38, %v819_v11  ;;  %vm818_vm7 = vcmp.eq.f32.partialorder %v817_v61, 8.507059e+37 }
 0xace   :  { %v3523_v29 = vpop.eup %3522 }
 0xacf   :  { %v809_v32 = vmul.f32 %v3523_v29, %v792_v31  ;;  %vm814_vm4 = vweird.f32 %v3523_v29 }
 0xad0   :  { %vm815_vm6 = vmor %vm813_vm5, %vm814_vm4 }
 0xad1   :  { %v810_v16 = vsub.f32 1.0, %v809_v32 }
 0xad3   :  { %v811_v41 = vmul.f32 %v3523_v29, %v810_v16  ;;  %v936_v16 = vrot.slane %v4366_v19, 6 }
 0xad5   :  { %v812_v42 = vadd.f32 %v3523_v29, %v811_v41 }
 0xad7   :  { %v816_v45 = vsel %vm815_vm6, %v3523_v29, %v812_v42 }
 0xad8   :  { %v821_v52 = vsel %vm818_vm7, %v820_v51, %v816_v45 }
 0xb37   :  { %v841_v24 = vpop.permute.xlu0 %840 }
 0xb38   :  { %v843_v10 = vmul.f32 %v841_v24, %v821_v52 }
 0xb3a   :  { %v845_v14 = vrot.slane %v843_v10, 2 }
 0xb3c   :  { %3356 = vmatmul.msk.f32.vlgmr.msra.gmra.mxu2 %vm191_vm3, %v845_v14  ;;  %3357 = vmatmul.msk.f32.vlgmr.msra.gmra.mxu3 %vm191_vm3, %v845_v14 }
 0xb3d   :  { %1293 = vmatpush.msra.mxu2 %v4298_v30  ;;  %1313 = vmatpush.msra.mxu3 %v4304_v53 }
 0xb3f   :  { %1294 = vmatpush.msra.mxu2 %v4310_v43  ;;  %1314 = vmatpush.msra.mxu3 %v4316_v54 }
 0xb41   :  { %1295 = vmatpush.msra.mxu2 %v4322_v2  ;;  %1315 = vmatpush.msra.mxu3 %v4328_v3 }
 0xb43   :  { %1296 = vmatpush.msra.mxu2 %v4381_v15  ;;  %1316 = vmatpush.msra.mxu3 %v4335_v6 }
 0xb45   :  { %1297 = vmatpush.msra.mxu2 %v4388_v25  ;;  %1317 = vmatpush.msra.mxu3 %v4342_v8 }
 0xb47   :  { %1298 = vmatpush.msra.mxu2 %v4395_v18  ;;  %1318 = vmatpush.msra.mxu3 %v4349_v17 }
 0xb49   :  { %1299 = vmatpush.msra.mxu2 %v4402_v33  ;;  %1319 = vmatpush.msra.mxu3 %v4356_v20 }
 0xb4b   :  { %1300 = vmatpush.msra.mxu2 %v4409_v55  ;;  %1320 = vmatpush.msra.mxu3 %v4415_v57 }
 0xbbf   :  { %v885_v59 = vpop.f32.mrf.mxu3  ;;  %v865_v62 = vpop.f32.mrf.mxu2 }
 0xbc0   :  { %v891_v26 = vrot.slane %v885_v59, 4  ;;  %v890_v63 = vrot.slane %v865_v62, 4 }
 0xbc2   :  { %v895_v60 = vadd.f32 %v891_v26, %v4278_v1  ;;  %v894_v56 = vadd.f32 %v890_v63, %v4284_v9 }
 0xbc4   :  { %3524 = vtanh.f32 %v895_v60  ;;  %v3358_v44 = vmul.f32 -1.442695, %v894_v56  ;;  %v3359_v45 = vmul.f32 -1.442695, %v895_v60 }
 0xbc6   :  { %3526 = vpow2.f32 %v3358_v44 }
 0xbca   :  { %v3525_v21 = vpop.eup %3524 }
 0xbcb   :  { %940 = vrot.lane.b32.xlu1 %v3525_v21, %s3892_s14 }
 0xbcc   :  { %v3527_v0 = vpop.eup %3526 }
 0xbcd   :  { %v902_v4 = vadd.f32 1.0, %v3527_v0 }
 0xbcf   :  { %3528 = vrcp.f32 %v902_v4  ;;  %v915_v13 = vand.u32 2147483648, %v902_v4  ;;  %vm909_vm9 = vweird.f32 %v902_v4  ;;  %v913_v22 = vand.u32 2147483647, %v902_v4 }
 0xbd1   :  { %v916_v27 = vor.u32 1.1754944e-38, %v915_v13  ;;  %vm914_vm11 = vcmp.eq.f32.partialorder %v913_v22, 8.507059e+37 }
 0xbd5   :  { %v3529_v5 = vpop.eup %3528 }
 0xbd6   :  { %v905_v58 = vmul.f32 %v3529_v5, %v902_v4  ;;  %vm910_vm8 = vweird.f32 %v3529_v5 }
 0xbd7   :  { %vm911_vm10 = vmor %vm909_vm9, %vm910_vm8 }
 0xbd8   :  { %v906_v37 = vsub.f32 1.0, %v905_v58 }
 0xbda   :  { %v907_v7 = vmul.f32 %v3529_v5, %v906_v37 }
 0xbdc   :  { %v908_v12 = vadd.f32 %v3529_v5, %v907_v7 }
 0xbde   :  { %v912_v23 = vsel %vm911_vm10, %v3529_v5, %v908_v12 }
 0xbdf   :  { %v917_v29 = vsel %vm914_vm11, %v916_v27, %v912_v23 }
 0xbe0   :  { %v938_v41 = vmul.f32 %v936_v16, %v917_v29 }
 0xc3d   :  { %v941_v31 = vpop.permute.xlu1 %940 }
 0xc3e   :  { %v943_v32 = vmul.f32 %v941_v31, %v917_v29 }
 0xc40   :  { %945 = vrot.lane.b32.xlu2 %v943_v32, %s3892_s14 }
 0xc9a   :  { %v946_v42 = vpop.permute.xlu2 %945 }
 0xc9b   :  { %v4423_v11 = vadd.f32 %v946_v42, %v938_v41 }
 0xc9d   :  { %3530 = vtanh.f32 %v4423_v11 }
 0xc9e   :  { %3532 = vpow2.f32 %v3359_v45 }
 0xca3   :  { %v3531_v61 = vpop.eup %3530 }
 0xca4   :  { %951 = vrot.lane.b32.xlu0 %v3531_v61, %s3892_s14  ;;  %v3533_v51 = vpop.eup %3532 }
 0xca5   :  { %v903_v52 = vadd.f32 1.0, %v3533_v51 }
 0xca7   :  { %3534 = vrcp.f32 %v903_v52  ;;  %v930_v19 = vand.u32 2147483648, %v903_v52  ;;  %vm924_vm13 = vweird.f32 %v903_v52  ;;  %v928_v21 = vand.u32 2147483647, %v903_v52 }
 0xca9   :  { %v931_v63 = vor.u32 1.1754944e-38, %v930_v19  ;;  %vm929_vm14 = vcmp.eq.f32.partialorder %v928_v21, 8.507059e+37 }
 0xcad   :  { %v3535_v24 = vpop.eup %3534 }
 0xcae   :  { %v920_v10 = vmul.f32 %v3535_v24, %v903_v52  ;;  %vm925_vm12 = vweird.f32 %v3535_v24 }
 0xcaf   :  { %vm926_vm2 = vmor %vm924_vm13, %vm925_vm12 }
 0xcb0   :  { %v921_v14 = vsub.f32 1.0, %v920_v10 }
 0xcb2   :  { %v922_v59 = vmul.f32 %v3535_v24, %v921_v14 }
 0xcb4   :  { %v923_v26 = vadd.f32 %v3535_v24, %v922_v59 }
 0xcb6   :  { %v927_v62 = vsel %vm926_vm2, %v3535_v24, %v923_v26  ;;  %v1047_v24 = vrot.slane %v4423_v11, 6 }
 0xcb7   :  { %v932_v56 = vsel %vm929_vm14, %v931_v63, %v927_v62 }
 0xd16   :  { %v952_v44 = vpop.permute.xlu0 %951 }
 0xd17   :  { %v954_v60 = vmul.f32 %v952_v44, %v932_v56 }
 0xd19   :  { %v956_v0 = vrot.slane %v954_v60, 4 }
 0xd1b   :  { %3360 = vmatmul.msk.f32.vlgmr.msrb.gmra.mxu0 %vm191_vm3, %v956_v0  ;;  %3361 = vmatmul.msk.f32.vlgmr.msrb.gmra.mxu1 %vm191_vm3, %v956_v0 }
 0xd1c   :  { %1404 = vmatpush.msrb.mxu0 %v4298_v30  ;;  %1424 = vmatpush.msrb.mxu1 %v4304_v53 }
 0xd1e   :  { %1405 = vmatpush.msrb.mxu0 %v4310_v43  ;;  %1425 = vmatpush.msrb.mxu1 %v4316_v54 }
 0xd20   :  { %1406 = vmatpush.msrb.mxu0 %v4322_v2  ;;  %1426 = vmatpush.msrb.mxu1 %v4328_v3 }
 0xd22   :  { %1407 = vmatpush.msrb.mxu0 %v4381_v15  ;;  %1427 = vmatpush.msrb.mxu1 %v4335_v6 }
 0xd24   :  { %1408 = vmatpush.msrb.mxu0 %v4388_v25  ;;  %1428 = vmatpush.msrb.mxu1 %v4342_v8 }
 0xd26   :  { %1409 = vmatpush.msrb.mxu0 %v4395_v18  ;;  %1429 = vmatpush.msrb.mxu1 %v4349_v17 }
 0xd28   :  { %1410 = vmatpush.msrb.mxu0 %v4402_v33  ;;  %1430 = vmatpush.msrb.mxu1 %v4356_v20 }
 0xd2a   :  { %1411 = vmatpush.msrb.mxu0 %v4409_v55  ;;  %1431 = vmatpush.msrb.mxu1 %v4415_v57 }
 0xd98   :  { %v996_v4 = vpop.f32.mrf.mxu1  ;;  %v976_v7 = vpop.f32.mrf.mxu0 }
 0xd99   :  { %v1002_v5 = vrot.slane %v996_v4, 2  ;;  %v1001_v12 = vrot.slane %v976_v7, 2 }
 0xd9b   :  { %v1006_v58 = vadd.f32 %v1002_v5, %v4278_v1  ;;  %v1005_v13 = vadd.f32 %v1001_v12, %v4284_v9 }
 0xd9d   :  { %3536 = vtanh.f32 %v1006_v58  ;;  %v3362_v22 = vmul.f32 -1.442695, %v1005_v13  ;;  %v3363_v19 = vmul.f32 -1.442695, %v1006_v58 }
 0xd9f   :  { %3538 = vpow2.f32 %v3362_v22  ;;  %v4474_v22 = vadd.f32 %v4227_v34, %v4104_v28 }
 0xda3   :  { %v3537_v37 = vpop.eup %3536 }
 0xda4   :  { %1051 = vrot.lane.b32.xlu1 %v3537_v37, %s3892_s14 }
 0xda5   :  { %v3539_v23 = vpop.eup %3538 }
 0xda6   :  { %v1013_v27 = vadd.f32 1.0, %v3539_v23 }
 0xda8   :  { %3540 = vrcp.f32 %v1013_v27  ;;  %v1026_v1 = vand.u32 2147483648, %v1013_v27  ;;  %vm1020_vm0 = vweird.f32 %v1013_v27  ;;  %v1024_v42 = vand.u32 2147483647, %v1013_v27 }
 0xdaa   :  { %v1027_v45 = vor.u32 1.1754944e-38, %v1026_v1  ;;  %vm1025_vm4 = vcmp.eq.f32.partialorder %v1024_v42, 8.507059e+37 }
 0xdae   :  { %v3541_v31 = vpop.eup %3540 }
 0xdaf   :  { %v1016_v29 = vmul.f32 %v3541_v31, %v1013_v27  ;;  %vm1021_vm15 = vweird.f32 %v3541_v31 }
 0xdb0   :  { %vm1022_vm1 = vmor %vm1020_vm0, %vm1021_vm15 }
 0xdb1   :  { %v1017_v32 = vsub.f32 1.0, %v1016_v29 }
 0xdb3   :  { %v1018_v16 = vmul.f32 %v3541_v31, %v1017_v32  ;;  %v4480_v32 = vadd.f32 %v4241_v46, %v4112_v35 }
 0xdb5   :  { %v1019_v41 = vadd.f32 %v3541_v31, %v1018_v16 }
 0xdb7   :  { %v1023_v61 = vsel %vm1022_vm1, %v3541_v31, %v1019_v41 }
 0xdb8   :  { %v1028_v9 = vsel %vm1025_vm4, %v1027_v45, %v1023_v61 }
 0xdb9   :  { %v1049_v10 = vmul.f32 %v1047_v24, %v1028_v9 }
 0xe16   :  { %v1052_v51 = vpop.permute.xlu1 %1051 }
 0xe17   :  { %v1054_v52 = vmul.f32 %v1052_v51, %v1028_v9 }
 0xe19   :  { %1056 = vrot.lane.b32.xlu2 %v1054_v52, %s3892_s14 }
 0xe73   :  { %v1057_v14 = vpop.permute.xlu2 %1056 }
 0xe74   :  { %v4450_v59 = vadd.f32 %v1057_v14, %v1049_v10 }
 0xe76   :  { %3542 = vtanh.f32 %v4450_v59 }
 0xe77   :  { %3544 = vpow2.f32 %v3363_v19 }
 0xe7c   :  { %v3543_v26 = vpop.eup %3542 }
 0xe7d   :  { %1062 = vrot.lane.b32.xlu0 %v3543_v26, %s3892_s14  ;;  %v3545_v21 = vpop.eup %3544 }
 0xe7e   :  { %v1014_v62 = vadd.f32 1.0, %v3545_v21  ;;  %v1152_v21 = vrot.slane %v4450_v59, 6 }
 0xe80   :  { %3546 = vrcp.f32 %v1014_v62  ;;  %v1041_v11 = vand.u32 2147483648, %v1014_v62  ;;  %vm1035_vm6 = vweird.f32 %v1014_v62  ;;  %v1039_v4 = vand.u32 2147483647, %v1014_v62 }
 0xe82   :  { %v1042_v37 = vor.u32 1.1754944e-38, %v1041_v11  ;;  %vm1040_vm8 = vcmp.eq.f32.partialorder %v1039_v4, 8.507059e+37 }
 0xe86   :  { %v3547_v63 = vpop.eup %3546 }
 0xe87   :  { %v1031_v56 = vmul.f32 %v3547_v63, %v1014_v62  ;;  %vm1036_vm5 = vweird.f32 %v3547_v63 }
 0xe88   :  { %vm1037_vm7 = vmor %vm1035_vm6, %vm1036_vm5 }
 0xe89   :  { %v1032_v44 = vsub.f32 1.0, %v1031_v56 }
 0xe8b   :  { %v1033_v60 = vmul.f32 %v3547_v63, %v1032_v44 }
 0xe8d   :  { %v1034_v0 = vadd.f32 %v3547_v63, %v1033_v60 }
 0xe8f   :  { %v1038_v5 = vsel %vm1037_vm7, %v3547_v63, %v1034_v0 }
 0xe90   :  { %v1043_v7 = vsel %vm1040_vm8, %v1042_v37, %v1038_v5 }
 0xeef   :  { %v1063_v12 = vpop.permute.xlu0 %1062 }
 0xef0   :  { %v1065_v58 = vmul.f32 %v1063_v12, %v1043_v7 }
 0xef2   :  { %v1067_v13 = vrot.slane %v1065_v58, 6 }
 0xef4   :  { %3364 = vmatmul.msk.f32.vlgmr.msrb.gmra.mxu2 %vm191_vm3, %v1067_v13  ;;  %3365 = vmatmul.msk.f32.vlgmr.msrb.gmra.mxu3 %vm191_vm3, %v1067_v13 }
 0xef5   :  { %1515 = vmatpush.msrb.mxu2 %v4298_v30  ;;  %1535 = vmatpush.msrb.mxu3 %v4304_v53 }
 0xef7   :  { %1516 = vmatpush.msrb.mxu2 %v4310_v43  ;;  %1536 = vmatpush.msrb.mxu3 %v4316_v54 }
 0xef9   :  { %1517 = vmatpush.msrb.mxu2 %v4322_v2  ;;  %1537 = vmatpush.msrb.mxu3 %v4328_v3 }
 0xefb   :  { %1518 = vmatpush.msrb.mxu2 %v4381_v15  ;;  %1538 = vmatpush.msrb.mxu3 %v4335_v6 }
 0xefd   :  { %1519 = vmatpush.msrb.mxu2 %v4388_v25  ;;  %1539 = vmatpush.msrb.mxu3 %v4342_v8 }
 0xeff   :  { %1520 = vmatpush.msrb.mxu2 %v4395_v18  ;;  %1540 = vmatpush.msrb.mxu3 %v4349_v17 }
 0xf01   :  { %1521 = vmatpush.msrb.mxu2 %v4402_v33  ;;  %1541 = vmatpush.msrb.mxu3 %v4356_v20 }
 0xf03   :  { %1522 = vmatpush.msrb.mxu2 %v4409_v55  ;;  %1542 = vmatpush.msrb.mxu3 %v4415_v57 }
 0xf77   :  { %v1107_v23 = vpop.f32.mrf.mxu3  ;;  %v1087_v29 = vpop.f32.mrf.mxu2 }
 0xf78   :  { %v1111_v27 = vadd.f32 %v1107_v23, %v4474_v22  ;;  %v1110_v16 = vadd.f32 %v1087_v29, %v4480_v32 }
 0xf7a   :  { %3548 = vtanh.f32 %v1111_v27  ;;  %v3366_v41 = vmul.f32 -1.442695, %v1110_v16  ;;  %v3367_v60 = vmul.f32 -1.442695, %v1111_v27 }
 0xf7c   :  { %3550 = vpow2.f32 %v3366_v41 }
 0xf80   :  { %v3549_v31 = vpop.eup %3548 }
 0xf81   :  { %1156 = vrot.lane.b32.xlu1 %v3549_v31, %s3892_s14 }
 0xf82   :  { %v3551_v1 = vpop.eup %3550 }
 0xf83   :  { %v1118_v42 = vadd.f32 1.0, %v3551_v1 }
 0xf85   :  { %3552 = vrcp.f32 %v1118_v42  ;;  %v1131_v52 = vand.u32 2147483648, %v1118_v42  ;;  %vm1125_vm10 = vweird.f32 %v1118_v42  ;;  %v1129_v24 = vand.u32 2147483647, %v1118_v42 }
 0xf87   :  { %v1132_v46 = vor.u32 1.1754944e-38, %v1131_v52  ;;  %vm1130_vm12 = vcmp.eq.f32.partialorder %v1129_v24, 8.507059e+37 }
 0xf8b   :  { %v3553_v34 = vpop.eup %3552 }
 0xf8c   :  { %v1121_v61 = vmul.f32 %v3553_v34, %v1118_v42  ;;  %vm1126_vm9 = vweird.f32 %v3553_v34 }
 0xf8d   :  { %vm1127_vm11 = vmor %vm1125_vm10, %vm1126_vm9 }
 0xf8e   :  { %v1122_v45 = vsub.f32 1.0, %v1121_v61 }
 0xf90   :  { %v1123_v51 = vmul.f32 %v3553_v34, %v1122_v45 }
 0xf92   :  { %v1124_v9 = vadd.f32 %v3553_v34, %v1123_v51 }
 0xf94   :  { %v1128_v10 = vsel %vm1127_vm11, %v3553_v34, %v1124_v9 }
 0xf95   :  { %v1133_v26 = vsel %vm1130_vm12, %v1132_v46, %v1128_v10 }
 0xf96   :  { %v1154_v62 = vmul.f32 %v1152_v21, %v1133_v26 }
 0xff3   :  { %v1157_v14 = vpop.permute.xlu1 %1156 }
 0xff4   :  { %v1159_v19 = vmul.f32 %v1157_v14, %v1133_v26 }
 0xff6   :  { %1161 = vrot.lane.b32.xlu2 %v1159_v19, %s3892_s14 }
0x1050   :  { %v1162_v63 = vpop.permute.xlu2 %1161 }
0x1051   :  { %v4485_v56 = vadd.f32 %v1162_v63, %v1154_v62 }
0x1053   :  { %3554 = vtanh.f32 %v4485_v56 }
0x1054   :  { %3556 = vpow2.f32 %v3367_v60 }
0x1059   :  { %v3555_v44 = vpop.eup %3554 }
0x105a   :  { %1167 = vrot.lane.b32.xlu0 %v3555_v44, %s3892_s14  ;;  %v3557_v0 = vpop.eup %3556 }
0x105b   :  { %v1119_v11 = vadd.f32 1.0, %v3557_v0 }
0x105d   :  { %3558 = vrcp.f32 %v1119_v11  ;;  %v1146_v59 = vand.u32 2147483648, %v1119_v11  ;;  %vm1140_vm2 = vweird.f32 %v1119_v11  ;;  %v1144_v58 = vand.u32 2147483647, %v1119_v11 }
0x105f   :  { %v1147_v23 = vor.u32 1.1754944e-38, %v1146_v59  ;;  %vm1145_vm15 = vcmp.eq.f32.partialorder %v1144_v58, 8.507059e+37 }
0x1063   :  { %v3559_v4 = vpop.eup %3558 }
0x1064   :  { %v1136_v5 = vmul.f32 %v3559_v4, %v1119_v11  ;;  %vm1141_vm13 = vweird.f32 %v3559_v4  ;;  %v1262_v11 = vrot.slane %v4485_v56, 6 }
0x1065   :  { %vm1142_vm14 = vmor %vm1140_vm2, %vm1141_vm13 }
0x1066   :  { %v1137_v37 = vsub.f32 1.0, %v1136_v5 }
0x1068   :  { %v1138_v7 = vmul.f32 %v3559_v4, %v1137_v37 }
0x106a   :  { %v1139_v12 = vadd.f32 %v3559_v4, %v1138_v7 }
0x106c   :  { %v1143_v13 = vsel %vm1142_vm14, %v3559_v4, %v1139_v12 }
0x106d   :  { %v1148_v31 = vsel %vm1145_vm15, %v1147_v23, %v1143_v13 }
0x10cc   :  { %v1168_v29 = vpop.permute.xlu0 %1167 }
0x10cd   :  { %v1170_v27 = vmul.f32 %v1168_v29, %v1148_v31 }
0x10cf   :  { %3368 = vmatmul.msk.f32.vlgmr.msra.gmra.mxu0 %vm191_vm3, %v1170_v27  ;;  %3369 = vmatmul.msk.f32.vlgmr.msra.gmra.mxu1 %vm191_vm3, %v1170_v27 }
0x10d0   :  { %1619 = vmatpush.msra.mxu0 %v4298_v30  ;;  %1639 = vmatpush.msra.mxu1 %v4304_v53 }
0x10d2   :  { %1620 = vmatpush.msra.mxu0 %v4310_v43  ;;  %1640 = vmatpush.msra.mxu1 %v4316_v54 }
0x10d4   :  { %1621 = vmatpush.msra.mxu0 %v4322_v2  ;;  %1641 = vmatpush.msra.mxu1 %v4328_v3 }
0x10d6   :  { %1622 = vmatpush.msra.mxu0 %v4381_v15  ;;  %1642 = vmatpush.msra.mxu1 %v4335_v6 }
0x10d8   :  { %1623 = vmatpush.msra.mxu0 %v4388_v25  ;;  %1643 = vmatpush.msra.mxu1 %v4342_v8 }
0x10da   :  { %1624 = vmatpush.msra.mxu0 %v4395_v18  ;;  %1644 = vmatpush.msra.mxu1 %v4349_v17 }
0x10dc   :  { %1625 = vmatpush.msra.mxu0 %v4402_v33  ;;  %1645 = vmatpush.msra.mxu1 %v4356_v20 }
0x10de   :  { %1626 = vmatpush.msra.mxu0 %v4409_v55  ;;  %1646 = vmatpush.msra.mxu1 %v4415_v57 }
0x114c   :  { %v1211_v16 = vpop.f32.mrf.mxu1  ;;  %v1191_v34 = vpop.f32.mrf.mxu0 }
0x114d   :  { %v1217_v41 = vrot.slane %v1211_v16, 6  ;;  %v1216_v61 = vrot.slane %v1191_v34, 6 }
0x114f   :  { %v1221_v1 = vadd.f32 %v1217_v41, %v4474_v22  ;;  %v1220_v45 = vadd.f32 %v1216_v61, %v4480_v32 }
0x1151   :  { %3560 = vtanh.f32 %v1221_v1  ;;  %v3370_v51 = vmul.f32 -1.442695, %v1220_v45  ;;  %v3371_v12 = vmul.f32 -1.442695, %v1221_v1 }
0x1153   :  { %3562 = vpow2.f32 %v3370_v51 }
0x1157   :  { %v3561_v42 = vpop.eup %3560 }
0x1158   :  { %1266 = vrot.lane.b32.xlu1 %v3561_v42, %s3892_s14 }
0x1159   :  { %v3563_v9 = vpop.eup %3562 }
0x115a   :  { %v1228_v52 = vadd.f32 1.0, %v3563_v9 }
0x115c   :  { %3564 = vrcp.f32 %v1228_v52  ;;  %v1241_v19 = vand.u32 2147483648, %v1228_v52  ;;  %vm1235_vm1 = vweird.f32 %v1228_v52  ;;  %v1239_v21 = vand.u32 2147483647, %v1228_v52 }
0x115e   :  { %v1242_v63 = vor.u32 1.1754944e-38, %v1241_v19  ;;  %vm1240_vm5 = vcmp.eq.f32.partialorder %v1239_v21, 8.507059e+37 }
0x1162   :  { %v3565_v24 = vpop.eup %3564 }
0x1163   :  { %v1231_v10 = vmul.f32 %v3565_v24, %v1228_v52  ;;  %vm1236_vm0 = vweird.f32 %v3565_v24 }
0x1164   :  { %vm1237_vm4 = vmor %vm1235_vm1, %vm1236_vm0 }
0x1165   :  { %v1232_v46 = vsub.f32 1.0, %v1231_v10 }
0x1167   :  { %v1233_v14 = vmul.f32 %v3565_v24, %v1232_v46 }
0x1169   :  { %v1234_v26 = vadd.f32 %v3565_v24, %v1233_v14 }
0x116b   :  { %v1238_v62 = vsel %vm1237_vm4, %v3565_v24, %v1234_v26 }
0x116c   :  { %v1243_v60 = vsel %vm1240_vm5, %v1242_v63, %v1238_v62 }
0x116d   :  { %v1264_v4 = vmul.f32 %v1262_v11, %v1243_v60 }
0x11ca   :  { %v1267_v44 = vpop.permute.xlu1 %1266 }
0x11cb   :  { %v1269_v0 = vmul.f32 %v1267_v44, %v1243_v60 }
0x11cd   :  { %1271 = vrot.lane.b32.xlu2 %v1269_v0, %s3892_s14 }
0x1227   :  { %v1272_v5 = vpop.permute.xlu2 %1271 }
0x1228   :  { %v4512_v37 = vadd.f32 %v1272_v5, %v1264_v4 }
0x122a   :  { %3566 = vtanh.f32 %v4512_v37 }
0x122b   :  { %3568 = vpow2.f32 %v3371_v12 }
0x1230   :  { %v3567_v7 = vpop.eup %3566 }
0x1231   :  { %1277 = vrot.lane.b32.xlu0 %v3567_v7, %s3892_s14  ;;  %v3569_v59 = vpop.eup %3568 }
0x1232   :  { %v1229_v58 = vadd.f32 1.0, %v3569_v59 }
0x1234   :  { %3570 = vrcp.f32 %v1229_v58  ;;  %v1256_v56 = vand.u32 2147483648, %v1229_v58  ;;  %vm1250_vm7 = vweird.f32 %v1229_v58  ;;  %v1254_v16 = vand.u32 2147483647, %v1229_v58 }
0x1236   :  { %v1257_v42 = vor.u32 1.1754944e-38, %v1256_v56  ;;  %vm1255_vm9 = vcmp.eq.f32.partialorder %v1254_v16, 8.507059e+37 }
0x123a   :  { %v3571_v13 = vpop.eup %3570 }
0x123b   :  { %v1246_v23 = vmul.f32 %v3571_v13, %v1229_v58  ;;  %vm1251_vm6 = vweird.f32 %v3571_v13 }
0x123c   :  { %vm1252_vm8 = vmor %vm1250_vm7, %vm1251_vm6 }
0x123d   :  { %v1247_v31 = vsub.f32 1.0, %v1246_v23 }
0x123f   :  { %v1248_v29 = vmul.f32 %v3571_v13, %v1247_v31 }
0x1241   :  { %v1249_v27 = vadd.f32 %v3571_v13, %v1248_v29 }
0x1243   :  { %v1253_v41 = vsel %vm1252_vm8, %v3571_v13, %v1249_v27  ;;  %v1373_v13 = vrot.slane %v4512_v37, 6 }
0x1244   :  { %v1258_v34 = vsel %vm1255_vm9, %v1257_v42, %v1253_v41 }
0x12a3   :  { %v1278_v61 = vpop.permute.xlu0 %1277 }
0x12a4   :  { %v1280_v1 = vmul.f32 %v1278_v61, %v1258_v34 }
0x12a6   :  { %v1282_v45 = vrot.slane %v1280_v1, 2 }
0x12a8   :  { %3372 = vmatmul.msk.f32.vlgmr.msra.gmra.mxu2 %vm191_vm3, %v1282_v45  ;;  %3373 = vmatmul.msk.f32.vlgmr.msra.gmra.mxu3 %vm191_vm3, %v1282_v45 }
0x12a9   :  { %1730 = vmatpush.msra.mxu2 %v4298_v30  ;;  %1750 = vmatpush.msra.mxu3 %v4304_v53 }
0x12ab   :  { %1731 = vmatpush.msra.mxu2 %v4310_v43  ;;  %1751 = vmatpush.msra.mxu3 %v4316_v54 }
0x12ad   :  { %1732 = vmatpush.msra.mxu2 %v4322_v2  ;;  %1752 = vmatpush.msra.mxu3 %v4328_v3 }
0x12af   :  { %1733 = vmatpush.msra.mxu2 %v4381_v15  ;;  %1753 = vmatpush.msra.mxu3 %v4335_v6 }
0x12b1   :  { %1734 = vmatpush.msra.mxu2 %v4388_v25  ;;  %1754 = vmatpush.msra.mxu3 %v4342_v8 }
0x12b3   :  { %1735 = vmatpush.msra.mxu2 %v4395_v18  ;;  %1755 = vmatpush.msra.mxu3 %v4349_v17 }
0x12b5   :  { %1736 = vmatpush.msra.mxu2 %v4402_v33  ;;  %1756 = vmatpush.msra.mxu3 %v4356_v20 }
0x12b7   :  { %1737 = vmatpush.msra.mxu2 %v4409_v55  ;;  %1757 = vmatpush.msra.mxu3 %v4415_v57 }
0x132b   :  { %v1322_v51 = vpop.f32.mrf.mxu3  ;;  %v1302_v10 = vpop.f32.mrf.mxu2 }
0x132c   :  { %v1328_v9 = vrot.slane %v1322_v51, 4  ;;  %v1327_v46 = vrot.slane %v1302_v10, 4 }
0x132e   :  { %v1332_v52 = vadd.f32 %v1328_v9, %v4474_v22  ;;  %v1331_v14 = vadd.f32 %v1327_v46, %v4480_v32 }
0x1330   :  { %3572 = vtanh.f32 %v1332_v52  ;;  %v3374_v26 = vmul.f32 -1.442695, %v1331_v14  ;;  %v3375_v56 = vmul.f32 -1.442695, %v1332_v52 }
0x1332   :  { %3574 = vpow2.f32 %v3374_v26 }
0x1336   :  { %v3573_v24 = vpop.eup %3572 }
0x1337   :  { %1377 = vrot.lane.b32.xlu1 %v3573_v24, %s3892_s14 }
0x1338   :  { %v3575_v19 = vpop.eup %3574 }
0x1339   :  { %v1339_v21 = vadd.f32 1.0, %v3575_v19 }
0x133b   :  { %3576 = vrcp.f32 %v1339_v21  ;;  %v1352_v11 = vand.u32 2147483648, %v1339_v21  ;;  %vm1346_vm11 = vweird.f32 %v1339_v21  ;;  %v1350_v4 = vand.u32 2147483647, %v1339_v21 }
0x133d   :  { %v1353_v7 = vor.u32 1.1754944e-38, %v1352_v11  ;;  %vm1351_vm13 = vcmp.eq.f32.partialorder %v1350_v4, 8.507059e+37 }
0x1341   :  { %v3577_v62 = vpop.eup %3576 }
0x1342   :  { %v1342_v63 = vmul.f32 %v3577_v62, %v1339_v21  ;;  %vm1347_vm10 = vweird.f32 %v3577_v62 }
0x1343   :  { %vm1348_vm12 = vmor %vm1346_vm11, %vm1347_vm10 }
0x1344   :  { %v1343_v44 = vsub.f32 1.0, %v1342_v63 }
0x1346   :  { %v1344_v60 = vmul.f32 %v3577_v62, %v1343_v44 }
0x1348   :  { %v1345_v0 = vadd.f32 %v3577_v62, %v1344_v60 }
0x134a   :  { %v1349_v5 = vsel %vm1348_vm12, %v3577_v62, %v1345_v0 }
0x134b   :  { %v1354_v59 = vsel %vm1351_vm13, %v1353_v7, %v1349_v5 }
0x134c   :  { %v1375_v23 = vmul.f32 %v1373_v13, %v1354_v59 }
0x13a9   :  { %v1378_v12 = vpop.permute.xlu1 %1377 }
0x13aa   :  { %v1380_v58 = vmul.f32 %v1378_v12, %v1354_v59 }
0x13ac   :  { %1382 = vrot.lane.b32.xlu2 %v1380_v58, %s3892_s14 }
0x1406   :  { %v1383_v31 = vpop.permute.xlu2 %1382 }
0x1407   :  { %v4539_v29 = vadd.f32 %v1383_v31, %v1375_v23 }
0x1409   :  { %3578 = vtanh.f32 %v4539_v29  ;;  %v1484_v5 = vrot.slane %v4539_v29, 6 }
0x140a   :  { %3580 = vpow2.f32 %v3375_v56 }
0x140f   :  { %v3579_v27 = vpop.eup %3578 }
0x1410   :  { %1388 = vrot.lane.b32.xlu0 %v3579_v27, %s3892_s14  ;;  %v3581_v16 = vpop.eup %3580 }
0x1411   :  { %v1340_v41 = vadd.f32 1.0, %v3581_v16 }
0x1413   :  { %3582 = vrcp.f32 %v1340_v41  ;;  %v1367_v37 = vand.u32 2147483648, %v1340_v41  ;;  %vm1361_vm14 = vweird.f32 %v1340_v41  ;;  %v1365_v51 = vand.u32 2147483647, %v1340_v41 }
0x1415   :  { %v1368_v24 = vor.u32 1.1754944e-38, %v1367_v37  ;;  %vm1366_vm0 = vcmp.eq.f32.partialorder %v1365_v51, 8.507059e+37 }
0x1419   :  { %v3583_v42 = vpop.eup %3582 }
0x141a   :  { %v1357_v34 = vmul.f32 %v3583_v42, %v1340_v41  ;;  %vm1362_vm2 = vweird.f32 %v3583_v42 }
0x141b   :  { %vm1363_vm15 = vmor %vm1361_vm14, %vm1362_vm2 }
0x141c   :  { %v1358_v61 = vsub.f32 1.0, %v1357_v34 }
0x141e   :  { %v1359_v1 = vmul.f32 %v3583_v42, %v1358_v61 }
0x1420   :  { %v1360_v45 = vadd.f32 %v3583_v42, %v1359_v1 }
0x1422   :  { %v1364_v9 = vsel %vm1363_vm15, %v3583_v42, %v1360_v45 }
0x1423   :  { %v1369_v10 = vsel %vm1366_vm0, %v1368_v24, %v1364_v9  ;;  %v4575_v24 = vld [vmem:[%s5149_s2 + $0x70] sm:$0xff] }
0x1482   :  { %v1389_v46 = vpop.permute.xlu0 %1388 }
0x1483   :  { %v1391_v52 = vmul.f32 %v1389_v46, %v1369_v10  ;;  %v4581_v10 = vld [vmem:[%s5149_s2 + $0x78] sm:$0xff]  ;;  %v4587_v46 = vld [vmem:[%s5149_s2 + $0x60] sm:$0xff] }
0x1485   :  { %v1393_v14 = vrot.slane %v1391_v52, 4  ;;  %v4593_v52 = vld [vmem:[%s5149_s2 + $0x68] sm:$0xff] }
0x1487   :  { %3376 = vmatmul.msk.f32.vlgmr.msrb.gmra.mxu0 %vm191_vm3, %v1393_v14  ;;  %3377 = vmatmul.msk.f32.vlgmr.msrb.gmra.mxu1 %vm191_vm3, %v1393_v14  ;;  %v4599_v14 = vld [vmem:[%s5149_s2 + $0x50] sm:$0xff] }
0x1488   :  { %1841 = vmatpush.msrb.mxu0 %v4298_v30  ;;  %1861 = vmatpush.msrb.mxu1 %v4304_v53 }
0x148a   :  { %1842 = vmatpush.msrb.mxu0 %v4310_v43  ;;  %1862 = vmatpush.msrb.mxu1 %v4316_v54 }
0x148c   :  { %1843 = vmatpush.msrb.mxu0 %v4322_v2  ;;  %1863 = vmatpush.msrb.mxu1 %v4328_v3 }
0x148e   :  { %1844 = vmatpush.msrb.mxu0 %v4381_v15  ;;  %1864 = vmatpush.msrb.mxu1 %v4335_v6 }
0x1490   :  { %1845 = vmatpush.msrb.mxu0 %v4388_v25  ;;  %1865 = vmatpush.msrb.mxu1 %v4342_v8 }
0x1492   :  { %1846 = vmatpush.msrb.mxu0 %v4395_v18  ;;  %1866 = vmatpush.msrb.mxu1 %v4349_v17 }
0x1494   :  { %1847 = vmatpush.msrb.mxu0 %v4402_v33  ;;  %1867 = vmatpush.msrb.mxu1 %v4356_v20 }
0x1496   :  { %1848 = vmatpush.msrb.mxu0 %v4409_v55  ;;  %1868 = vmatpush.msrb.mxu1 %v4415_v57 }
0x1504   :  { %v1433_v30 = vpop.f32.mrf.mxu1  ;;  %v1413_v2 = vpop.f32.mrf.mxu0 }
0x1505   :  { %v1439_v53 = vrot.slane %v1433_v30, 2  ;;  %v1438_v3 = vrot.slane %v1413_v2, 2  ;;  %v4605_v30 = vld [vmem:[%s5149_s2 + $0x58] sm:$0xff] }
0x1507   :  { %v1443_v43 = vadd.f32 %v1439_v53, %v4474_v22  ;;  %v1442_v6 = vadd.f32 %v1438_v3, %v4480_v32  ;;  %v4612_v53 = vld [vmem:[%s5149_s2 + $0x48] sm:$0xff] }
0x1509   :  { %3584 = vtanh.f32 %v1443_v43  ;;  %v3378_v8 = vmul.f32 -1.442695, %v1442_v6  ;;  %v3379_v13 = vmul.f32 -1.442695, %v1443_v43  ;;  %v4619_v43 = vld [vmem:[%s5149_s2 + $0x38] sm:$0xff]  ;;  %v4646_v6 = vadd.f32 %v4243_v47, %v4112_v35 }
0x150b   :  { %3586 = vpow2.f32 %v3378_v8 }
0x150f   :  { %v3585_v54 = vpop.eup %3584 }
0x1510   :  { %1488 = vrot.lane.b32.xlu1 %v3585_v54, %s3892_s14 }
0x1511   :  { %v3587_v17 = vpop.eup %3586 }
0x1512   :  { %v1450_v20 = vadd.f32 1.0, %v3587_v17 }
0x1514   :  { %3588 = vrcp.f32 %v1450_v20  ;;  %v1463_v22 = vand.u32 2147483648, %v1450_v20  ;;  %vm1457_vm4 = vweird.f32 %v1450_v20  ;;  %v1461_v44 = vand.u32 2147483647, %v1450_v20 }
0x1516   :  { %v1464_v0 = vor.u32 1.1754944e-38, %v1463_v22  ;;  %vm1462_vm6 = vcmp.eq.f32.partialorder %v1461_v44, 8.507059e+37 }
0x151a   :  { %v3589_v26 = vpop.eup %3588 }
0x151b   :  { %v1453_v19 = vmul.f32 %v3589_v26, %v1450_v20  ;;  %vm1458_vm1 = vweird.f32 %v3589_v26 }
0x151c   :  { %vm1459_vm5 = vmor %vm1457_vm4, %vm1458_vm1 }
0x151d   :  { %v1454_v21 = vsub.f32 1.0, %v1453_v19 }
0x151f   :  { %v1455_v62 = vmul.f32 %v3589_v26, %v1454_v21 }
0x1521   :  { %v1456_v63 = vadd.f32 %v3589_v26, %v1455_v62 }
0x1523   :  { %v1460_v60 = vsel %vm1459_vm5, %v3589_v26, %v1456_v63 }
0x1524   :  { %v1465_v32 = vsel %vm1462_vm6, %v1464_v0, %v1460_v60 }
0x1525   :  { %v1486_v7 = vmul.f32 %v1484_v5, %v1465_v32 }
0x1582   :  { %v1489_v11 = vpop.permute.xlu1 %1488 }
0x1583   :  { %v1491_v4 = vmul.f32 %v1489_v11, %v1465_v32 }
0x1585   :  { %1493 = vrot.lane.b32.xlu2 %v1491_v4, %s3892_s14 }
0x15df   :  { %v1494_v12 = vpop.permute.xlu2 %1493 }
0x15e0   :  { %v4566_v59 = vadd.f32 %v1494_v12, %v1486_v7 }
0x15e2   :  { %3590 = vtanh.f32 %v4566_v59  ;;  %v1589_v11 = vrot.slane %v4566_v59, 6 }
0x15e3   :  { %3592 = vpow2.f32 %v3379_v13 }
0x15e8   :  { %v3591_v58 = vpop.eup %3590 }
0x15e9   :  { %1499 = vrot.lane.b32.xlu0 %v3591_v58, %s3892_s14  ;;  %v3593_v23 = vpop.eup %3592 }
0x15ea   :  { %v1451_v31 = vadd.f32 1.0, %v3593_v23 }
0x15ec   :  { %3594 = vrcp.f32 %v1451_v31  ;;  %v1478_v29 = vand.u32 2147483648, %v1451_v31  ;;  %vm1472_vm8 = vweird.f32 %v1451_v31  ;;  %v1476_v34 = vand.u32 2147483647, %v1451_v31 }
0x15ee   :  { %v1479_v1 = vor.u32 1.1754944e-38, %v1478_v29  ;;  %vm1477_vm10 = vcmp.eq.f32.partialorder %v1476_v34, 8.507059e+37 }
0x15f2   :  { %v3595_v27 = vpop.eup %3594 }
0x15f3   :  { %v1468_v56 = vmul.f32 %v3595_v27, %v1451_v31  ;;  %vm1473_vm7 = vweird.f32 %v3595_v27 }
0x15f4   :  { %vm1474_vm9 = vmor %vm1472_vm8, %vm1473_vm7 }
0x15f5   :  { %v1469_v16 = vsub.f32 1.0, %v1468_v56 }
0x15f7   :  { %v1470_v41 = vmul.f32 %v3595_v27, %v1469_v16 }
0x15f9   :  { %v1471_v42 = vadd.f32 %v3595_v27, %v1470_v41 }
0x15fb   :  { %v1475_v61 = vsel %vm1474_vm9, %v3595_v27, %v1471_v42 }
0x15fc   :  { %v1480_v45 = vsel %vm1477_vm10, %v1479_v1, %v1475_v61 }
0x165b   :  { %v1500_v37 = vpop.permute.xlu0 %1499 }
0x165c   :  { %v1502_v51 = vmul.f32 %v1500_v37, %v1480_v45  ;;  %v4666_v45 = vld [vmem:[%s5149_s2 + $0x40] sm:$0xff]  ;;  %v4673_v37 = vld [vmem:[%s5149_s2 + $0x30] sm:$0xff] }
0x165e   :  { %v1504_v9 = vrot.slane %v1502_v51, 6  ;;  %v4680_v51 = vld [vmem:[%s5149_s2 + $0x20] sm:$0xff] }
0x1660   :  { %3380 = vmatmul.msk.f32.vlgmr.msrb.gmra.mxu2 %vm191_vm3, %v1504_v9  ;;  %3381 = vmatmul.msk.f32.vlgmr.msrb.gmra.mxu3 %vm191_vm3, %v1504_v9  ;;  %v4687_v9 = vld [vmem:[%s5149_s2 + $0x10] sm:$0xff] }
0x1661   :  { %1952 = vmatpush.msrb.mxu2 %v4575_v24  ;;  %1972 = vmatpush.msrb.mxu3 %v4581_v10 }
0x1663   :  { %1953 = vmatpush.msrb.mxu2 %v4587_v46  ;;  %1973 = vmatpush.msrb.mxu3 %v4593_v52 }
0x1665   :  { %1954 = vmatpush.msrb.mxu2 %v4599_v14  ;;  %1974 = vmatpush.msrb.mxu3 %v4605_v30 }
0x1667   :  { %1955 = vmatpush.msrb.mxu2 %v4381_v15  ;;  %1975 = vmatpush.msrb.mxu3 %v4612_v53  ;;  %v4626_v15 = vld [vmem:[%s5149_s2 + $0x28] sm:$0xff] }
0x1669   :  { %1956 = vmatpush.msrb.mxu2 %v4388_v25  ;;  %1976 = vmatpush.msrb.mxu3 %v4619_v43  ;;  %v4633_v25 = vld [vmem:[%s5149_s2 + $0x18] sm:$0xff] }
0x166b   :  { %1957 = vmatpush.msrb.mxu2 %v4395_v18  ;;  %1977 = vmatpush.msrb.mxu3 %v4626_v15  ;;  %v4640_v18 = vadd.f32 %v4229_v36, %v4104_v28 }
0x166d   :  { %1958 = vmatpush.msrb.mxu2 %v4402_v33  ;;  %1978 = vmatpush.msrb.mxu3 %v4633_v25 }
0x166f   :  { %1959 = vmatpush.msrb.mxu2 %v4409_v55  ;;  %1979 = vmatpush.msrb.mxu3 %v4415_v57 }
0x16e3   :  { %v1544_v54 = vpop.f32.mrf.mxu3  ;;  %v1524_v3 = vpop.f32.mrf.mxu2 }
0x16e4   :  { %v1548_v2 = vadd.f32 %v1544_v54, %v4640_v18  ;;  %v1547_v55 = vadd.f32 %v1524_v3, %v4646_v6  ;;  %v4694_v54 = vld [vmem:[%s5149_s2] sm:$0xff] }
0x16e6   :  { %3596 = vtanh.f32 %v1548_v2  ;;  %v3382_v8 = vmul.f32 -1.442695, %v1547_v55  ;;  %v3383_v12 = vmul.f32 -1.442695, %v1548_v2  ;;  %v4700_v2 = vld [vmem:[%s5149_s2 + $0x8] sm:$0xff] }
0x16e8   :  { %3598 = vpow2.f32 %v3382_v8 }
0x16ec   :  { %v3597_v33 = vpop.eup %3596 }
0x16ed   :  { %1593 = vrot.lane.b32.xlu1 %v3597_v33, %s3892_s14 }
0x16ee   :  { %v3599_v57 = vpop.eup %3598 }
0x16ef   :  { %v1555_v17 = vadd.f32 1.0, %v3599_v57 }
0x16f1   :  { %3600 = vrcp.f32 %v1555_v17  ;;  %v1568_v62 = vand.u32 2147483648, %v1555_v17  ;;  %vm1562_vm12 = vweird.f32 %v1555_v17  ;;  %v1566_v63 = vand.u32 2147483647, %v1555_v17 }
0x16f3   :  { %v1569_v47 = vor.u32 1.1754944e-38, %v1568_v62  ;;  %vm1567_vm2 = vcmp.eq.f32.partialorder %v1566_v63, 8.507059e+37 }
0x16f7   :  { %v3601_v36 = vpop.eup %3600 }
0x16f8   :  { %v1558_v20 = vmul.f32 %v3601_v36, %v1555_v17  ;;  %vm1563_vm11 = vweird.f32 %v3601_v36 }
0x16f9   :  { %vm1564_vm13 = vmor %vm1562_vm12, %vm1563_vm11 }
0x16fa   :  { %v1559_v26 = vsub.f32 1.0, %v1558_v20 }
0x16fc   :  { %v1560_v19 = vmul.f32 %v3601_v36, %v1559_v26 }
0x16fe   :  { %v1561_v21 = vadd.f32 %v3601_v36, %v1560_v19 }
0x1700   :  { %v1565_v22 = vsel %vm1564_vm13, %v3601_v36, %v1561_v21 }
0x1701   :  { %v1570_v60 = vsel %vm1567_vm2, %v1569_v47, %v1565_v22 }
0x1702   :  { %v1591_v32 = vmul.f32 %v1589_v11, %v1570_v60 }
0x175f   :  { %v1594_v44 = vpop.permute.xlu1 %1593 }
0x1760   :  { %v1596_v0 = vmul.f32 %v1594_v44, %v1570_v60 }
0x1762   :  { %1598 = vrot.lane.b32.xlu2 %v1596_v0, %s3892_s14 }
0x17bc   :  { %v1599_v4 = vpop.permute.xlu2 %1598 }
0x17bd   :  { %v4651_v5 = vadd.f32 %v1599_v4, %v1591_v32 }
0x17bf   :  { %3602 = vtanh.f32 %v4651_v5 }
0x17c0   :  { %3604 = vpow2.f32 %v3383_v12  ;;  %v1699_v12 = vrot.slane %v4651_v5, 6 }
0x17c5   :  { %v3603_v7 = vpop.eup %3602 }
0x17c6   :  { %1604 = vrot.lane.b32.xlu0 %v3603_v7, %s3892_s14  ;;  %v3605_v58 = vpop.eup %3604 }
0x17c7   :  { %v1556_v13 = vadd.f32 1.0, %v3605_v58 }
0x17c9   :  { %3606 = vrcp.f32 %v1556_v13  ;;  %v1583_v59 = vand.u32 2147483648, %v1556_v13  ;;  %vm1577_vm15 = vweird.f32 %v1556_v13  ;;  %v1581_v41 = vand.u32 2147483647, %v1556_v13 }
0x17cb   :  { %v1584_v29 = vor.u32 1.1754944e-38, %v1583_v59  ;;  %vm1582_vm1 = vcmp.eq.f32.partialorder %v1581_v41, 8.507059e+37 }
0x17cf   :  { %v3607_v23 = vpop.eup %3606 }
0x17d0   :  { %v1573_v31 = vmul.f32 %v3607_v23, %v1556_v13  ;;  %vm1578_vm14 = vweird.f32 %v3607_v23 }
0x17d1   :  { %vm1579_vm0 = vmor %vm1577_vm15, %vm1578_vm14 }
0x17d2   :  { %v1574_v27 = vsub.f32 1.0, %v1573_v31 }
0x17d4   :  { %v1575_v56 = vmul.f32 %v3607_v23, %v1574_v27 }
0x17d6   :  { %v1576_v16 = vadd.f32 %v3607_v23, %v1575_v56 }
0x17d8   :  { %v1580_v42 = vsel %vm1579_vm0, %v3607_v23, %v1576_v16 }
0x17d9   :  { %v1585_v34 = vsel %vm1582_vm1, %v1584_v29, %v1580_v42 }
0x1838   :  { %v1605_v61 = vpop.permute.xlu0 %1604 }
0x1839   :  { %v1607_v1 = vmul.f32 %v1605_v61, %v1585_v34 }
0x183b   :  { %3384 = vmatmul.msk.f32.vlgmr.msra.gmra.mxu0 %vm191_vm3, %v1607_v1  ;;  %3385 = vmatmul.msk.f32.vlgmr.msra.gmra.mxu1 %vm191_vm3, %v1607_v1 }
0x183c   :  { %2056 = vmatpush.msra.mxu0 %v4575_v24  ;;  %2076 = vmatpush.msra.mxu1 %v4581_v10 }
0x183e   :  { %2057 = vmatpush.msra.mxu0 %v4587_v46  ;;  %2077 = vmatpush.msra.mxu1 %v4593_v52 }
0x1840   :  { %2058 = vmatpush.msra.mxu0 %v4599_v14  ;;  %2078 = vmatpush.msra.mxu1 %v4605_v30 }
0x1842   :  { %2059 = vmatpush.msra.mxu0 %v4666_v45  ;;  %2079 = vmatpush.msra.mxu1 %v4612_v53 }
0x1844   :  { %2060 = vmatpush.msra.mxu0 %v4673_v37  ;;  %2080 = vmatpush.msra.mxu1 %v4619_v43 }
0x1846   :  { %2061 = vmatpush.msra.mxu0 %v4680_v51  ;;  %2081 = vmatpush.msra.mxu1 %v4626_v15 }
0x1848   :  { %2062 = vmatpush.msra.mxu0 %v4687_v9  ;;  %2082 = vmatpush.msra.mxu1 %v4633_v25 }
0x184a   :  { %2063 = vmatpush.msra.mxu0 %v4694_v54  ;;  %2083 = vmatpush.msra.mxu1 %v4700_v2 }
0x18b8   :  { %v1648_v33 = vpop.f32.mrf.mxu1  ;;  %v1628_v57 = vpop.f32.mrf.mxu0 }
0x18b9   :  { %v1654_v3 = vrot.slane %v1648_v33, 6  ;;  %v1653_v17 = vrot.slane %v1628_v57, 6 }
0x18bb   :  { %v1658_v55 = vadd.f32 %v1654_v3, %v4640_v18  ;;  %v1657_v36 = vadd.f32 %v1653_v17, %v4646_v6 }
0x18bd   :  { %3608 = vtanh.f32 %v1658_v55  ;;  %v3386_v20 = vmul.f32 -1.442695, %v1657_v36  ;;  %v3387_v27 = vmul.f32 -1.442695, %v1658_v55 }
0x18bf   :  { %3610 = vpow2.f32 %v3386_v20 }
0x18c3   :  { %v3609_v8 = vpop.eup %3608 }
0x18c4   :  { %1703 = vrot.lane.b32.xlu1 %v3609_v8, %s3892_s14 }
0x18c5   :  { %v3611_v26 = vpop.eup %3610 }
0x18c6   :  { %v1665_v19 = vadd.f32 1.0, %v3611_v26 }
0x18c8   :  { %3612 = vrcp.f32 %v1665_v19  ;;  %v1678_v44 = vand.u32 2147483648, %v1665_v19  ;;  %vm1672_vm5 = vweird.f32 %v1665_v19  ;;  %v1676_v60 = vand.u32 2147483647, %v1665_v19 }
0x18ca   :  { %v1679_v11 = vor.u32 1.1754944e-38, %v1678_v44  ;;  %vm1677_vm7 = vcmp.eq.f32.partialorder %v1676_v60, 8.507059e+37 }
0x18ce   :  { %v3613_v21 = vpop.eup %3612 }
0x18cf   :  { %v1668_v62 = vmul.f32 %v3613_v21, %v1665_v19  ;;  %vm1673_vm4 = vweird.f32 %v3613_v21 }
0x18d0   :  { %vm1674_vm6 = vmor %vm1672_vm5, %vm1673_vm4 }
0x18d1   :  { %v1669_v63 = vsub.f32 1.0, %v1668_v62 }
0x18d3   :  { %v1670_v22 = vmul.f32 %v3613_v21, %v1669_v63 }
0x18d5   :  { %v1671_v47 = vadd.f32 %v3613_v21, %v1670_v22 }
0x18d7   :  { %v1675_v0 = vsel %vm1674_vm6, %v3613_v21, %v1671_v47 }
0x18d8   :  { %v1680_v4 = vsel %vm1677_vm7, %v1679_v11, %v1675_v0 }
0x18d9   :  { %v1701_v58 = vmul.f32 %v1699_v12, %v1680_v4 }
0x1936   :  { %v1704_v32 = vpop.permute.xlu1 %1703 }
0x1937   :  { %v1706_v7 = vmul.f32 %v1704_v32, %v1680_v4 }
0x1939   :  { %1708 = vrot.lane.b32.xlu2 %v1706_v7, %s3892_s14 }
0x1993   :  { %v1709_v13 = vpop.permute.xlu2 %1708 }
0x1994   :  { %v4708_v23 = vadd.f32 %v1709_v13, %v1701_v58 }
0x1996   :  { %3614 = vtanh.f32 %v4708_v23 }
0x1997   :  { %3616 = vpow2.f32 %v3387_v27 }
0x199c   :  { %v3615_v31 = vpop.eup %3614 }
0x199d   :  { %1714 = vrot.lane.b32.xlu0 %v3615_v31, %s3892_s14  ;;  %v3617_v56 = vpop.eup %3616 }
0x199e   :  { %v1666_v16 = vadd.f32 1.0, %v3617_v56  ;;  %v1810_v56 = vrot.slane %v4708_v23, 6 }
0x19a0   :  { %3618 = vrcp.f32 %v1666_v16  ;;  %v1693_v5 = vand.u32 2147483648, %v1666_v16  ;;  %vm1687_vm9 = vweird.f32 %v1666_v16  ;;  %v1691_v61 = vand.u32 2147483647, %v1666_v16 }
0x19a2   :  { %v1694_v33 = vor.u32 1.1754944e-38, %v1693_v5  ;;  %vm1692_vm11 = vcmp.eq.f32.partialorder %v1691_v61, 8.507059e+37 }
0x19a6   :  { %v3619_v59 = vpop.eup %3618 }
0x19a7   :  { %v1683_v41 = vmul.f32 %v3619_v59, %v1666_v16  ;;  %vm1688_vm8 = vweird.f32 %v3619_v59 }
0x19a8   :  { %vm1689_vm10 = vmor %vm1687_vm9, %vm1688_vm8 }
0x19a9   :  { %v1684_v42 = vsub.f32 1.0, %v1683_v41 }
0x19ab   :  { %v1685_v29 = vmul.f32 %v3619_v59, %v1684_v42 }
0x19ad   :  { %v1686_v34 = vadd.f32 %v3619_v59, %v1685_v29 }
0x19af   :  { %v1690_v1 = vsel %vm1689_vm10, %v3619_v59, %v1686_v34 }
0x19b0   :  { %v1695_v3 = vsel %vm1692_vm11, %v1694_v33, %v1690_v1 }
0x1a0f   :  { %v1715_v8 = vpop.permute.xlu0 %1714 }
0x1a10   :  { %v1717_v55 = vmul.f32 %v1715_v8, %v1695_v3 }
0x1a12   :  { %v1719_v57 = vrot.slane %v1717_v55, 2 }
0x1a14   :  { %3388 = vmatmul.msk.f32.vlgmr.msra.gmra.mxu2 %vm191_vm3, %v1719_v57  ;;  %3389 = vmatmul.msk.f32.vlgmr.msra.gmra.mxu3 %vm191_vm3, %v1719_v57 }
0x1a15   :  { %2167 = vmatpush.msra.mxu2 %v4575_v24  ;;  %2187 = vmatpush.msra.mxu3 %v4581_v10 }
0x1a17   :  { %2168 = vmatpush.msra.mxu2 %v4587_v46  ;;  %2188 = vmatpush.msra.mxu3 %v4593_v52 }
0x1a19   :  { %2169 = vmatpush.msra.mxu2 %v4599_v14  ;;  %2189 = vmatpush.msra.mxu3 %v4605_v30 }
0x1a1b   :  { %2170 = vmatpush.msra.mxu2 %v4666_v45  ;;  %2190 = vmatpush.msra.mxu3 %v4612_v53 }
0x1a1d   :  { %2171 = vmatpush.msra.mxu2 %v4673_v37  ;;  %2191 = vmatpush.msra.mxu3 %v4619_v43 }
0x1a1f   :  { %2172 = vmatpush.msra.mxu2 %v4680_v51  ;;  %2192 = vmatpush.msra.mxu3 %v4626_v15 }
0x1a21   :  { %2173 = vmatpush.msra.mxu2 %v4687_v9  ;;  %2193 = vmatpush.msra.mxu3 %v4633_v25 }
0x1a23   :  { %2174 = vmatpush.msra.mxu2 %v4694_v54  ;;  %2194 = vmatpush.msra.mxu3 %v4700_v2 }
0x1a97   :  { %v1759_v17 = vpop.f32.mrf.mxu3  ;;  %v1739_v19 = vpop.f32.mrf.mxu2 }
0x1a98   :  { %v1765_v36 = vrot.slane %v1759_v17, 4  ;;  %v1764_v21 = vrot.slane %v1739_v19, 4 }
0x1a9a   :  { %v1769_v20 = vadd.f32 %v1765_v36, %v4640_v18  ;;  %v1768_v62 = vadd.f32 %v1764_v21, %v4646_v6 }
0x1a9c   :  { %3620 = vtanh.f32 %v1769_v20  ;;  %v3390_v63 = vmul.f32 -1.442695, %v1768_v62  ;;  %v3391_v29 = vmul.f32 -1.442695, %v1769_v20 }
0x1a9e   :  { %3622 = vpow2.f32 %v3390_v63 }
0x1aa2   :  { %v3621_v26 = vpop.eup %3620 }
0x1aa3   :  { %1814 = vrot.lane.b32.xlu1 %v3621_v26, %s3892_s14 }
0x1aa4   :  { %v3623_v22 = vpop.eup %3622 }
0x1aa5   :  { %v1776_v47 = vadd.f32 1.0, %v3623_v22 }
0x1aa7   :  { %3624 = vrcp.f32 %v1776_v47  ;;  %v1789_v4 = vand.u32 2147483648, %v1776_v47  ;;  %vm1783_vm13 = vweird.f32 %v1776_v47  ;;  %v1787_v7 = vand.u32 2147483647, %v1776_v47 }
0x1aa9   :  { %v1790_v58 = vor.u32 1.1754944e-38, %v1789_v4  ;;  %vm1788_vm14 = vcmp.eq.f32.partialorder %v1787_v7, 8.507059e+37 }
0x1aad   :  { %v3625_v44 = vpop.eup %3624 }
0x1aae   :  { %v1779_v60 = vmul.f32 %v3625_v44, %v1776_v47  ;;  %vm1784_vm12 = vweird.f32 %v3625_v44 }
0x1aaf   :  { %vm1785_vm2 = vmor %vm1783_vm13, %vm1784_vm12 }
0x1ab0   :  { %v1780_v0 = vsub.f32 1.0, %v1779_v60 }
0x1ab2   :  { %v1781_v11 = vmul.f32 %v3625_v44, %v1780_v0 }
0x1ab4   :  { %v1782_v32 = vadd.f32 %v3625_v44, %v1781_v11 }
0x1ab6   :  { %v1786_v12 = vsel %vm1785_vm2, %v3625_v44, %v1782_v32 }
0x1ab7   :  { %v1791_v31 = vsel %vm1788_vm14, %v1790_v58, %v1786_v12 }
0x1ab8   :  { %v1812_v16 = vmul.f32 %v1810_v56, %v1791_v31 }
0x1b15   :  { %v1815_v13 = vpop.permute.xlu1 %1814 }
0x1b16   :  { %v1817_v27 = vmul.f32 %v1815_v13, %v1791_v31 }
0x1b18   :  { %1819 = vrot.lane.b32.xlu2 %v1817_v27, %s3892_s14 }
0x1b72   :  { %v1820_v59 = vpop.permute.xlu2 %1819 }
0x1b73   :  { %v4735_v41 = vadd.f32 %v1820_v59, %v1812_v16 }
0x1b75   :  { %3626 = vtanh.f32 %v4735_v41 }
0x1b76   :  { %3628 = vpow2.f32 %v3391_v29 }
0x1b7b   :  { %v3627_v42 = vpop.eup %3626 }
0x1b7c   :  { %1825 = vrot.lane.b32.xlu0 %v3627_v42, %s3892_s14  ;;  %v3629_v34 = vpop.eup %3628  ;;  %v1921_v42 = vrot.slane %v4735_v41, 6 }
0x1b7d   :  { %v1777_v5 = vadd.f32 1.0, %v3629_v34 }
0x1b7f   :  { %3630 = vrcp.f32 %v1777_v5  ;;  %v1804_v23 = vand.u32 2147483648, %v1777_v5  ;;  %vm1798_vm0 = vweird.f32 %v1777_v5  ;;  %v1802_v55 = vand.u32 2147483647, %v1777_v5 }
0x1b81   :  { %v1805_v17 = vor.u32 1.1754944e-38, %v1804_v23  ;;  %vm1803_vm4 = vcmp.eq.f32.partialorder %v1802_v55, 8.507059e+37 }
0x1b85   :  { %v3631_v61 = vpop.eup %3630 }
0x1b86   :  { %v1794_v1 = vmul.f32 %v3631_v61, %v1777_v5  ;;  %vm1799_vm15 = vweird.f32 %v3631_v61 }
0x1b87   :  { %vm1800_vm1 = vmor %vm1798_vm0, %vm1799_vm15 }
0x1b88   :  { %v1795_v33 = vsub.f32 1.0, %v1794_v1 }
0x1b8a   :  { %v1796_v3 = vmul.f32 %v3631_v61, %v1795_v33 }
0x1b8c   :  { %v1797_v8 = vadd.f32 %v3631_v61, %v1796_v3 }
0x1b8e   :  { %v1801_v57 = vsel %vm1800_vm1, %v3631_v61, %v1797_v8 }
0x1b8f   :  { %v1806_v36 = vsel %vm1803_vm4, %v1805_v17, %v1801_v57 }
0x1bee   :  { %v1826_v26 = vpop.permute.xlu0 %1825 }
0x1bef   :  { %v1828_v20 = vmul.f32 %v1826_v26, %v1806_v36 }
0x1bf1   :  { %v1830_v19 = vrot.slane %v1828_v20, 4 }
0x1bf3   :  { %3392 = vmatmul.msk.f32.vlgmr.msrb.gmra.mxu0 %vm191_vm3, %v1830_v19  ;;  %3393 = vmatmul.msk.f32.vlgmr.msrb.gmra.mxu1 %vm191_vm3, %v1830_v19 }
0x1bf4   :  { %2278 = vmatpush.msrb.mxu0 %v4575_v24  ;;  %2298 = vmatpush.msrb.mxu1 %v4581_v10 }
0x1bf6   :  { %2279 = vmatpush.msrb.mxu0 %v4587_v46  ;;  %2299 = vmatpush.msrb.mxu1 %v4593_v52 }
0x1bf8   :  { %2280 = vmatpush.msrb.mxu0 %v4599_v14  ;;  %2300 = vmatpush.msrb.mxu1 %v4605_v30 }
0x1bfa   :  { %2281 = vmatpush.msrb.mxu0 %v4666_v45  ;;  %2301 = vmatpush.msrb.mxu1 %v4612_v53 }
0x1bfc   :  { %2282 = vmatpush.msrb.mxu0 %v4673_v37  ;;  %2302 = vmatpush.msrb.mxu1 %v4619_v43 }
0x1bfe   :  { %2283 = vmatpush.msrb.mxu0 %v4680_v51  ;;  %2303 = vmatpush.msrb.mxu1 %v4626_v15 }
0x1c00   :  { %2284 = vmatpush.msrb.mxu0 %v4687_v9  ;;  %2304 = vmatpush.msrb.mxu1 %v4633_v25 }
0x1c02   :  { %2285 = vmatpush.msrb.mxu0 %v4694_v54  ;;  %2305 = vmatpush.msrb.mxu1 %v4700_v2 }
0x1c70   :  { %v1870_v21 = vpop.f32.mrf.mxu1  ;;  %v1850_v47 = vpop.f32.mrf.mxu0 }
0x1c71   :  { %v1876_v62 = vrot.slane %v1870_v21, 2  ;;  %v1875_v44 = vrot.slane %v1850_v47, 2 }
0x1c73   :  { %v1880_v63 = vadd.f32 %v1876_v62, %v4640_v18  ;;  %v1879_v60 = vadd.f32 %v1875_v44, %v4646_v6 }
0x1c75   :  { %3632 = vtanh.f32 %v1880_v63  ;;  %v3394_v0 = vmul.f32 -1.442695, %v1879_v60  ;;  %v3395_v1 = vmul.f32 -1.442695, %v1880_v63 }
0x1c77   :  { %3634 = vpow2.f32 %v3394_v0 }
0x1c7b   :  { %v3633_v22 = vpop.eup %3632 }
0x1c7c   :  { %1925 = vrot.lane.b32.xlu1 %v3633_v22, %s3892_s14  ;;  %v4786_v22 = vadd.f32 %v4231_v38, %v4104_v28 }
0x1c7d   :  { %v3635_v11 = vpop.eup %3634 }
0x1c7e   :  { %v1887_v32 = vadd.f32 1.0, %v3635_v11  ;;  %v4792_v11 = vadd.f32 %v4245_v48, %v4112_v35 }
0x1c80   :  { %3636 = vrcp.f32 %v1887_v32  ;;  %v1900_v18 = vand.u32 2147483648, %v1887_v32  ;;  %vm1894_vm6 = vweird.f32 %v1887_v32  ;;  %v1898_v31 = vand.u32 2147483647, %v1887_v32 }
0x1c82   :  { %v1901_v56 = vor.u32 1.1754944e-38, %v1900_v18  ;;  %vm1899_vm8 = vcmp.eq.f32.partialorder %v1898_v31, 8.507059e+37 }
0x1c86   :  { %v3637_v4 = vpop.eup %3636 }
0x1c87   :  { %v1890_v7 = vmul.f32 %v3637_v4, %v1887_v32  ;;  %vm1895_vm5 = vweird.f32 %v3637_v4 }
0x1c88   :  { %vm1896_vm7 = vmor %vm1894_vm6, %vm1895_vm5 }
0x1c89   :  { %v1891_v12 = vsub.f32 1.0, %v1890_v7 }
0x1c8b   :  { %v1892_v58 = vmul.f32 %v3637_v4, %v1891_v12 }
0x1c8d   :  { %v1893_v13 = vadd.f32 %v3637_v4, %v1892_v58 }
0x1c8f   :  { %v1897_v27 = vsel %vm1896_vm7, %v3637_v4, %v1893_v13 }
0x1c90   :  { %v1902_v6 = vsel %vm1899_vm8, %v1901_v56, %v1897_v27 }
0x1c91   :  { %v1923_v29 = vmul.f32 %v1921_v42, %v1902_v6 }
0x1cee   :  { %v1926_v16 = vpop.permute.xlu1 %1925 }
0x1cef   :  { %v1928_v59 = vmul.f32 %v1926_v16, %v1902_v6 }
0x1cf1   :  { %1930 = vrot.lane.b32.xlu2 %v1928_v59, %s3892_s14 }
0x1d4b   :  { %v1931_v34 = vpop.permute.xlu2 %1930 }
0x1d4c   :  { %v4762_v5 = vadd.f32 %v1931_v34, %v1923_v29 }
0x1d4e   :  { %3638 = vtanh.f32 %v4762_v5  ;;  %v2026_v29 = vrot.slane %v4762_v5, 6 }
0x1d4f   :  { %3640 = vpow2.f32 %v3395_v1 }
0x1d54   :  { %v3639_v61 = vpop.eup %3638 }
0x1d55   :  { %1936 = vrot.lane.b32.xlu0 %v3639_v61, %s3892_s14  ;;  %v3641_v33 = vpop.eup %3640 }
0x1d56   :  { %v1888_v3 = vadd.f32 1.0, %v3641_v33 }
0x1d58   :  { %3642 = vrcp.f32 %v1888_v3  ;;  %v1915_v41 = vand.u32 2147483648, %v1888_v3  ;;  %vm1909_vm10 = vweird.f32 %v1888_v3  ;;  %v1913_v36 = vand.u32 2147483647, %v1888_v3 }
0x1d5a   :  { %v1916_v20 = vor.u32 1.1754944e-38, %v1915_v41  ;;  %vm1914_vm12 = vcmp.eq.f32.partialorder %v1913_v36, 8.507059e+37 }
0x1d5e   :  { %v3643_v8 = vpop.eup %3642 }
0x1d5f   :  { %v1905_v23 = vmul.f32 %v3643_v8, %v1888_v3  ;;  %vm1910_vm9 = vweird.f32 %v3643_v8 }
0x1d60   :  { %vm1911_vm11 = vmor %vm1909_vm10, %vm1910_vm9 }
0x1d61   :  { %v1906_v55 = vsub.f32 1.0, %v1905_v23 }
0x1d63   :  { %v1907_v57 = vmul.f32 %v3643_v8, %v1906_v55 }
0x1d65   :  { %v1908_v17 = vadd.f32 %v3643_v8, %v1907_v57 }
0x1d67   :  { %v1912_v26 = vsel %vm1911_vm11, %v3643_v8, %v1908_v17 }
0x1d68   :  { %v1917_v19 = vsel %vm1914_vm12, %v1916_v20, %v1912_v26 }
0x1dc7   :  { %v1937_v21 = vpop.permute.xlu0 %1936 }
0x1dc8   :  { %v1939_v62 = vmul.f32 %v1937_v21, %v1917_v19 }
0x1dca   :  { %v1941_v63 = vrot.slane %v1939_v62, 6 }
0x1dcc   :  { %3396 = vmatmul.msk.f32.vlgmr.msrb.gmra.mxu2 %vm191_vm3, %v1941_v63  ;;  %3397 = vmatmul.msk.f32.vlgmr.msrb.gmra.mxu3 %vm191_vm3, %v1941_v63 }
0x1dcd   :  { %2389 = vmatpush.msrb.mxu2 %v4575_v24  ;;  %2409 = vmatpush.msrb.mxu3 %v4581_v10 }
0x1dcf   :  { %2390 = vmatpush.msrb.mxu2 %v4587_v46  ;;  %2410 = vmatpush.msrb.mxu3 %v4593_v52 }
0x1dd1   :  { %2391 = vmatpush.msrb.mxu2 %v4599_v14  ;;  %2411 = vmatpush.msrb.mxu3 %v4605_v30 }
0x1dd3   :  { %2392 = vmatpush.msrb.mxu2 %v4666_v45  ;;  %2412 = vmatpush.msrb.mxu3 %v4612_v53 }
0x1dd5   :  { %2393 = vmatpush.msrb.mxu2 %v4673_v37  ;;  %2413 = vmatpush.msrb.mxu3 %v4619_v43 }
0x1dd7   :  { %2394 = vmatpush.msrb.mxu2 %v4680_v51  ;;  %2414 = vmatpush.msrb.mxu3 %v4626_v15 }
0x1dd9   :  { %2395 = vmatpush.msrb.mxu2 %v4687_v9  ;;  %2415 = vmatpush.msrb.mxu3 %v4633_v25 }
0x1ddb   :  { %2396 = vmatpush.msrb.mxu2 %v4694_v54  ;;  %2416 = vmatpush.msrb.mxu3 %v4700_v2 }
0x1e4f   :  { %v1981_v47 = vpop.f32.mrf.mxu3  ;;  %v1961_v0 = vpop.f32.mrf.mxu2 }
0x1e50   :  { %v1985_v44 = vadd.f32 %v1981_v47, %v4786_v22  ;;  %v1984_v32 = vadd.f32 %v1961_v0, %v4792_v11 }
0x1e52   :  { %3644 = vtanh.f32 %v1985_v44  ;;  %v3398_v4 = vmul.f32 -1.442695, %v1984_v32  ;;  %v3399_v3 = vmul.f32 -1.442695, %v1985_v44 }
0x1e54   :  { %3646 = vpow2.f32 %v3398_v4 }
0x1e58   :  { %v3645_v60 = vpop.eup %3644 }
0x1e59   :  { %2030 = vrot.lane.b32.xlu1 %v3645_v60, %s3892_s14 }
0x1e5a   :  { %v3647_v7 = vpop.eup %3646 }
0x1e5b   :  { %v1992_v12 = vadd.f32 1.0, %v3647_v7 }
0x1e5d   :  { %3648 = vrcp.f32 %v1992_v12  ;;  %v2005_v27 = vand.u32 2147483648, %v1992_v12  ;;  %vm1999_vm2 = vweird.f32 %v1992_v12  ;;  %v2003_v56 = vand.u32 2147483647, %v1992_v12 }
0x1e5f   :  { %v2006_v48 = vor.u32 1.1754944e-38, %v2005_v27  ;;  %vm2004_vm15 = vcmp.eq.f32.partialorder %v2003_v56, 8.507059e+37 }
0x1e63   :  { %v3649_v38 = vpop.eup %3648 }
0x1e64   :  { %v1995_v58 = vmul.f32 %v3649_v38, %v1992_v12  ;;  %vm2000_vm13 = vweird.f32 %v3649_v38 }
0x1e65   :  { %vm2001_vm14 = vmor %vm1999_vm2, %vm2000_vm13 }
0x1e66   :  { %v1996_v13 = vsub.f32 1.0, %v1995_v58 }
0x1e68   :  { %v1997_v18 = vmul.f32 %v3649_v38, %v1996_v13 }
0x1e6a   :  { %v1998_v31 = vadd.f32 %v3649_v38, %v1997_v18 }
0x1e6c   :  { %v2002_v16 = vsel %vm2001_vm14, %v3649_v38, %v1998_v31 }
0x1e6d   :  { %v2007_v59 = vsel %vm2004_vm15, %v2006_v48, %v2002_v16 }
0x1e6e   :  { %v2028_v34 = vmul.f32 %v2026_v29, %v2007_v59 }
0x1ecb   :  { %v2031_v6 = vpop.permute.xlu1 %2030 }
0x1ecc   :  { %v2033_v42 = vmul.f32 %v2031_v6, %v2007_v59 }
0x1ece   :  { %2035 = vrot.lane.b32.xlu2 %v2033_v42, %s3892_s14 }
0x1f28   :  { %v2036_v61 = vpop.permute.xlu2 %2035 }
0x1f29   :  { %v4797_v1 = vadd.f32 %v2036_v61, %v2028_v34 }
0x1f2b   :  { %3650 = vtanh.f32 %v4797_v1  ;;  %v2136_v61 = vrot.slane %v4797_v1, 6 }
0x1f2c   :  { %3652 = vpow2.f32 %v3399_v3 }
0x1f31   :  { %v3651_v33 = vpop.eup %3650 }
0x1f32   :  { %2041 = vrot.lane.b32.xlu0 %v3651_v33, %s3892_s14  ;;  %v3653_v8 = vpop.eup %3652 }
0x1f33   :  { %v1993_v23 = vadd.f32 1.0, %v3653_v8 }
0x1f35   :  { %3654 = vrcp.f32 %v1993_v23  ;;  %v2020_v5 = vand.u32 2147483648, %v1993_v23  ;;  %vm2014_vm1 = vweird.f32 %v1993_v23  ;;  %v2018_v26 = vand.u32 2147483647, %v1993_v23 }
0x1f37   :  { %v2021_v19 = vor.u32 1.1754944e-38, %v2020_v5  ;;  %vm2019_vm5 = vcmp.eq.f32.partialorder %v2018_v26, 8.507059e+37 }
0x1f3b   :  { %v3655_v55 = vpop.eup %3654 }
0x1f3c   :  { %v2010_v57 = vmul.f32 %v3655_v55, %v1993_v23  ;;  %vm2015_vm0 = vweird.f32 %v3655_v55 }
0x1f3d   :  { %vm2016_vm4 = vmor %vm2014_vm1, %vm2015_vm0 }
0x1f3e   :  { %v2011_v17 = vsub.f32 1.0, %v2010_v57 }
0x1f40   :  { %v2012_v41 = vmul.f32 %v3655_v55, %v2011_v17 }
0x1f42   :  { %v2013_v36 = vadd.f32 %v3655_v55, %v2012_v41 }
0x1f44   :  { %v2017_v20 = vsel %vm2016_vm4, %v3655_v55, %v2013_v36 }
0x1f45   :  { %v2022_v21 = vsel %vm2019_vm5, %v2021_v19, %v2017_v20 }
0x1fa4   :  { %v2042_v62 = vpop.permute.xlu0 %2041 }
0x1fa5   :  { %v2044_v63 = vmul.f32 %v2042_v62, %v2022_v21 }
0x1fa7   :  { %3400 = vmatmul.msk.f32.vlgmr.msra.gmra.mxu0 %vm191_vm3, %v2044_v63  ;;  %3401 = vmatmul.msk.f32.vlgmr.msra.gmra.mxu1 %vm191_vm3, %v2044_v63 }
0x1fa8   :  { %2493 = vmatpush.msra.mxu0 %v4575_v24  ;;  %2513 = vmatpush.msra.mxu1 %v4581_v10 }
0x1faa   :  { %2494 = vmatpush.msra.mxu0 %v4587_v46  ;;  %2514 = vmatpush.msra.mxu1 %v4593_v52 }
0x1fac   :  { %2495 = vmatpush.msra.mxu0 %v4599_v14  ;;  %2515 = vmatpush.msra.mxu1 %v4605_v30 }
0x1fae   :  { %2496 = vmatpush.msra.mxu0 %v4666_v45  ;;  %2516 = vmatpush.msra.mxu1 %v4612_v53 }
0x1fb0   :  { %2497 = vmatpush.msra.mxu0 %v4673_v37  ;;  %2517 = vmatpush.msra.mxu1 %v4619_v43 }
0x1fb2   :  { %2498 = vmatpush.msra.mxu0 %v4680_v51  ;;  %2518 = vmatpush.msra.mxu1 %v4626_v15 }
0x1fb4   :  { %2499 = vmatpush.msra.mxu0 %v4687_v9  ;;  %2519 = vmatpush.msra.mxu1 %v4633_v25 }
0x1fb6   :  { %2500 = vmatpush.msra.mxu0 %v4694_v54  ;;  %2520 = vmatpush.msra.mxu1 %v4700_v2 }
0x2024   :  { %v2085_v47 = vpop.f32.mrf.mxu1  ;;  %v2065_v32 = vpop.f32.mrf.mxu0 }
0x2025   :  { %v2091_v44 = vrot.slane %v2085_v47, 6  ;;  %v2090_v4 = vrot.slane %v2065_v32, 6 }
0x2027   :  { %v2095_v60 = vadd.f32 %v2091_v44, %v4786_v22  ;;  %v2094_v7 = vadd.f32 %v2090_v4, %v4792_v11 }
0x2029   :  { %3656 = vtanh.f32 %v2095_v60  ;;  %v3402_v12 = vmul.f32 -1.442695, %v2094_v7  ;;  %v3403_v55 = vmul.f32 -1.442695, %v2095_v60 }
0x202b   :  { %3658 = vpow2.f32 %v3402_v12 }
0x202f   :  { %v3657_v0 = vpop.eup %3656 }
0x2030   :  { %2140 = vrot.lane.b32.xlu1 %v3657_v0, %s3892_s14 }
0x2031   :  { %v3659_v38 = vpop.eup %3658 }
0x2032   :  { %v2102_v58 = vadd.f32 1.0, %v3659_v38 }
0x2034   :  { %3660 = vrcp.f32 %v2102_v58  ;;  %v2115_v16 = vand.u32 2147483648, %v2102_v58  ;;  %vm2109_vm7 = vweird.f32 %v2102_v58  ;;  %v2113_v48 = vand.u32 2147483647, %v2102_v58 }
0x2036   :  { %v2116_v59 = vor.u32 1.1754944e-38, %v2115_v16  ;;  %vm2114_vm9 = vcmp.eq.f32.partialorder %v2113_v48, 8.507059e+37 }
0x203a   :  { %v3661_v13 = vpop.eup %3660 }
0x203b   :  { %v2105_v18 = vmul.f32 %v3661_v13, %v2102_v58  ;;  %vm2110_vm6 = vweird.f32 %v3661_v13 }
0x203c   :  { %vm2111_vm8 = vmor %vm2109_vm7, %vm2110_vm6 }
0x203d   :  { %v2106_v31 = vsub.f32 1.0, %v2105_v18 }
0x203f   :  { %v2107_v27 = vmul.f32 %v3661_v13, %v2106_v31 }
0x2041   :  { %v2108_v56 = vadd.f32 %v3661_v13, %v2107_v27 }
0x2043   :  { %v2112_v6 = vsel %vm2111_vm8, %v3661_v13, %v2108_v56 }
0x2044   :  { %v2117_v29 = vsel %vm2114_vm9, %v2116_v59, %v2112_v6 }
0x2045   :  { %v2138_v33 = vmul.f32 %v2136_v61, %v2117_v29 }
0x20a2   :  { %v2141_v42 = vpop.permute.xlu1 %2140 }
0x20a3   :  { %v2143_v34 = vmul.f32 %v2141_v42, %v2117_v29 }
0x20a5   :  { %2145 = vrot.lane.b32.xlu2 %v2143_v34, %s3892_s14 }
0x20ff   :  { %v2146_v3 = vpop.permute.xlu2 %2145 }
0x2100   :  { %v4824_v8 = vadd.f32 %v2146_v3, %v2138_v33 }
0x2102   :  { %3662 = vtanh.f32 %v4824_v8  ;;  %v2247_v16 = vrot.slane %v4824_v8, 6 }
0x2103   :  { %3664 = vpow2.f32 %v3403_v55 }
0x2108   :  { %v3663_v23 = vpop.eup %3662 }
0x2109   :  { %2151 = vrot.lane.b32.xlu0 %v3663_v23, %s3892_s14  ;;  %v3665_v57 = vpop.eup %3664 }
0x210a   :  { %v2103_v17 = vadd.f32 1.0, %v3665_v57 }
0x210c   :  { %3666 = vrcp.f32 %v2103_v17  ;;  %v2130_v1 = vand.u32 2147483648, %v2103_v17  ;;  %vm2124_vm11 = vweird.f32 %v2103_v17  ;;  %v2128_v19 = vand.u32 2147483647, %v2103_v17 }
0x210e   :  { %v2131_v62 = vor.u32 1.1754944e-38, %v2130_v1  ;;  %vm2129_vm13 = vcmp.eq.f32.partialorder %v2128_v19, 8.507059e+37  ;;  %v4860_v19 = vld [vmem:[%s5149_s2 + $0x70] sm:$0xff] }
0x2112   :  { %v3667_v41 = vpop.eup %3666 }
0x2113   :  { %v2120_v36 = vmul.f32 %v3667_v41, %v2103_v17  ;;  %vm2125_vm10 = vweird.f32 %v3667_v41 }
0x2114   :  { %vm2126_vm12 = vmor %vm2124_vm11, %vm2125_vm10 }
0x2115   :  { %v2121_v5 = vsub.f32 1.0, %v2120_v36 }
0x2117   :  { %v2122_v26 = vmul.f32 %v3667_v41, %v2121_v5 }
0x2119   :  { %v2123_v20 = vadd.f32 %v3667_v41, %v2122_v26 }
0x211b   :  { %v2127_v21 = vsel %vm2126_vm12, %v3667_v41, %v2123_v20 }
0x211c   :  { %v2132_v63 = vsel %vm2129_vm13, %v2131_v62, %v2127_v21  ;;  %v4866_v21 = vld [vmem:[%s5149_s2 + $0x78] sm:$0xff]  ;;  %v4872_v62 = vld [vmem:[%s5149_s2 + $0x60] sm:$0xff] }
0x217b   :  { %v2152_v47 = vpop.permute.xlu0 %2151 }
0x217c   :  { %v2154_v44 = vmul.f32 %v2152_v47, %v2132_v63  ;;  %v4878_v63 = vld [vmem:[%s5149_s2 + $0x68] sm:$0xff]  ;;  %v4884_v47 = vld [vmem:[%s5149_s2 + $0x50] sm:$0xff] }
0x217e   :  { %v2156_v60 = vrot.slane %v2154_v44, 2  ;;  %v4890_v44 = vld [vmem:[%s5149_s2 + $0x58] sm:$0xff] }
0x2180   :  { %3404 = vmatmul.msk.f32.vlgmr.msra.gmra.mxu2 %vm191_vm3, %v2156_v60  ;;  %3405 = vmatmul.msk.f32.vlgmr.msra.gmra.mxu3 %vm191_vm3, %v2156_v60  ;;  %v4897_v60 = vld [vmem:[%s5149_s2 + $0x48] sm:$0xff] }
0x2181   :  { %2604 = vmatpush.msra.mxu2 %v4575_v24  ;;  %2624 = vmatpush.msra.mxu3 %v4581_v10 }
0x2183   :  { %2605 = vmatpush.msra.mxu2 %v4587_v46  ;;  %2625 = vmatpush.msra.mxu3 %v4593_v52 }
0x2185   :  { %2606 = vmatpush.msra.mxu2 %v4599_v14  ;;  %2626 = vmatpush.msra.mxu3 %v4605_v30 }
0x2187   :  { %2607 = vmatpush.msra.mxu2 %v4666_v45  ;;  %2627 = vmatpush.msra.mxu3 %v4612_v53 }
0x2189   :  { %2608 = vmatpush.msra.mxu2 %v4673_v37  ;;  %2628 = vmatpush.msra.mxu3 %v4619_v43 }
0x218b   :  { %2609 = vmatpush.msra.mxu2 %v4680_v51  ;;  %2629 = vmatpush.msra.mxu3 %v4626_v15 }
0x218d   :  { %2610 = vmatpush.msra.mxu2 %v4687_v9  ;;  %2630 = vmatpush.msra.mxu3 %v4633_v25 }
0x218f   :  { %2611 = vmatpush.msra.mxu2 %v4694_v54  ;;  %2631 = vmatpush.msra.mxu3 %v4700_v2 }
0x2203   :  { %v2196_v24 = vpop.f32.mrf.mxu3  ;;  %v2176_v14 = vpop.f32.mrf.mxu2 }
0x2204   :  { %v2202_v10 = vrot.slane %v2196_v24, 4  ;;  %v2201_v30 = vrot.slane %v2176_v14, 4  ;;  %v4904_v24 = vld [vmem:[%s5149_s2 + $0x38] sm:$0xff] }
0x2206   :  { %v2206_v46 = vadd.f32 %v2202_v10, %v4786_v22  ;;  %v2205_v53 = vadd.f32 %v2201_v30, %v4792_v11 }
0x2208   :  { %3668 = vtanh.f32 %v2206_v46  ;;  %v3406_v43 = vmul.f32 -1.442695, %v2205_v53  ;;  %v3407_v29 = vmul.f32 -1.442695, %v2206_v46 }
0x220a   :  { %3670 = vpow2.f32 %v3406_v43 }
0x220e   :  { %v3669_v52 = vpop.eup %3668 }
0x220f   :  { %2251 = vrot.lane.b32.xlu1 %v3669_v52, %s3892_s14 }
0x2210   :  { %v3671_v15 = vpop.eup %3670 }
0x2211   :  { %v2213_v25 = vadd.f32 1.0, %v3671_v15 }
0x2213   :  { %3672 = vrcp.f32 %v2213_v25  ;;  %v2226_v38 = vand.u32 2147483648, %v2213_v25  ;;  %vm2220_vm14 = vweird.f32 %v2213_v25  ;;  %v2224_v58 = vand.u32 2147483647, %v2213_v25 }
0x2215   :  { %v2227_v18 = vor.u32 1.1754944e-38, %v2226_v38  ;;  %vm2225_vm0 = vcmp.eq.f32.partialorder %v2224_v58, 8.507059e+37 }
0x2219   :  { %v3673_v0 = vpop.eup %3672 }
0x221a   :  { %v2216_v32 = vmul.f32 %v3673_v0, %v2213_v25  ;;  %vm2221_vm2 = vweird.f32 %v3673_v0 }
0x221b   :  { %vm2222_vm15 = vmor %vm2220_vm14, %vm2221_vm2 }
0x221c   :  { %v2217_v4 = vsub.f32 1.0, %v2216_v32 }
0x221e   :  { %v2218_v7 = vmul.f32 %v3673_v0, %v2217_v4 }
0x2220   :  { %v2219_v12 = vadd.f32 %v3673_v0, %v2218_v7 }
0x2222   :  { %v2223_v13 = vsel %vm2222_vm15, %v3673_v0, %v2219_v12 }
0x2223   :  { %v2228_v27 = vsel %vm2225_vm0, %v2227_v18, %v2223_v13 }
0x2224   :  { %v2249_v48 = vmul.f32 %v2247_v16, %v2228_v27 }
0x2281   :  { %v2252_v31 = vpop.permute.xlu1 %2251 }
0x2282   :  { %v2254_v56 = vmul.f32 %v2252_v31, %v2228_v27 }
0x2284   :  { %2256 = vrot.lane.b32.xlu2 %v2254_v56, %s3892_s14 }
0x22de   :  { %v2257_v6 = vpop.permute.xlu2 %2256 }
0x22df   :  { %v4851_v59 = vadd.f32 %v2257_v6, %v2249_v48 }
0x22e1   :  { %3674 = vtanh.f32 %v4851_v59  ;;  %v2358_v13 = vrot.slane %v4851_v59, 6 }
0x22e2   :  { %3676 = vpow2.f32 %v3407_v29 }
0x22e7   :  { %v3675_v42 = vpop.eup %3674 }
0x22e8   :  { %2262 = vrot.lane.b32.xlu0 %v3675_v42, %s3892_s14  ;;  %v3677_v34 = vpop.eup %3676 }
0x22e9   :  { %v2214_v61 = vadd.f32 1.0, %v3677_v34 }
0x22eb   :  { %3678 = vrcp.f32 %v2214_v61  ;;  %v2241_v8 = vand.u32 2147483648, %v2214_v61  ;;  %vm2235_vm4 = vweird.f32 %v2214_v61  ;;  %v2239_v17 = vand.u32 2147483647, %v2214_v61 }
0x22ed   :  { %v2242_v36 = vor.u32 1.1754944e-38, %v2241_v8  ;;  %vm2240_vm6 = vcmp.eq.f32.partialorder %v2239_v17, 8.507059e+37 }
0x22f1   :  { %v3679_v33 = vpop.eup %3678 }
0x22f2   :  { %v2231_v3 = vmul.f32 %v3679_v33, %v2214_v61  ;;  %vm2236_vm1 = vweird.f32 %v3679_v33 }
0x22f3   :  { %vm2237_vm5 = vmor %vm2235_vm4, %vm2236_vm1 }
0x22f4   :  { %v2232_v23 = vsub.f32 1.0, %v2231_v3 }
0x22f6   :  { %v2233_v55 = vmul.f32 %v3679_v33, %v2232_v23 }
0x22f8   :  { %v2234_v57 = vadd.f32 %v3679_v33, %v2233_v55 }
0x22fa   :  { %v2238_v41 = vsel %vm2237_vm5, %v3679_v33, %v2234_v57 }
0x22fb   :  { %v2243_v5 = vsel %vm2240_vm6, %v2242_v36, %v2238_v41  ;;  %v4943_v36 = vld [vmem:[%s5149_s2 + $0x40] sm:$0xff] }
0x235a   :  { %v2263_v26 = vpop.permute.xlu0 %2262 }
0x235b   :  { %v2265_v20 = vmul.f32 %v2263_v26, %v2243_v5  ;;  %v4950_v5 = vld [vmem:[%s5149_s2 + $0x30] sm:$0xff]  ;;  %v4957_v26 = vld [vmem:[%s5149_s2 + $0x20] sm:$0xff] }
0x235d   :  { %v2267_v1 = vrot.slane %v2265_v20, 4  ;;  %v4964_v20 = vld [vmem:[%s5149_s2 + $0x10] sm:$0xff] }
0x235f   :  { %3408 = vmatmul.msk.f32.vlgmr.msrb.gmra.mxu0 %vm191_vm3, %v2267_v1  ;;  %3409 = vmatmul.msk.f32.vlgmr.msrb.gmra.mxu1 %vm191_vm3, %v2267_v1  ;;  %v4971_v1 = vld [vmem:[%s5149_s2] sm:$0xff] }
0x2360   :  { %2715 = vmatpush.msrb.mxu0 %v4860_v19  ;;  %2735 = vmatpush.msrb.mxu1 %v4866_v21 }
0x2362   :  { %2716 = vmatpush.msrb.mxu0 %v4872_v62  ;;  %2736 = vmatpush.msrb.mxu1 %v4878_v63 }
0x2364   :  { %2717 = vmatpush.msrb.mxu0 %v4884_v47  ;;  %2737 = vmatpush.msrb.mxu1 %v4890_v44 }
0x2366   :  { %2718 = vmatpush.msrb.mxu0 %v4666_v45  ;;  %2738 = vmatpush.msrb.mxu1 %v4897_v60  ;;  %v4911_v45 = vld [vmem:[%s5149_s2 + $0x28] sm:$0xff] }
0x2368   :  { %2719 = vmatpush.msrb.mxu0 %v4673_v37  ;;  %2739 = vmatpush.msrb.mxu1 %v4904_v24  ;;  %v4918_v37 = vld [vmem:[%s5149_s2 + $0x18] sm:$0xff] }
0x236a   :  { %2720 = vmatpush.msrb.mxu0 %v4680_v51  ;;  %2740 = vmatpush.msrb.mxu1 %v4911_v45 }
0x236c   :  { %2721 = vmatpush.msrb.mxu0 %v4687_v9  ;;  %2741 = vmatpush.msrb.mxu1 %v4918_v37 }
0x236e   :  { %2722 = vmatpush.msrb.mxu0 %v4694_v54  ;;  %2742 = vmatpush.msrb.mxu1 %v4700_v2 }
0x23dc   :  { %v2307_v51 = vpop.f32.mrf.mxu1  ;;  %v2287_v9 = vpop.f32.mrf.mxu0 }
0x23dd   :  { %v2313_v10 = vrot.slane %v2307_v51, 2  ;;  %v2312_v14 = vrot.slane %v2287_v9, 2  ;;  %v4977_v51 = vld [vmem:[%s5149_s2 + $0x8] sm:$0xff] }
0x23df   :  { %v2317_v46 = vadd.f32 %v2313_v10, %v4786_v22  ;;  %v2316_v30 = vadd.f32 %v2312_v14, %v4792_v11  ;;  %v4982_v10 = vadd.f32 %v4233_v39, %v4104_v28 }
0x23e1   :  { %3680 = vtanh.f32 %v2317_v46  ;;  %v3410_v53 = vmul.f32 -1.442695, %v2316_v30  ;;  %v3411_v16 = vmul.f32 -1.442695, %v2317_v46  ;;  %v4988_v30 = vadd.f32 %v4247_v49, %v4112_v35 }
0x23e3   :  { %3682 = vpow2.f32 %v3410_v53 }
0x23e7   :  { %v3681_v52 = vpop.eup %3680 }
0x23e8   :  { %2362 = vrot.lane.b32.xlu1 %v3681_v52, %s3892_s14 }
0x23e9   :  { %v3683_v43 = vpop.eup %3682 }
0x23ea   :  { %v2324_v15 = vadd.f32 1.0, %v3683_v43 }
0x23ec   :  { %3684 = vrcp.f32 %v2324_v15  ;;  %v2337_v22 = vand.u32 2147483648, %v2324_v15  ;;  %vm2331_vm8 = vweird.f32 %v2324_v15  ;;  %v2335_v4 = vand.u32 2147483647, %v2324_v15 }
0x23ee   :  { %v2338_v12 = vor.u32 1.1754944e-38, %v2337_v22  ;;  %vm2336_vm10 = vcmp.eq.f32.partialorder %v2335_v4, 8.507059e+37 }
0x23f2   :  { %v3685_v54 = vpop.eup %3684 }
0x23f3   :  { %v2327_v25 = vmul.f32 %v3685_v54, %v2324_v15  ;;  %vm2332_vm7 = vweird.f32 %v3685_v54 }
0x23f4   :  { %vm2333_vm9 = vmor %vm2331_vm8, %vm2332_vm7 }
0x23f5   :  { %v2328_v2 = vsub.f32 1.0, %v2327_v25 }
0x23f7   :  { %v2329_v0 = vmul.f32 %v3685_v54, %v2328_v2 }
0x23f9   :  { %v2330_v32 = vadd.f32 %v3685_v54, %v2329_v0 }
0x23fb   :  { %v2334_v7 = vsel %vm2333_vm9, %v3685_v54, %v2330_v32 }
0x23fc   :  { %v2339_v11 = vsel %vm2336_vm10, %v2338_v12, %v2334_v7 }
0x23fd   :  { %v2360_v18 = vmul.f32 %v2358_v13, %v2339_v11 }
0x245a   :  { %v2363_v38 = vpop.permute.xlu1 %2362 }
0x245b   :  { %v2365_v58 = vmul.f32 %v2363_v38, %v2339_v11 }
0x245d   :  { %2367 = vrot.lane.b32.xlu2 %v2365_v58, %s3892_s14 }
0x24b7   :  { %v2368_v31 = vpop.permute.xlu2 %2367 }
0x24b8   :  { %v4928_v27 = vadd.f32 %v2368_v31, %v2360_v18 }
0x24ba   :  { %3686 = vtanh.f32 %v4928_v27  ;;  %v2463_v58 = vrot.slane %v4928_v27, 6 }
0x24bb   :  { %3688 = vpow2.f32 %v3411_v16 }
0x24c0   :  { %v3687_v56 = vpop.eup %3686 }
0x24c1   :  { %2373 = vrot.lane.b32.xlu0 %v3687_v56, %s3892_s14  ;;  %v3689_v48 = vpop.eup %3688 }
0x24c2   :  { %v2325_v6 = vadd.f32 1.0, %v3689_v48 }
0x24c4   :  { %3690 = vrcp.f32 %v2325_v6  ;;  %v2352_v59 = vand.u32 2147483648, %v2325_v6  ;;  %vm2346_vm12 = vweird.f32 %v2325_v6  ;;  %v2350_v3 = vand.u32 2147483647, %v2325_v6 }
0x24c6   :  { %v2353_v55 = vor.u32 1.1754944e-38, %v2352_v59  ;;  %vm2351_vm2 = vcmp.eq.f32.partialorder %v2350_v3, 8.507059e+37 }
0x24ca   :  { %v3691_v42 = vpop.eup %3690 }
0x24cb   :  { %v2342_v29 = vmul.f32 %v3691_v42, %v2325_v6  ;;  %vm2347_vm11 = vweird.f32 %v3691_v42 }
0x24cc   :  { %vm2348_vm13 = vmor %vm2346_vm12, %vm2347_vm11 }
0x24cd   :  { %v2343_v34 = vsub.f32 1.0, %v2342_v29 }
0x24cf   :  { %v2344_v61 = vmul.f32 %v3691_v42, %v2343_v34 }
0x24d1   :  { %v2345_v33 = vadd.f32 %v3691_v42, %v2344_v61 }
0x24d3   :  { %v2349_v23 = vsel %vm2348_vm13, %v3691_v42, %v2345_v33 }
0x24d4   :  { %v2354_v57 = vsel %vm2351_vm2, %v2353_v55, %v2349_v23 }
0x2533   :  { %v2374_v8 = vpop.permute.xlu0 %2373 }
0x2534   :  { %v2376_v17 = vmul.f32 %v2374_v8, %v2354_v57 }
0x2536   :  { %v2378_v41 = vrot.slane %v2376_v17, 6 }
0x2538   :  { %3412 = vmatmul.msk.f32.vlgmr.msrb.gmra.mxu2 %vm191_vm3, %v2378_v41  ;;  %3413 = vmatmul.msk.f32.vlgmr.msrb.gmra.mxu3 %vm191_vm3, %v2378_v41 }
0x2539   :  { %2826 = vmatpush.msrb.mxu2 %v4860_v19  ;;  %2846 = vmatpush.msrb.mxu3 %v4866_v21 }
0x253b   :  { %2827 = vmatpush.msrb.mxu2 %v4872_v62  ;;  %2847 = vmatpush.msrb.mxu3 %v4878_v63 }
0x253d   :  { %2828 = vmatpush.msrb.mxu2 %v4884_v47  ;;  %2848 = vmatpush.msrb.mxu3 %v4890_v44 }
0x253f   :  { %2829 = vmatpush.msrb.mxu2 %v4943_v36  ;;  %2849 = vmatpush.msrb.mxu3 %v4897_v60 }
0x2541   :  { %2830 = vmatpush.msrb.mxu2 %v4950_v5  ;;  %2850 = vmatpush.msrb.mxu3 %v4904_v24 }
0x2543   :  { %2831 = vmatpush.msrb.mxu2 %v4957_v26  ;;  %2851 = vmatpush.msrb.mxu3 %v4911_v45 }
0x2545   :  { %2832 = vmatpush.msrb.mxu2 %v4964_v20  ;;  %2852 = vmatpush.msrb.mxu3 %v4918_v37 }
0x2547   :  { %2833 = vmatpush.msrb.mxu2 %v4971_v1  ;;  %2853 = vmatpush.msrb.mxu3 %v4977_v51 }
0x25bb   :  { %v2418_v46 = vpop.f32.mrf.mxu3  ;;  %v2398_v14 = vpop.f32.mrf.mxu2 }
0x25bc   :  { %v2422_v52 = vadd.f32 %v2418_v46, %v4982_v10  ;;  %v2421_v53 = vadd.f32 %v2398_v14, %v4988_v30 }
0x25be   :  { %3692 = vtanh.f32 %v2422_v52  ;;  %v3414_v43 = vmul.f32 -1.442695, %v2421_v53  ;;  %v3415_v16 = vmul.f32 -1.442695, %v2422_v52 }
0x25c0   :  { %3694 = vpow2.f32 %v3414_v43 }
0x25c4   :  { %v3693_v9 = vpop.eup %3692 }
0x25c5   :  { %2467 = vrot.lane.b32.xlu1 %v3693_v9, %s3892_s14 }
0x25c6   :  { %v3695_v15 = vpop.eup %3694 }
0x25c7   :  { %v2429_v54 = vadd.f32 1.0, %v3695_v15 }
0x25c9   :  { %3696 = vrcp.f32 %v2429_v54  ;;  %v2442_v22 = vand.u32 2147483648, %v2429_v54  ;;  %vm2436_vm15 = vweird.f32 %v2429_v54  ;;  %v2440_v4 = vand.u32 2147483647, %v2429_v54 }
0x25cb   :  { %v2443_v49 = vor.u32 1.1754944e-38, %v2442_v22  ;;  %vm2441_vm1 = vcmp.eq.f32.partialorder %v2440_v4, 8.507059e+37 }
0x25cf   :  { %v3697_v39 = vpop.eup %3696 }
0x25d0   :  { %v2432_v25 = vmul.f32 %v3697_v39, %v2429_v54  ;;  %vm2437_vm14 = vweird.f32 %v3697_v39 }
0x25d1   :  { %vm2438_vm0 = vmor %vm2436_vm15, %vm2437_vm14 }
0x25d2   :  { %v2433_v2 = vsub.f32 1.0, %v2432_v25 }
0x25d4   :  { %v2434_v0 = vmul.f32 %v3697_v39, %v2433_v2 }
0x25d6   :  { %v2435_v32 = vadd.f32 %v3697_v39, %v2434_v0 }
0x25d8   :  { %v2439_v7 = vsel %vm2438_vm0, %v3697_v39, %v2435_v32 }
0x25d9   :  { %v2444_v38 = vsel %vm2441_vm1, %v2443_v49, %v2439_v7 }
0x25da   :  { %v2465_v13 = vmul.f32 %v2463_v58, %v2444_v38 }
0x2637   :  { %v2468_v12 = vpop.permute.xlu1 %2467 }
0x2638   :  { %v2470_v11 = vmul.f32 %v2468_v12, %v2444_v38 }
0x263a   :  { %2472 = vrot.lane.b32.xlu2 %v2470_v11, %s3892_s14 }
0x2694   :  { %v2473_v18 = vpop.permute.xlu2 %2472 }
0x2695   :  { %v4993_v31 = vadd.f32 %v2473_v18, %v2465_v13 }
0x2697   :  { %3698 = vtanh.f32 %v4993_v31  ;;  %v2573_v58 = vrot.slane %v4993_v31, 6 }
0x2698   :  { %3700 = vpow2.f32 %v3415_v16 }
0x269d   :  { %v3699_v56 = vpop.eup %3698 }
0x269e   :  { %2478 = vrot.lane.b32.xlu0 %v3699_v56, %s3892_s14  ;;  %v3701_v48 = vpop.eup %3700 }
0x269f   :  { %v2430_v6 = vadd.f32 1.0, %v3701_v48 }
0x26a1   :  { %3702 = vrcp.f32 %v2430_v6  ;;  %v2457_v27 = vand.u32 2147483648, %v2430_v6  ;;  %vm2451_vm5 = vweird.f32 %v2430_v6  ;;  %v2455_v59 = vand.u32 2147483647, %v2430_v6 }
0x26a3   :  { %v2458_v23 = vor.u32 1.1754944e-38, %v2457_v27  ;;  %vm2456_vm7 = vcmp.eq.f32.partialorder %v2455_v59, 8.507059e+37 }
0x26a7   :  { %v3703_v42 = vpop.eup %3702 }
0x26a8   :  { %v2447_v29 = vmul.f32 %v3703_v42, %v2430_v6  ;;  %vm2452_vm4 = vweird.f32 %v3703_v42 }
0x26a9   :  { %vm2453_vm6 = vmor %vm2451_vm5, %vm2452_vm4 }
0x26aa   :  { %v2448_v34 = vsub.f32 1.0, %v2447_v29 }
0x26ac   :  { %v2449_v61 = vmul.f32 %v3703_v42, %v2448_v34 }
0x26ae   :  { %v2450_v33 = vadd.f32 %v3703_v42, %v2449_v61 }
0x26b0   :  { %v2454_v3 = vsel %vm2453_vm6, %v3703_v42, %v2450_v33 }
0x26b1   :  { %v2459_v55 = vsel %vm2456_vm7, %v2458_v23, %v2454_v3 }
0x2710   :  { %v2479_v57 = vpop.permute.xlu0 %2478 }
0x2711   :  { %v2481_v8 = vmul.f32 %v2479_v57, %v2459_v55 }
0x2713   :  { %3416 = vmatmul.msk.f32.vlgmr.msra.gmra.mxu0 %vm191_vm3, %v2481_v8  ;;  %3417 = vmatmul.msk.f32.vlgmr.msra.gmra.mxu1 %vm191_vm3, %v2481_v8 }
0x2714   :  { %2930 = vmatpush.msra.mxu0 %v4860_v19  ;;  %2950 = vmatpush.msra.mxu1 %v4866_v21 }
0x2716   :  { %2931 = vmatpush.msra.mxu0 %v4872_v62  ;;  %2951 = vmatpush.msra.mxu1 %v4878_v63 }
0x2718   :  { %2932 = vmatpush.msra.mxu0 %v4884_v47  ;;  %2952 = vmatpush.msra.mxu1 %v4890_v44 }
0x271a   :  { %2933 = vmatpush.msra.mxu0 %v4943_v36  ;;  %2953 = vmatpush.msra.mxu1 %v4897_v60 }
0x271c   :  { %2934 = vmatpush.msra.mxu0 %v4950_v5  ;;  %2954 = vmatpush.msra.mxu1 %v4904_v24 }
0x271e   :  { %2935 = vmatpush.msra.mxu0 %v4957_v26  ;;  %2955 = vmatpush.msra.mxu1 %v4911_v45 }
0x2720   :  { %2936 = vmatpush.msra.mxu0 %v4964_v20  ;;  %2956 = vmatpush.msra.mxu1 %v4918_v37 }
0x2722   :  { %2937 = vmatpush.msra.mxu0 %v4971_v1  ;;  %2957 = vmatpush.msra.mxu1 %v4977_v51 }
0x2790   :  { %v2522_v17 = vpop.f32.mrf.mxu1  ;;  %v2502_v9 = vpop.f32.mrf.mxu0 }
0x2791   :  { %v2528_v41 = vrot.slane %v2522_v17, 6  ;;  %v2527_v14 = vrot.slane %v2502_v9, 6 }
0x2793   :  { %v2532_v46 = vadd.f32 %v2528_v41, %v4982_v10  ;;  %v2531_v53 = vadd.f32 %v2527_v14, %v4988_v30 }
0x2795   :  { %3704 = vtanh.f32 %v2532_v46  ;;  %v3418_v43 = vmul.f32 -1.442695, %v2531_v53  ;;  %v3419_v48 = vmul.f32 -1.442695, %v2532_v46 }
0x2797   :  { %3706 = vpow2.f32 %v3418_v43 }
0x279b   :  { %v3705_v52 = vpop.eup %3704 }
0x279c   :  { %2577 = vrot.lane.b32.xlu1 %v3705_v52, %s3892_s14 }
0x279d   :  { %v3707_v15 = vpop.eup %3706 }
0x279e   :  { %v2539_v54 = vadd.f32 1.0, %v3707_v15 }
0x27a0   :  { %3708 = vrcp.f32 %v2539_v54  ;;  %v2552_v22 = vand.u32 2147483648, %v2539_v54  ;;  %vm2546_vm9 = vweird.f32 %v2539_v54  ;;  %v2550_v4 = vand.u32 2147483647, %v2539_v54 }
0x27a2   :  { %v2553_v49 = vor.u32 1.1754944e-38, %v2552_v22  ;;  %vm2551_vm11 = vcmp.eq.f32.partialorder %v2550_v4, 8.507059e+37 }
0x27a6   :  { %v3709_v39 = vpop.eup %3708 }
0x27a7   :  { %v2542_v25 = vmul.f32 %v3709_v39, %v2539_v54  ;;  %vm2547_vm8 = vweird.f32 %v3709_v39 }
0x27a8   :  { %vm2548_vm10 = vmor %vm2546_vm9, %vm2547_vm8 }
0x27a9   :  { %v2543_v2 = vsub.f32 1.0, %v2542_v25 }
0x27ab   :  { %v2544_v0 = vmul.f32 %v3709_v39, %v2543_v2 }
0x27ad   :  { %v2545_v32 = vadd.f32 %v3709_v39, %v2544_v0 }
0x27af   :  { %v2549_v7 = vsel %vm2548_vm10, %v3709_v39, %v2545_v32 }
0x27b0   :  { %v2554_v38 = vsel %vm2551_vm11, %v2553_v49, %v2549_v7 }
0x27b1   :  { %v2575_v13 = vmul.f32 %v2573_v58, %v2554_v38 }
0x280e   :  { %v2578_v12 = vpop.permute.xlu1 %2577 }
0x280f   :  { %v2580_v11 = vmul.f32 %v2578_v12, %v2554_v38 }
0x2811   :  { %2582 = vrot.lane.b32.xlu2 %v2580_v11, %s3892_s14 }
0x286b   :  { %v2583_v18 = vpop.permute.xlu2 %2582 }
0x286c   :  { %v5020_v56 = vadd.f32 %v2583_v18, %v2575_v13 }
0x286e   :  { %3710 = vtanh.f32 %v5020_v56  ;;  %v2684_v13 = vrot.slane %v5020_v56, 6 }
0x286f   :  { %3712 = vpow2.f32 %v3419_v48 }
0x2874   :  { %v3711_v16 = vpop.eup %3710 }
0x2875   :  { %2588 = vrot.lane.b32.xlu0 %v3711_v16, %s3892_s14  ;;  %v3713_v6 = vpop.eup %3712 }
0x2876   :  { %v2540_v42 = vadd.f32 1.0, %v3713_v6 }
0x2878   :  { %3714 = vrcp.f32 %v2540_v42  ;;  %v2567_v31 = vand.u32 2147483648, %v2540_v42  ;;  %vm2561_vm13 = vweird.f32 %v2540_v42  ;;  %v2565_v59 = vand.u32 2147483647, %v2540_v42 }
0x287a   :  { %v2568_v23 = vor.u32 1.1754944e-38, %v2567_v31  ;;  %vm2566_vm14 = vcmp.eq.f32.partialorder %v2565_v59, 8.507059e+37 }
0x287e   :  { %v3715_v29 = vpop.eup %3714 }
0x287f   :  { %v2557_v34 = vmul.f32 %v3715_v29, %v2540_v42  ;;  %vm2562_vm12 = vweird.f32 %v3715_v29 }
0x2880   :  { %vm2563_vm2 = vmor %vm2561_vm13, %vm2562_vm12 }
0x2881   :  { %v2558_v61 = vsub.f32 1.0, %v2557_v34 }
0x2883   :  { %v2559_v33 = vmul.f32 %v3715_v29, %v2558_v61 }
0x2885   :  { %v2560_v27 = vadd.f32 %v3715_v29, %v2559_v33 }
0x2887   :  { %v2564_v3 = vsel %vm2563_vm2, %v3715_v29, %v2560_v27 }
0x2888   :  { %v2569_v55 = vsel %vm2566_vm14, %v2568_v23, %v2564_v3 }
0x28e7   :  { %v2589_v57 = vpop.permute.xlu0 %2588 }
0x28e8   :  { %v2591_v8 = vmul.f32 %v2589_v57, %v2569_v55 }
0x28ea   :  { %v2593_v17 = vrot.slane %v2591_v8, 2 }
0x28ec   :  { %3420 = vmatmul.msk.f32.vlgmr.msra.gmra.mxu2 %vm191_vm3, %v2593_v17  ;;  %3421 = vmatmul.msk.f32.vlgmr.msra.gmra.mxu3 %vm191_vm3, %v2593_v17 }
0x28ed   :  { %3041 = vmatpush.msra.mxu2 %v4860_v19  ;;  %3061 = vmatpush.msra.mxu3 %v4866_v21 }
0x28ef   :  { %3042 = vmatpush.msra.mxu2 %v4872_v62  ;;  %3062 = vmatpush.msra.mxu3 %v4878_v63 }
0x28f1   :  { %3043 = vmatpush.msra.mxu2 %v4884_v47  ;;  %3063 = vmatpush.msra.mxu3 %v4890_v44 }
0x28f3   :  { %3044 = vmatpush.msra.mxu2 %v4943_v36  ;;  %3064 = vmatpush.msra.mxu3 %v4897_v60 }
0x28f5   :  { %3045 = vmatpush.msra.mxu2 %v4950_v5  ;;  %3065 = vmatpush.msra.mxu3 %v4904_v24 }
0x28f7   :  { %3046 = vmatpush.msra.mxu2 %v4957_v26  ;;  %3066 = vmatpush.msra.mxu3 %v4911_v45 }
0x28f9   :  { %3047 = vmatpush.msra.mxu2 %v4964_v20  ;;  %3067 = vmatpush.msra.mxu3 %v4918_v37 }
0x28fb   :  { %3048 = vmatpush.msra.mxu2 %v4971_v1  ;;  %3068 = vmatpush.msra.mxu3 %v4977_v51 }
0x296f   :  { %v2633_v41 = vpop.f32.mrf.mxu3  ;;  %v2613_v14 = vpop.f32.mrf.mxu2 }
0x2970   :  { %v2639_v46 = vrot.slane %v2633_v41, 4  ;;  %v2638_v53 = vrot.slane %v2613_v14, 4 }
0x2972   :  { %v2643_v52 = vadd.f32 %v2639_v46, %v4982_v10  ;;  %v2642_v43 = vadd.f32 %v2638_v53, %v4988_v30 }
0x2974   :  { %3716 = vtanh.f32 %v2643_v52  ;;  %v3422_v15 = vmul.f32 -1.442695, %v2642_v43  ;;  %v3423_v42 = vmul.f32 -1.442695, %v2643_v52 }
0x2976   :  { %3718 = vpow2.f32 %v3422_v15 }
0x297a   :  { %v3717_v9 = vpop.eup %3716 }
0x297b   :  { %2688 = vrot.lane.b32.xlu1 %v3717_v9, %s3892_s14 }
0x297c   :  { %v3719_v54 = vpop.eup %3718 }
0x297d   :  { %v2650_v39 = vadd.f32 1.0, %v3719_v54 }
0x297f   :  { %3720 = vrcp.f32 %v2650_v39  ;;  %v2663_v4 = vand.u32 2147483648, %v2650_v39  ;;  %vm2657_vm0 = vweird.f32 %v2650_v39  ;;  %v2661_v7 = vand.u32 2147483647, %v2650_v39 }
0x2981   :  { %v2664_v12 = vor.u32 1.1754944e-38, %v2663_v4  ;;  %vm2662_vm4 = vcmp.eq.f32.partialorder %v2661_v7, 8.507059e+37 }
0x2985   :  { %v3721_v25 = vpop.eup %3720 }
0x2986   :  { %v2653_v2 = vmul.f32 %v3721_v25, %v2650_v39  ;;  %vm2658_vm15 = vweird.f32 %v3721_v25 }
0x2987   :  { %vm2659_vm1 = vmor %vm2657_vm0, %vm2658_vm15 }
0x2988   :  { %v2654_v0 = vsub.f32 1.0, %v2653_v2 }
0x298a   :  { %v2655_v32 = vmul.f32 %v3721_v25, %v2654_v0 }
0x298c   :  { %v2656_v22 = vadd.f32 %v3721_v25, %v2655_v32 }
0x298e   :  { %v2660_v49 = vsel %vm2659_vm1, %v3721_v25, %v2656_v22 }
0x298f   :  { %v2665_v11 = vsel %vm2662_vm4, %v2664_v12, %v2660_v49 }
0x2990   :  { %v2686_v18 = vmul.f32 %v2684_v13, %v2665_v11 }
0x29ed   :  { %v2689_v38 = vpop.permute.xlu1 %2688 }
0x29ee   :  { %v2691_v58 = vmul.f32 %v2689_v38, %v2665_v11 }
0x29f0   :  { %2693 = vrot.lane.b32.xlu2 %v2691_v58, %s3892_s14 }
0x2a4a   :  { %v2694_v16 = vpop.permute.xlu2 %2693 }
0x2a4b   :  { %v5047_v48 = vadd.f32 %v2694_v16, %v2686_v18 }
0x2a4d   :  { %3722 = vtanh.f32 %v5047_v48  ;;  %v2795_v53 = vrot.slane %v5047_v48, 6 }
0x2a4e   :  { %3724 = vpow2.f32 %v3423_v42 }
0x2a53   :  { %v3723_v6 = vpop.eup %3722 }
0x2a54   :  { %2699 = vrot.lane.b32.xlu0 %v3723_v6, %s3892_s14  ;;  %v3725_v29 = vpop.eup %3724  ;;  %v5079_v6 = vadd.f32 %v4235_v40, %v4104_v28 }
0x2a55   :  { %v2651_v34 = vadd.f32 1.0, %v3725_v29 }
0x2a57   :  { %3726 = vrcp.f32 %v2651_v34  ;;  %v2678_v56 = vand.u32 2147483648, %v2651_v34  ;;  %vm2672_vm6 = vweird.f32 %v2651_v34  ;;  %v2676_v3 = vand.u32 2147483647, %v2651_v34 }
0x2a59   :  { %v2679_v55 = vor.u32 1.1754944e-38, %v2678_v56  ;;  %vm2677_vm8 = vcmp.eq.f32.partialorder %v2676_v3, 8.507059e+37 }
0x2a5d   :  { %v3727_v61 = vpop.eup %3726 }
0x2a5e   :  { %v2668_v33 = vmul.f32 %v3727_v61, %v2651_v34  ;;  %vm2673_vm5 = vweird.f32 %v3727_v61 }
0x2a5f   :  { %vm2674_vm7 = vmor %vm2672_vm6, %vm2673_vm5 }
0x2a60   :  { %v2669_v27 = vsub.f32 1.0, %v2668_v33  ;;  %v5085_v33 = vadd.f32 %v4249_v50, %v4112_v35 }
0x2a62   :  { %v2670_v31 = vmul.f32 %v3727_v61, %v2669_v27 }
0x2a64   :  { %v2671_v59 = vadd.f32 %v3727_v61, %v2670_v31 }
0x2a66   :  { %v2675_v23 = vsel %vm2674_vm7, %v3727_v61, %v2671_v59 }
0x2a67   :  { %v2680_v57 = vsel %vm2677_vm8, %v2679_v55, %v2675_v23 }
0x2ac6   :  { %v2700_v8 = vpop.permute.xlu0 %2699 }
0x2ac7   :  { %v2702_v17 = vmul.f32 %v2700_v8, %v2680_v57 }
0x2ac9   :  { %v2704_v41 = vrot.slane %v2702_v17, 4 }
0x2acb   :  { %3424 = vmatmul.msk.f32.vlgmr.msrb.gmra.mxu0 %vm191_vm3, %v2704_v41  ;;  %3425 = vmatmul.msk.f32.vlgmr.msrb.gmra.mxu1 %vm191_vm3, %v2704_v41 }
0x2acc   :  { %3152 = vmatpush.msrb.mxu0 %v4860_v19  ;;  %3172 = vmatpush.msrb.mxu1 %v4866_v21 }
0x2ace   :  { %3153 = vmatpush.msrb.mxu0 %v4872_v62  ;;  %3173 = vmatpush.msrb.mxu1 %v4878_v63 }
0x2ad0   :  { %3154 = vmatpush.msrb.mxu0 %v4884_v47  ;;  %3174 = vmatpush.msrb.mxu1 %v4890_v44 }
0x2ad2   :  { %3155 = vmatpush.msrb.mxu0 %v4943_v36  ;;  %3175 = vmatpush.msrb.mxu1 %v4897_v60 }
0x2ad4   :  { %3156 = vmatpush.msrb.mxu0 %v4950_v5  ;;  %3176 = vmatpush.msrb.mxu1 %v4904_v24 }
0x2ad6   :  { %3157 = vmatpush.msrb.mxu0 %v4957_v26  ;;  %3177 = vmatpush.msrb.mxu1 %v4911_v45 }
0x2ad8   :  { %3158 = vmatpush.msrb.mxu0 %v4964_v20  ;;  %3178 = vmatpush.msrb.mxu1 %v4918_v37 }
0x2ada   :  { %3159 = vmatpush.msrb.mxu0 %v4971_v1  ;;  %3179 = vmatpush.msrb.mxu1 %v4977_v51 }
0x2b48   :  { %v2744_v19 = vpop.f32.mrf.mxu1  ;;  %v2724_v47 = vpop.f32.mrf.mxu0 }
0x2b49   :  { %v2750_v21 = vrot.slane %v2744_v19, 2  ;;  %v2749_v44 = vrot.slane %v2724_v47, 2 }
0x2b4b   :  { %v2754_v62 = vadd.f32 %v2750_v21, %v4982_v10  ;;  %v2753_v60 = vadd.f32 %v2749_v44, %v4988_v30 }
0x2b4d   :  { %3728 = vtanh.f32 %v2754_v62  ;;  %v3426_v24 = vmul.f32 -1.442695, %v2753_v60  ;;  %v3427_v25 = vmul.f32 -1.442695, %v2754_v62 }
0x2b4f   :  { %3730 = vpow2.f32 %v3426_v24 }
0x2b53   :  { %v3729_v63 = vpop.eup %3728 }
0x2b54   :  { %2799 = vrot.lane.b32.xlu1 %v3729_v63, %s3892_s14 }
0x2b55   :  { %v3731_v45 = vpop.eup %3730 }
0x2b56   :  { %v2761_v37 = vadd.f32 1.0, %v3731_v45 }
0x2b58   :  { %3732 = vrcp.f32 %v2761_v37  ;;  %v2774_v51 = vand.u32 2147483648, %v2761_v37  ;;  %vm2768_vm10 = vweird.f32 %v2761_v37  ;;  %v2772_v10 = vand.u32 2147483647, %v2761_v37 }
0x2b5a   :  { %v2775_v52 = vor.u32 1.1754944e-38, %v2774_v51  ;;  %vm2773_vm12 = vcmp.eq.f32.partialorder %v2772_v10, 8.507059e+37 }
0x2b5e   :  { %v3733_v36 = vpop.eup %3732 }
0x2b5f   :  { %v2764_v5 = vmul.f32 %v3733_v36, %v2761_v37  ;;  %vm2769_vm9 = vweird.f32 %v3733_v36 }
0x2b60   :  { %vm2770_vm11 = vmor %vm2768_vm10, %vm2769_vm9 }
0x2b61   :  { %v2765_v26 = vsub.f32 1.0, %v2764_v5 }
0x2b63   :  { %v2766_v20 = vmul.f32 %v3733_v36, %v2765_v26 }
0x2b65   :  { %v2767_v1 = vadd.f32 %v3733_v36, %v2766_v20 }
0x2b67   :  { %v2771_v46 = vsel %vm2770_vm11, %v3733_v36, %v2767_v1 }
0x2b68   :  { %v2776_v30 = vsel %vm2773_vm12, %v2775_v52, %v2771_v46 }
0x2b69   :  { %v2797_v43 = vmul.f32 %v2795_v53, %v2776_v30 }
0x2bc6   :  { %v2800_v9 = vpop.permute.xlu1 %2799 }
0x2bc7   :  { %v2802_v14 = vmul.f32 %v2800_v9, %v2776_v30 }
0x2bc9   :  { %2804 = vrot.lane.b32.xlu2 %v2802_v14, %s3892_s14 }
0x2c23   :  { %v2805_v15 = vpop.permute.xlu2 %2804 }
0x2c24   :  { %v2807_v54 = vadd.f32 %v2805_v15, %v2797_v43 }
0x2c26   :  { %3734 = vtanh.f32 %v2807_v54  ;;  %v2900_v21 = vrot.slane %v2807_v54, 6 }
0x2c27   :  { %3736 = vpow2.f32 %v3427_v25 }
0x2c2c   :  { %v3735_v39 = vpop.eup %3734 }
0x2c2d   :  { %2810 = vrot.lane.b32.xlu0 %v3735_v39, %s3892_s14  ;;  %v3737_v2 = vpop.eup %3736 }
0x2c2e   :  { %v2762_v0 = vadd.f32 1.0, %v3737_v2 }
0x2c30   :  { %3738 = vrcp.f32 %v2762_v0  ;;  %v2789_v12 = vand.u32 2147483648, %v2762_v0  ;;  %vm2783_vm2 = vweird.f32 %v2762_v0  ;;  %v2787_v38 = vand.u32 2147483647, %v2762_v0 }
0x2c32   :  { %v2790_v58 = vor.u32 1.1754944e-38, %v2789_v12  ;;  %vm2788_vm15 = vcmp.eq.f32.partialorder %v2787_v38, 8.507059e+37 }
0x2c36   :  { %v3739_v32 = vpop.eup %3738 }
0x2c37   :  { %v2779_v22 = vmul.f32 %v3739_v32, %v2762_v0  ;;  %vm2784_vm13 = vweird.f32 %v3739_v32 }
0x2c38   :  { %vm2785_vm14 = vmor %vm2783_vm2, %vm2784_vm13 }
0x2c39   :  { %v2780_v4 = vsub.f32 1.0, %v2779_v22 }
0x2c3b   :  { %v2781_v7 = vmul.f32 %v3739_v32, %v2780_v4 }
0x2c3d   :  { %v2782_v49 = vadd.f32 %v3739_v32, %v2781_v7 }
0x2c3f   :  { %v2786_v11 = vsel %vm2785_vm14, %v3739_v32, %v2782_v49 }
0x2c40   :  { %v2791_v13 = vsel %vm2788_vm15, %v2790_v58, %v2786_v11 }
0x2c9f   :  { %v2811_v18 = vpop.permute.xlu0 %2810 }
0x2ca0   :  { %v2813_v16 = vmul.f32 %v2811_v18, %v2791_v13 }
0x2ca2   :  { %v2815_v48 = vrot.slane %v2813_v16, 6 }
0x2ca4   :  { %3428 = vmatmul.msk.f32.vlgmr.msrb.gmra.mxu2 %vm191_vm3, %v2815_v48  ;;  %3429 = vmatmul.msk.f32.vlgmr.msrb.gmra.mxu3 %vm191_vm3, %v2815_v48 }
0x2d27   :  { %v2855_v42 = vpop.f32.mrf.mxu3  ;;  %v2835_v61 = vpop.f32.mrf.mxu2 }
0x2d28   :  { %v2859_v29 = vadd.f32 %v2855_v42, %v5079_v6  ;;  %v2858_v27 = vadd.f32 %v2835_v61, %v5085_v33 }
0x2d2a   :  { %3740 = vtanh.f32 %v2859_v29  ;;  %v3430_v31 = vmul.f32 -1.442695, %v2858_v27  ;;  %v3431_v60 = vmul.f32 -1.442695, %v2859_v29 }
0x2d2c   :  { %3742 = vpow2.f32 %v3430_v31 }
0x2d30   :  { %v3741_v34 = vpop.eup %3740 }
0x2d31   :  { %2904 = vrot.lane.b32.xlu1 %v3741_v34, %s3892_s14 }
0x2d32   :  { %v3743_v59 = vpop.eup %3742 }
0x2d33   :  { %v2866_v56 = vadd.f32 1.0, %v3743_v59 }
0x2d35   :  { %3744 = vrcp.f32 %v2866_v56  ;;  %v2879_v57 = vand.u32 2147483648, %v2866_v56  ;;  %vm2873_vm1 = vweird.f32 %v2866_v56  ;;  %v2877_v8 = vand.u32 2147483647, %v2866_v56 }
0x2d37   :  { %v2880_v35 = vor.u32 1.1754944e-38, %v2879_v57  ;;  %vm2878_vm5 = vcmp.eq.f32.partialorder %v2877_v8, 8.507059e+37 }
0x2d3b   :  { %v3745_v28 = vpop.eup %3744 }
0x2d3c   :  { %v2869_v40 = vmul.f32 %v3745_v28, %v2866_v56  ;;  %vm2874_vm0 = vweird.f32 %v3745_v28 }
0x2d3d   :  { %vm2875_vm4 = vmor %vm2873_vm1, %vm2874_vm0 }
0x2d3e   :  { %v2870_v3 = vsub.f32 1.0, %v2869_v40 }
0x2d40   :  { %v2871_v23 = vmul.f32 %v3745_v28, %v2870_v3 }
0x2d42   :  { %v2872_v55 = vadd.f32 %v3745_v28, %v2871_v23 }
0x2d44   :  { %v2876_v17 = vsel %vm2875_vm4, %v3745_v28, %v2872_v55 }
0x2d45   :  { %v2881_v41 = vsel %vm2878_vm5, %v2880_v35, %v2876_v17 }
0x2d46   :  { %v2902_v62 = vmul.f32 %v2900_v21, %v2881_v41 }
0x2da3   :  { %v2905_v50 = vpop.permute.xlu1 %2904 }
0x2da4   :  { %v2907_v19 = vmul.f32 %v2905_v50, %v2881_v41 }
0x2da6   :  { %2909 = vrot.lane.b32.xlu2 %v2907_v19, %s3892_s14 }
0x2e00   :  { %v2910_v63 = vpop.permute.xlu2 %2909 }
0x2e01   :  { %v2912_v47 = vadd.f32 %v2910_v63, %v2902_v62 }
0x2e03   :  { %3746 = vtanh.f32 %v2912_v47  ;;  %v3010_v42 = vrot.slane %v2912_v47, 6 }
0x2e04   :  { %3748 = vpow2.f32 %v3431_v60 }
0x2e09   :  { %v3747_v44 = vpop.eup %3746 }
0x2e0a   :  { %2915 = vrot.lane.b32.xlu0 %v3747_v44, %s3892_s14  ;;  %v3749_v24 = vpop.eup %3748 }
0x2e0b   :  { %v2867_v45 = vadd.f32 1.0, %v3749_v24 }
0x2e0d   :  { %3750 = vrcp.f32 %v2867_v45  ;;  %v2894_v1 = vand.u32 2147483648, %v2867_v45  ;;  %vm2888_vm7 = vweird.f32 %v2867_v45  ;;  %v2892_v51 = vand.u32 2147483647, %v2867_v45 }
0x2e0f   :  { %v2895_v46 = vor.u32 1.1754944e-38, %v2894_v1  ;;  %vm2893_vm9 = vcmp.eq.f32.partialorder %v2892_v51, 8.507059e+37 }
0x2e13   :  { %v3751_v37 = vpop.eup %3750 }
0x2e14   :  { %v2884_v36 = vmul.f32 %v3751_v37, %v2867_v45  ;;  %vm2889_vm6 = vweird.f32 %v3751_v37 }
0x2e15   :  { %vm2890_vm8 = vmor %vm2888_vm7, %vm2889_vm6 }
0x2e16   :  { %v2885_v5 = vsub.f32 1.0, %v2884_v36 }
0x2e18   :  { %v2886_v26 = vmul.f32 %v3751_v37, %v2885_v5 }
0x2e1a   :  { %v2887_v20 = vadd.f32 %v3751_v37, %v2886_v26 }
0x2e1c   :  { %v2891_v10 = vsel %vm2890_vm8, %v3751_v37, %v2887_v20 }
0x2e1d   :  { %v2896_v52 = vsel %vm2893_vm9, %v2895_v46, %v2891_v10 }
0x2e7c   :  { %v2916_v9 = vpop.permute.xlu0 %2915 }
0x2e7d   :  { %v2918_v30 = vmul.f32 %v2916_v9, %v2896_v52 }
0x2e7f   :  { %3432 = vmatmul.msk.f32.vlgmr.msra.gmra.mxu0 %vm191_vm3, %v2918_v30  ;;  %3433 = vmatmul.msk.f32.vlgmr.msra.gmra.mxu1 %vm191_vm3, %v2918_v30 }
0x2efc   :  { %v2959_v14 = vpop.f32.mrf.mxu1  ;;  %v2939_v54 = vpop.f32.mrf.mxu0 }
0x2efd   :  { %v2965_v53 = vrot.slane %v2959_v14, 6  ;;  %v2964_v39 = vrot.slane %v2939_v54, 6 }
0x2eff   :  { %v2969_v43 = vadd.f32 %v2965_v53, %v5079_v6  ;;  %v2968_v25 = vadd.f32 %v2964_v39, %v5085_v33 }
0x2f01   :  { %3752 = vtanh.f32 %v2969_v43  ;;  %v3434_v2 = vmul.f32 -1.442695, %v2968_v25  ;;  %v3435_v31 = vmul.f32 -1.442695, %v2969_v43 }
0x2f03   :  { %3754 = vpow2.f32 %v3434_v2 }
0x2f07   :  { %v3753_v15 = vpop.eup %3752 }
0x2f08   :  { %3014 = vrot.lane.b32.xlu1 %v3753_v15, %s3892_s14 }
0x2f09   :  { %v3755_v0 = vpop.eup %3754 }
0x2f0a   :  { %v2976_v32 = vadd.f32 1.0, %v3755_v0 }
0x2f0c   :  { %3756 = vrcp.f32 %v2976_v32  ;;  %v2989_v38 = vand.u32 2147483648, %v2976_v32  ;;  %vm2983_vm11 = vweird.f32 %v2976_v32  ;;  %v2987_v11 = vand.u32 2147483647, %v2976_v32 }
0x2f0e   :  { %v2990_v13 = vor.u32 1.1754944e-38, %v2989_v38  ;;  %vm2988_vm13 = vcmp.eq.f32.partialorder %v2987_v11, 8.507059e+37 }
0x2f12   :  { %v3757_v22 = vpop.eup %3756 }
0x2f13   :  { %v2979_v4 = vmul.f32 %v3757_v22, %v2976_v32  ;;  %vm2984_vm10 = vweird.f32 %v3757_v22 }
0x2f14   :  { %vm2985_vm12 = vmor %vm2983_vm11, %vm2984_vm10 }
0x2f15   :  { %v2980_v7 = vsub.f32 1.0, %v2979_v4 }
0x2f17   :  { %v2981_v49 = vmul.f32 %v3757_v22, %v2980_v7 }
0x2f19   :  { %v2982_v12 = vadd.f32 %v3757_v22, %v2981_v49 }
0x2f1b   :  { %v2986_v58 = vsel %vm2985_vm12, %v3757_v22, %v2982_v12 }
0x2f1c   :  { %v2991_v16 = vsel %vm2988_vm13, %v2990_v13, %v2986_v58 }
0x2f1d   :  { %v3012_v29 = vmul.f32 %v3010_v42, %v2991_v16 }
0x2f7a   :  { %v3015_v18 = vpop.permute.xlu1 %3014 }
0x2f7b   :  { %v3017_v48 = vmul.f32 %v3015_v18, %v2991_v16 }
0x2f7d   :  { %3019 = vrot.lane.b32.xlu2 %v3017_v48, %s3892_s14 }
0x2fd7   :  { %v3020_v34 = vpop.permute.xlu2 %3019 }
0x2fd8   :  { %v3022_v61 = vadd.f32 %v3020_v34, %v3012_v29 }
0x2fda   :  { %3758 = vtanh.f32 %v3022_v61  ;;  %v3121_v15 = vrot.slane %v3022_v61, 6 }
0x2fdb   :  { %3760 = vpow2.f32 %v3435_v31 }
0x2fe0   :  { %v3759_v27 = vpop.eup %3758 }
0x2fe1   :  { %3025 = vrot.lane.b32.xlu0 %v3759_v27, %s3892_s14  ;;  %v3761_v59 = vpop.eup %3760 }
0x2fe2   :  { %v2977_v56 = vadd.f32 1.0, %v3761_v59 }
0x2fe4   :  { %3762 = vrcp.f32 %v2977_v56  ;;  %v3004_v57 = vand.u32 2147483648, %v2977_v56  ;;  %vm2998_vm14 = vweird.f32 %v2977_v56  ;;  %v3002_v8 = vand.u32 2147483647, %v2977_v56 }
0x2fe6   :  { %v3005_v35 = vor.u32 1.1754944e-38, %v3004_v57  ;;  %vm3003_vm0 = vcmp.eq.f32.partialorder %v3002_v8, 8.507059e+37 }
0x2fea   :  { %v3763_v28 = vpop.eup %3762 }
0x2feb   :  { %v2994_v40 = vmul.f32 %v3763_v28, %v2977_v56  ;;  %vm2999_vm2 = vweird.f32 %v3763_v28 }
0x2fec   :  { %vm3000_vm15 = vmor %vm2998_vm14, %vm2999_vm2  ;;  %vm3251_vm14 = vcmask 523270  }
0x2fed   :  { %v2995_v3 = vsub.f32 1.0, %v2994_v40 }
0x2fef   :  { %v2996_v23 = vmul.f32 %v3763_v28, %v2995_v3 }
0x2ff1   :  { %v2997_v55 = vadd.f32 %v3763_v28, %v2996_v23 }
0x2ff3   :  { %v3001_v17 = vsel %vm3000_vm15, %v3763_v28, %v2997_v55 }
0x2ff4   :  { %v3006_v50 = vsel %vm3003_vm0, %v3005_v35, %v3001_v17 }
0x3053   :  { %v3026_v41 = vpop.permute.xlu0 %3025 }
0x3054   :  { %v3028_v19 = vmul.f32 %v3026_v41, %v3006_v50 }
0x3056   :  { %v3030_v21 = vrot.slane %v3028_v19, 2 }
0x3058   :  { %3436 = vmatmul.msk.f32.vlgmr.msra.gmra.mxu2 %vm191_vm3, %v3030_v21  ;;  %3437 = vmatmul.msk.f32.vlgmr.msra.gmra.mxu3 %vm191_vm3, %v3030_v21 }
0x30db   :  { %v3070_v62 = vpop.f32.mrf.mxu3  ;;  %v3050_v60 = vpop.f32.mrf.mxu2 }
0x30dc   :  { %v3076_v63 = vrot.slane %v3070_v62, 4  ;;  %v3075_v24 = vrot.slane %v3050_v60, 4 }
0x30de   :  { %v3080_v47 = vadd.f32 %v3076_v63, %v5079_v6  ;;  %v3079_v45 = vadd.f32 %v3075_v24, %v5085_v33  ;;  %v3268_v63 = vld [vmem:[%s5151_s4 + $0x38] sm:$0xff] }
0x30df   :  { %3285 = vmatpush.msrb.mxu2 %v3268_v63 }
0x30e0   :  { %3764 = vtanh.f32 %v3080_v47  ;;  %v3438_v37 = vmul.f32 -1.442695, %v3079_v45  ;;  %v3439_v0 = vmul.f32 -1.442695, %v3080_v47  ;;  %v3267_v47 = vld [vmem:[%s5151_s4 + $0x30] sm:$0xff] }
0x30e1   :  { %3286 = vmatpush.msrb.mxu2 %v3267_v47 }
0x30e2   :  { %3766 = vpow2.f32 %v3438_v37 }
0x30e6   :  { %v3765_v44 = vpop.eup %3764 }
0x30e7   :  { %3125 = vrot.lane.b32.xlu1 %v3765_v44, %s3892_s14 }
0x30e8   :  { %v3767_v36 = vpop.eup %3766 }
0x30e9   :  { %v3087_v5 = vadd.f32 1.0, %v3767_v36 }
0x30eb   :  { %3768 = vrcp.f32 %v3087_v5  ;;  %v3100_v46 = vand.u32 2147483648, %v3087_v5  ;;  %vm3094_vm4 = vweird.f32 %v3087_v5  ;;  %v3098_v52 = vand.u32 2147483647, %v3087_v5 }
0x30ed   :  { %v3101_v30 = vor.u32 1.1754944e-38, %v3100_v46  ;;  %vm3099_vm6 = vcmp.eq.f32.partialorder %v3098_v52, 8.507059e+37  ;;  %v3262_v46 = vld [vmem:[%s5151_s4 + $0x8] sm:$0xff]  ;;  %v3261_v52 = vld [vmem:[%s5151_s4] sm:$0xff] }
0x30f1   :  { %v3769_v26 = vpop.eup %3768 }
0x30f2   :  { %v3090_v20 = vmul.f32 %v3769_v26, %v3087_v5  ;;  %vm3095_vm1 = vweird.f32 %v3769_v26  ;;  %v3266_v5 = vld [vmem:[%s5151_s4 + $0x28] sm:$0xff] }
0x30f3   :  { %vm3096_vm5 = vmor %vm3094_vm4, %vm3095_vm1  ;;  %3287 = vmatpush.msrb.mxu2 %v3266_v5 }
0x30f4   :  { %v3091_v1 = vsub.f32 1.0, %v3090_v20  ;;  %v3264_v20 = vld [vmem:[%s5151_s4 + $0x18] sm:$0xff] }
0x30f6   :  { %v3092_v51 = vmul.f32 %v3769_v26, %v3091_v1 }
0x30f8   :  { %v3093_v10 = vadd.f32 %v3769_v26, %v3092_v51  ;;  %v3263_v51 = vld [vmem:[%s5151_s4 + $0x10] sm:$0xff] }
0x30fa   :  { %v3097_v9 = vsel %vm3096_vm5, %v3769_v26, %v3093_v10  ;;  %v3265_v26 = vld [vmem:[%s5151_s4 + $0x20] sm:$0xff]  ;;  %vm3297_vm5 = vcmask 74752  }
0x30fb   :  { %v3102_v53 = vsel %vm3099_vm6, %v3101_v30, %v3097_v9  ;;  %3288 = vmatpush.msrb.mxu2 %v3265_v26 }
0x30fc   :  { %v3123_v54 = vmul.f32 %v3121_v15, %v3102_v53 }
0x30fd   :  { %3289 = vmatpush.msrb.mxu2 %v3264_v20 }
0x30ff   :  { %3290 = vmatpush.msrb.mxu2 %v3263_v51 }
0x3101   :  { %3291 = vmatpush.msrb.mxu2 %v3262_v46 }
0x3103   :  { %3292 = vmatpush.msrb.mxu2 %v3261_v52 }
0x3159   :  { %v3126_v14 = vpop.permute.xlu1 %3125 }
0x315a   :  { %v3128_v43 = vmul.f32 %v3126_v14, %v3102_v53 }
0x315c   :  { %3130 = vrot.lane.b32.xlu2 %v3128_v43, %s3892_s14 }
0x31b6   :  { %v3131_v39 = vpop.permute.xlu2 %3130 }
0x31b7   :  { %v5103_v25 = vadd.f32 %v3131_v39, %v3123_v54 }
0x31b9   :  { %3770 = vtanh.f32 %v5103_v25  ;;  %v3232_v44 = vrot.slane %v5103_v25, 6 }
0x31ba   :  { %3772 = vpow2.f32 %v3439_v0 }
0x31bf   :  { %v3771_v2 = vpop.eup %3770 }
0x31c0   :  { %3136 = vrot.lane.b32.xlu0 %v3771_v2, %s3892_s14  ;;  %v3773_v32 = vpop.eup %3772 }
0x31c1   :  { %v3088_v22 = vadd.f32 1.0, %v3773_v32 }
0x31c3   :  { %3774 = vrcp.f32 %v3088_v22  ;;  %v3115_v11 = vand.u32 2147483648, %v3088_v22  ;;  %vm3109_vm8 = vweird.f32 %v3088_v22  ;;  %v3113_v58 = vand.u32 2147483647, %v3088_v22 }
0x31c5   :  { %v3116_v18 = vor.u32 1.1754944e-38, %v3115_v11  ;;  %vm3114_vm10 = vcmp.eq.f32.partialorder %v3113_v58, 8.507059e+37 }
0x31c9   :  { %v3775_v4 = vpop.eup %3774 }
0x31ca   :  { %v3105_v7 = vmul.f32 %v3775_v4, %v3088_v22  ;;  %vm3110_vm7 = vweird.f32 %v3775_v4 }
0x31cb   :  { %vm3111_vm9 = vmor %vm3109_vm8, %vm3110_vm7 }
0x31cc   :  { %v3106_v49 = vsub.f32 1.0, %v3105_v7  ;;  %v3451_v7 = vld [vmem:[%s5152_s5] ss:$0 sm:$0xff] }
0x31ce   :  { %v3107_v12 = vmul.f32 %v3775_v4, %v3106_v49 }
0x31d0   :  { %v3108_v38 = vadd.f32 %v3775_v4, %v3107_v12 }
0x31d2   :  { %v3112_v13 = vsel %vm3111_vm9, %v3775_v4, %v3108_v38 }
0x31d3   :  { %v3117_v16 = vsel %vm3114_vm10, %v3116_v18, %v3112_v13 }
0x3232   :  { %v3137_v48 = vpop.permute.xlu0 %3136 }
0x3233   :  { %v3139_v42 = vmul.f32 %v3137_v48, %v3117_v16 }
0x3235   :  { %v3141_v29 = vrot.slane %v3139_v42, 4 }
0x3237   :  { %3440 = vmatmul.msk.f32.vlgmr.msrb.gmra.mxu0 %vm191_vm3, %v3141_v29  ;;  %3441 = vmatmul.msk.f32.vlgmr.msrb.gmra.mxu1 %vm191_vm3, %v3141_v29 }
0x32b4   :  { %v3181_v34 = vpop.f32.mrf.mxu1  ;;  %v3161_v59 = vpop.f32.mrf.mxu0 }
0x32b5   :  { %v3187_v61 = vrot.slane %v3181_v34, 2  ;;  %v3186_v56 = vrot.slane %v3161_v59, 2 }
0x32b7   :  { %v3191_v27 = vadd.f32 %v3187_v61, %v5079_v6  ;;  %v3190_v28 = vadd.f32 %v3186_v56, %v5085_v33 }
0x32b9   :  { %3776 = vtanh.f32 %v3191_v27  ;;  %v3442_v40 = vmul.f32 -1.442695, %v3190_v28  ;;  %v3443_v36 = vmul.f32 -1.442695, %v3191_v27 }
0x32bb   :  { %3778 = vpow2.f32 %v3442_v40 }
0x32bf   :  { %v3777_v31 = vpop.eup %3776 }
0x32c0   :  { %3236 = vrot.lane.b32.xlu1 %v3777_v31, %s3892_s14 }
0x32c1   :  { %v3779_v3 = vpop.eup %3778 }
0x32c2   :  { %v3198_v23 = vadd.f32 1.0, %v3779_v3 }
0x32c4   :  { %3780 = vrcp.f32 %v3198_v23  ;;  %v3211_v6 = vand.u32 2147483648, %v3198_v23  ;;  %vm3205_vm12 = vweird.f32 %v3198_v23  ;;  %v3209_v50 = vand.u32 2147483647, %v3198_v23 }
0x32c6   :  { %v3212_v19 = vor.u32 1.1754944e-38, %v3211_v6  ;;  %vm3210_vm2 = vcmp.eq.f32.partialorder %v3209_v50, 8.507059e+37 }
0x32ca   :  { %v3781_v55 = vpop.eup %3780 }
0x32cb   :  { %v3201_v57 = vmul.f32 %v3781_v55, %v3198_v23  ;;  %vm3206_vm11 = vweird.f32 %v3781_v55 }
0x32cc   :  { %vm3207_vm13 = vmor %vm3205_vm12, %vm3206_vm11 }
0x32cd   :  { %v3202_v8 = vsub.f32 1.0, %v3201_v57 }
0x32cf   :  { %v3203_v17 = vmul.f32 %v3781_v55, %v3202_v8 }
0x32d1   :  { %v3204_v35 = vadd.f32 %v3781_v55, %v3203_v17 }
0x32d3   :  { %v3208_v41 = vsel %vm3207_vm13, %v3781_v55, %v3204_v35 }
0x32d4   :  { %v3213_v33 = vsel %vm3210_vm2, %v3212_v19, %v3208_v41 }
0x32d5   :  { %v3234_v60 = vmul.f32 %v3232_v44, %v3213_v33 }
0x3332   :  { %v3237_v21 = vpop.permute.xlu1 %3236 }
0x3333   :  { %v3239_v62 = vmul.f32 %v3237_v21, %v3213_v33 }
0x3335   :  { %3241 = vrot.lane.b32.xlu2 %v3239_v62, %s3892_s14 }
0x338f   :  { %v3242_v24 = vpop.permute.xlu2 %3241 }
0x3390   :  { %v3244_v45 = vadd.f32 %v3242_v24, %v3234_v60 }
0x3392   :  { %3782 = vtanh.f32 %v3244_v45  ;;  %3254 = vrot.lane.b32.xlu1 %v3244_v45, %s3892_s14 }
0x3393   :  { %3784 = vpow2.f32 %v3443_v36 }
0x3398   :  { %v3783_v37 = vpop.eup %3782 }
0x3399   :  { %3247 = vrot.lane.b32.xlu0 %v3783_v37, %s3892_s14  ;;  %v3785_v1 = vpop.eup %3784 }
0x339a   :  { %v3199_v10 = vadd.f32 1.0, %v3785_v1 }
0x339c   :  { %3786 = vrcp.f32 %v3199_v10  ;;  %v3226_v54 = vand.u32 2147483648, %v3199_v10  ;;  %vm3220_vm0 = vweird.f32 %v3199_v10  ;;  %v3224_v39 = vand.u32 2147483647, %v3199_v10 }
0x339e   :  { %v3227_v2 = vor.u32 1.1754944e-38, %v3226_v54  ;;  %vm3225_vm4 = vcmp.eq.f32.partialorder %v3224_v39, 8.507059e+37 }
0x33a2   :  { %v3787_v9 = vpop.eup %3786 }
0x33a3   :  { %v3216_v30 = vmul.f32 %v3787_v9, %v3199_v10  ;;  %vm3221_vm15 = vweird.f32 %v3787_v9 }
0x33a4   :  { %vm3222_vm1 = vmor %vm3220_vm0, %vm3221_vm15 }
0x33a5   :  { %v3217_v14 = vsub.f32 1.0, %v3216_v30 }
0x33a7   :  { %v3218_v53 = vmul.f32 %v3787_v9, %v3217_v14 }
0x33a9   :  { %v3219_v15 = vadd.f32 %v3787_v9, %v3218_v53 }
0x33ab   :  { %v3223_v25 = vsel %vm3222_vm1, %v3787_v9, %v3219_v15 }
0x33ac   :  { %v3228_v0 = vsel %vm3225_vm4, %v3227_v2, %v3223_v25 }
0x3404   :  { %v3255_v43 = vpop.permute.xlu1 %3254 }
0x3405   :  { %3257 = vst.msk [vmem:[#allocation3 - $0x6] sm:$0xc0] %vm3251_vm14, %v3255_v43 }
0x340b   :  { %v3248_v32 = vpop.permute.xlu0 %3247 }
0x340c   :  { %v3250_v22 = vmul.f32 %v3248_v32, %v3228_v0 }
0x340e   :  { %3252 = vst.msk [vmem:[#allocation2 - $0x6] sm:$0xc0] %vm3251_vm14, %v3250_v22  ;;  %v3274_v4 = vrot.slane %v3250_v22, 6 }
0x3410   :  { %3444 = vmatmul.msk.f32.vlgmr.msrb.gmra.mxu2 %vm191_vm3, %v3274_v4 }
0x3493   :  { %v3294_v49 = vpop.f32.mrf.mxu2 }
0x3494   :  { %v3295_v12 = vadd.f32 %v3451_v7, %v3294_v49 }
0x3496   :  { %3298 = vst.msk [vmem:[#allocation7] sm:$0x3] %vm3297_vm5, %v3295_v12 }
0x3497   :  { %3309 = dma.vmem_to_hbm [thread:$0]  %s3305_s8, 32, %s3307_s11, [#allocation6]  }
0x3498   :  { %3886 = dma.done.wait [#allocation6], 32  }
0x3499   :  { %3887 = vsyncadd [#allocation6], 4294967264 }
0x349a   :  { %3314 = vsyncpa [#allocation5], 1 }
0x349b   :  { %3315 = vsyncpa [#allocation6], 1 }

</bundles_post_ra>
